<compile_context>
chip_gen: v5e
topology: v5e:2x2
jax: 0.10.0
libtpu: 0.0.40
codegen_flags: <defaults>
</compile_context>

<pallas_src>
import math

import jax
import jax.numpy as jnp
from jax.experimental import pallas as pl
from jax.experimental.pallas import tpu as pltpu


def _round_up(x, m):
    return ((x + m - 1) // m) * m


# --------------------------------------------------------------------------- #
# Kernel: one pallas_call == the whole T-step autoregressive decode.
# --------------------------------------------------------------------------- #
def _make_decoder_kernel(T, HP):
    """Build the decode kernel for a static number of steps T (fully unrolled)."""
    G = 3 * HP  # per-layer gate width (r|z|n), each gate on its own 128-lane block

    def kernel(xb_ref, h0_ref, wih1_ref, bgi1_ref, whh1_ref, bhh1n_ref,
               w2_ref, b2_ref, wo_ref, bo_ref,
               out_ref, hid_ref, h2s_ref):
        # xb_ref   : (T_PAD, IN_PAD) f32   per-step inputs (zero-padded rows/lanes)
        # h0_ref   : (1, HP) f32           initial hidden (zero-padded lanes)
        # wih1_ref : (IN_PAD, G) f32       layer-1 input weights (gate-aligned)
        # bgi1_ref : (1, G) f32            b_ih1 (all gates) + b_hh1 (r,z gates)
        # whh1_ref : (HP, G) f32           layer-1 hidden weights
        # bhh1n_ref: (1, HP) f32           b_hh1 for the n gate only
        # w2_ref   : (HP, 4*HP) f32        [Wih2+Whh2 (r)|(z)| Wih2_n | Whh2_n]
        # b2_ref   : (1, 4*HP) f32         [bi_r+bh_r | bi_z+bh_z | bi_n | bh_n]
        # wo_ref   : (HP, OUT_PAD) f32     output Linear weights
        # bo_ref   : (1, OUT_PAD) f32      output Linear bias
        # out_ref  : (T_PAD, OUT_PAD) f32  sigmoid(Linear(h2)) per step
        # hid_ref  : (1, HP) f32           final hidden state
        # h2s_ref  : (T_PAD, HP) f32 VMEM scratch staging per-step h2 rows

        # ---- Prologue (off the recurrent chain): batched layer-1 input proj.
        gi1_all = (jnp.dot(xb_ref[...], wih1_ref[...],
                           preferred_element_type=jnp.float32)
                   + bgi1_ref[...])                                   # (T_PAD, G)

        # Small loop-invariant bias rows (1-4 vregs): hoist once.
        bhh1n = bhh1n_ref[...]                                        # (1, HP)
        b2 = b2_ref[...]                                              # (1, 4*HP)

        h2s_ref[...] = jnp.zeros_like(h2s_ref)                        # pad rows -> 0

        # ---- Recurrence: fully unrolled static loop, hidden carried in vregs.
        # NOTE: the big weight operands are deliberately read inside the loop
        # (streamed from VMEM into the MXU) instead of being hoisted as values,
        # which would pin ~100+ vregs and force spill churn.
        h = h0_ref[...]                                               # (1, HP) f32
        for t in range(T):
            gi1 = gi1_all[t:t + 1, :]                                 # (1, G), static slice

            # Layer 1: only the hidden-side projection remains per step.
            gh1 = jnp.dot(h, whh1_ref[...],
                          preferred_element_type=jnp.float32)         # (1, G)
            r1 = jax.nn.sigmoid(gi1[:, 0:HP] + gh1[:, 0:HP])
            z1 = jax.nn.sigmoid(gi1[:, HP:2 * HP] + gh1[:, HP:2 * HP])
            n1 = jnp.tanh(gi1[:, 2 * HP:] + r1 * (gh1[:, 2 * HP:] + bhh1n))
            h1 = n1 + z1 * (h - n1)                                   # == (1-z)*n + z*h

            # Layer 2: input == hidden == h1, so one packed 4-tile push gives
            # [gi_r+gh_r | gi_z+gh_z | gi_n | gh_n].
            g2 = jnp.dot(h1, w2_ref[...],
                         preferred_element_type=jnp.float32) + b2     # (1, 4*HP)
            r2 = jax.nn.sigmoid(g2[:, 0:HP])
            z2 = jax.nn.sigmoid(g2[:, HP:2 * HP])
            n2 = jnp.tanh(g2[:, 2 * HP:3 * HP] + r2 * g2[:, 3 * HP:])
            h2 = n2 + z2 * (h1 - n2)

            h2s_ref[t:t + 1, :] = h2                                  # stage for out head
            h = h2

        # ---- Epilogue: batched output head, one lane-dense (T_PAD, OUT_PAD) store.
        logits = (jnp.dot(h2s_ref[...], wo_ref[...],
                          preferred_element_type=jnp.float32)
                  + bo_ref[...])
        out_ref[...] = jax.nn.sigmoid(logits)
        hid_ref[...] = h

    return kernel


# --------------------------------------------------------------------------- #
# Parameter initialisation & packing (host side, done once)
# --------------------------------------------------------------------------- #
def init_params(key, input_size, hidden_size, output_size):
    """PyTorch-shaped params, pre-transposed to (in_features, 3H) / (H, out)."""
    keys = jax.random.split(key, 10)
    k = 1.0 / math.sqrt(hidden_size)

    def u(kk, shape):
        return jax.random.uniform(kk, shape, jnp.float32, -k, k)

    return {
        "w_ih1": u(keys[0], (input_size, 3 * hidden_size)),
        "w_hh1": u(keys[1], (hidden_size, 3 * hidden_size)),
        "b_ih1": u(keys[2], (3 * hidden_size,)),
        "b_hh1": u(keys[3], (3 * hidden_size,)),
        "w_ih2": u(keys[4], (hidden_size, 3 * hidden_size)),
        "w_hh2": u(keys[5], (hidden_size, 3 * hidden_size)),
        "b_ih2": u(keys[6], (3 * hidden_size,)),
        "b_hh2": u(keys[7], (3 * hidden_size,)),
        "w_out": u(keys[8], (hidden_size, output_size)),
        "b_out": u(keys[9], (output_size,)),
    }


def pack_params(p, input_size, hidden_size, output_size):
    """Pad each gate to its own 128-lane block; pre-fold biases and layer-2 weights."""
    H = hidden_size
    HP = _round_up(H, 128)
    IN_PAD = _round_up(input_size, 128)
    OUT_PAD = _round_up(output_size, 128)
    G = 3 * HP

    def place_gates(w):
        # (rows, 3H), gate order (r,z,n) -> (rows, 3*HP), one 128-lane block per gate.
        rows = w.shape[0]
        out = jnp.zeros((rows, G), jnp.float32)
        for gidx in range(3):
            out = out.at[:, gidx * HP:gidx * HP + H].set(
                w[:, gidx * H:(gidx + 1) * H])
        return out

    # Layer 1, input side (hoisted out of the recurrence inside the kernel).
    w_ih1 = jnp.zeros((IN_PAD, G), jnp.float32).at[:input_size, :].set(
        place_gates(p["w_ih1"]))
    b_ih1 = place_gates(p["b_ih1"].reshape(1, -1))
    b_hh1 = place_gates(p["b_hh1"].reshape(1, -1))
    # GI1 bias: b_ih1 for all gates + b_hh1 for r/z; the n-gate hidden bias must
    # ride inside the per-step r * (gh_n + b_hh1_n) term.
    b_gi1 = b_ih1.at[:, :2 * HP].add(b_hh1[:, :2 * HP])
    b_hh1_n = b_hh1[:, 2 * HP:]

    # Layer 1, hidden side (per-step matmul, no bias needed for r/z).
    w_hh1 = jnp.zeros((HP, G), jnp.float32).at[:H, :].set(place_gates(p["w_hh1"]))

    # Layer 2: input == hidden == h1, so fold W_ih2 + W_hh2 for the r/z gates
    # and keep W_ih2_n / W_hh2_n separate (they enter the n gate differently).
    wi2, wh2 = place_gates(p["w_ih2"]), place_gates(p["w_hh2"])
    bi2 = place_gates(p["b_ih2"].reshape(1, -1))
    bh2 = place_gates(p["b_hh2"].reshape(1, -1))
    w2 = jnp.zeros((HP, G + HP), jnp.float32)
    w2 = w2.at[:H, :2 * HP].set((wi2 + wh2)[:, :2 * HP])
    w2 = w2.at[:H, 2 * HP:3 * HP].set(wi2[:, 2 * HP:])
    w2 = w2.at[:H, 3 * HP:].set(wh2[:, 2 * HP:])
    b2 = jnp.zeros((1, G + HP), jnp.float32)
    b2 = b2.at[:, :2 * HP].set(bi2[:, :2 * HP] + bh2[:, :2 * HP])
    b2 = b2.at[:, 2 * HP:3 * HP].set(bi2[:, 2 * HP:])
    b2 = b2.at[:, 3 * HP:].set(bh2[:, 2 * HP:])

    # Output head.
    w_out = jnp.zeros((HP, OUT_PAD), jnp.float32).at[:H, :output_size].set(p["w_out"])
    b_out = jnp.zeros((1, OUT_PAD), jnp.float32).at[:, :output_size].set(p["b_out"])

    return {
        "w_ih1": w_ih1, "b_gi1": b_gi1, "w_hh1": w_hh1, "b_hh1_n": b_hh1_n,
        "w2": w2, "b2": b2, "w_out": w_out, "b_out": b_out,
        "dims": dict(H=H, HP=HP, IN=input_size, IN_PAD=IN_PAD,
                     OUT=output_size, OUT_PAD=OUT_PAD),
    }


# --------------------------------------------------------------------------- #
# Wrappers
# --------------------------------------------------------------------------- #
def decoder_rnn_decode(xs, hidden, packed):
    """Run DecoderRNN.forward once per row of xs, carrying hidden across steps.

    xs: (T, input_size), hidden: (1, 1, H).
    Returns ((T, output_size), (1, 1, H)); row t is the module's output for
    input xs[t] given the hidden carried from step t-1.
    """
    d = packed["dims"]
    H, HP = d["H"], d["HP"]
    IN, IN_PAD = d["IN"], d["IN_PAD"]
    OUT, OUT_PAD = d["OUT"], d["OUT_PAD"]
    T = xs.shape[0]
    T_PAD = _round_up(T, 8)          # sublane-aligned staging / output slab
    G = 3 * HP

    xb = jnp.zeros((T_PAD, IN_PAD), jnp.float32).at[:T, :IN].set(
        xs.astype(jnp.float32).reshape(T, IN))
    h0 = jnp.zeros((1, HP), jnp.float32).at[:, :H].set(
        hidden.reshape(1, H).astype(jnp.float32))

    flops = 2 * (T_PAD * IN_PAD * G          # hoisted layer-1 input projection
                 + T * HP * G                # per-step layer-1 hidden projection
                 + T * HP * (G + HP)         # per-step packed layer-2 projection
                 + T_PAD * HP * OUT_PAD)     # batched output head
    transcendentals = T * 6 * HP + T_PAD * OUT_PAD
    bytes_accessed = 4 * (xb.size + h0.size + T_PAD * OUT_PAD + HP
                          + sum(int(packed[k].size) for k in
                                ("w_ih1", "b_gi1", "w_hh1", "b_hh1_n",
                                 "w2", "b2", "w_out", "b_out")))

    out_pad, h_final = pl.pallas_call(
        _make_decoder_kernel(T, HP),
        out_shape=(
            jax.ShapeDtypeStruct((T_PAD, OUT_PAD), jnp.float32),
            jax.ShapeDtypeStruct((1, HP), jnp.float32),
        ),
        scratch_shapes=[pltpu.VMEM((T_PAD, HP), jnp.float32)],
        cost_estimate=pl.CostEstimate(flops=int(flops),
                                      transcendentals=int(transcendentals),
                                      bytes_accessed=int(bytes_accessed)),
    )(xb, h0, packed["w_ih1"], packed["b_gi1"], packed["w_hh1"],
      packed["b_hh1_n"], packed["w2"], packed["b2"],
      packed["w_out"], packed["b_out"])

    return out_pad[:T, :OUT], h_final[:, :H].reshape(1, 1, H)


def decoder_rnn_forward(x, hidden, packed):
    """Exact single-step PyTorch signature: x is anything reshapeable to (1,1,-1)."""
    out, h_new = decoder_rnn_decode(x.reshape(1, -1), hidden, packed)
    return out, h_new


# --------------------------------------------------------------------------- #
# Pure-JAX reference (f32, unpacked weights), mirroring the PyTorch forward.
# --------------------------------------------------------------------------- #
def _reference_decode(xs, hidden, p):
    H = hidden.shape[-1]

    def gru_cell(x, h, wi, wh, bi, bh):
        gi = x @ wi + bi
        gh = h @ wh + bh
        r = jax.nn.sigmoid(gi[:, :H] + gh[:, :H])
        z = jax.nn.sigmoid(gi[:, H:2 * H] + gh[:, H:2 * H])
        n = jnp.tanh(gi[:, 2 * H:] + r * gh[:, 2 * H:])
        return (1.0 - z) * n + z * h

    h = hidden.reshape(1, H)
    outs = []
    for t in range(xs.shape[0]):
        x = xs[t].reshape(1, -1)
        h1 = gru_cell(x, h, p["w_ih1"], p["w_hh1"], p["b_ih1"], p["b_hh1"])
        h2 = gru_cell(h1, h1, p["w_ih2"], p["w_hh2"], p["b_ih2"], p["b_hh2"])
        outs.append(jax.nn.sigmoid(h2 @ p["w_out"] + p["b_out"]))
        h = h2
    return jnp.concatenate(outs, axis=0), h.reshape(1, 1, H)


if __name__ == "__main__":
    INPUT_SIZE = 48      # stands in for getTotalTokens()
    HIDDEN_SIZE = 32
    OUTPUT_SIZE = 16
    T = 8                # number of autoregressive decode steps

    root = jax.random.PRNGKey(0)
    k_params, k_x = jax.random.split(root, 2)

    params = init_params(k_params, INPUT_SIZE, HIDDEN_SIZE, OUTPUT_SIZE)
    packed = pack_params(params, INPUT_SIZE, HIDDEN_SIZE, OUTPUT_SIZE)

    xs = jax.random.normal(k_x, (T, INPUT_SIZE), jnp.float32)
    hidden0 = jnp.zeros((1, 1, HIDDEN_SIZE), jnp.float32)    # initHidden()

    outs, h_new = decoder_rnn_decode(xs, hidden0, packed)
    outs = jax.block_until_ready(outs)
    h_new = jax.block_until_ready(h_new)

    ref_outs, ref_h = _reference_decode(xs, hidden0, params)

    assert outs.shape == (T, OUTPUT_SIZE)
    assert h_new.shape == (1, 1, HIDDEN_SIZE)
    # Everything is f32 (MXU f32 multi-pass matmul); only EUP transcendental
    # approximation differences remain -> tight tolerance.
    assert jnp.allclose(outs, ref_outs, atol=5e-3, rtol=5e-3), \
        float(jnp.max(jnp.abs(outs - ref_outs)))
    assert jnp.allclose(h_new, ref_h, atol=5e-3, rtol=5e-3), \
        float(jnp.max(jnp.abs(h_new - ref_h)))

    # Single-step API (exact PyTorch forward signature) agrees with step 0.
    out1, h1 = decoder_rnn_forward(xs[0].reshape(1, 1, INPUT_SIZE), hidden0, packed)
    out1 = jax.block_until_ready(out1)
    assert out1.shape == (1, OUTPUT_SIZE) and h1.shape == (1, 1, HIDDEN_SIZE)
    assert jnp.allclose(out1, outs[0:1], atol=1e-5)

    print("KERNEL_OK")
</pallas_src>

<mosaic_0001>
module attributes {stable_mosaic.version = 11 : i64} {
  func.func @kernel(%arg0: memref<8x128xf32, #tpu.memory_space<vmem>>, %arg1: memref<1x128xf32, #tpu.memory_space<vmem>>, %arg2: memref<128x384xf32, #tpu.memory_space<vmem>>, %arg3: memref<1x384xf32, #tpu.memory_space<vmem>>, %arg4: memref<128x384xf32, #tpu.memory_space<vmem>>, %arg5: memref<1x128xf32, #tpu.memory_space<vmem>>, %arg6: memref<128x512xf32, #tpu.memory_space<vmem>>, %arg7: memref<1x512xf32, #tpu.memory_space<vmem>>, %arg8: memref<128x128xf32, #tpu.memory_space<vmem>>, %arg9: memref<1x128xf32, #tpu.memory_space<vmem>>, %arg10: memref<8x128xf32, #tpu.memory_space<vmem>>, %arg11: memref<1x128xf32, #tpu.memory_space<vmem>>, %arg12: memref<8x128xf32, #tpu.memory_space<vmem>>) attributes {dimension_semantics = [], scalar_prefetch = 0 : i64, scratch_operands = 1 : i64, tpu.core_type = #tpu.core_type<tc>} {
    %c0 = arith.constant 0 : index
    %c0_0 = arith.constant 0 : index
    %0 = vector.load %arg0[%c0, %c0_0] : memref<8x128xf32, #tpu.memory_space<vmem>>, vector<8x128xf32>
    %c0_1 = arith.constant 0 : index
    %c0_2 = arith.constant 0 : index
    %1 = vector.load %arg2[%c0_1, %c0_2] : memref<128x384xf32, #tpu.memory_space<vmem>>, vector<128x384xf32>
    %cst = arith.constant dense<0.000000e+00> : vector<8x384xf32>
    %2 = tpu.matmul %0, %1, %cst {dimension_numbers = #tpu.dot_dimension_numbers<[1], [0], [0], [1], [0, 0, 1, 1], [], []>} : vector<8x128xf32>, vector<128x384xf32>, vector<8x384xf32> -> vector<8x384xf32>
    %c0_3 = arith.constant 0 : index
    %c0_4 = arith.constant 0 : index
    %3 = vector.load %arg3[%c0_3, %c0_4] : memref<1x384xf32, #tpu.memory_space<vmem>>, vector<1x384xf32>
    %4 = vector.broadcast %3 : vector<1x384xf32> to vector<8x384xf32>
    %5 = arith.addf %2, %4 : vector<8x384xf32>
    %c0_5 = arith.constant 0 : index
    %c0_6 = arith.constant 0 : index
    %6 = vector.load %arg5[%c0_5, %c0_6] : memref<1x128xf32, #tpu.memory_space<vmem>>, vector<1x128xf32>
    %c0_7 = arith.constant 0 : index
    %c0_8 = arith.constant 0 : index
    %7 = vector.load %arg7[%c0_7, %c0_8] : memref<1x512xf32, #tpu.memory_space<vmem>>, vector<1x512xf32>
    %cst_9 = arith.constant 0.000000e+00 : f32
    %8 = vector.broadcast %cst_9 : f32 to vector<8x128xf32>
    %c0_10 = arith.constant 0 : index
    %c0_11 = arith.constant 0 : index
    %9 = vector.load %arg12[%c0_10, %c0_11] : memref<8x128xf32, #tpu.memory_space<vmem>>, vector<8x128xf32>
    tpu.vector_store %arg12[%c0_10, %c0_11], %8 {strides = array<i32>} : memref<8x128xf32, #tpu.memory_space<vmem>>, vector<8x128xf32>,
    %c0_12 = arith.constant 0 : index
    %c0_13 = arith.constant 0 : index
    %10 = vector.load %arg1[%c0_12, %c0_13] : memref<1x128xf32, #tpu.memory_space<vmem>>, vector<1x128xf32>
    %11 = vector.extract_strided_slice %5 {offsets = [0, 0], sizes = [1, 384], strides = [1, 1]} : vector<8x384xf32> to vector<1x384xf32>
    %c0_14 = arith.constant 0 : index
    %c0_15 = arith.constant 0 : index
    %12 = vector.load %arg4[%c0_14, %c0_15] : memref<128x384xf32, #tpu.memory_space<vmem>>, vector<128x384xf32>
    %cst_16 = arith.constant dense<0.000000e+00> : vector<1x384xf32>
    %13 = tpu.matmul %10, %12, %cst_16 {dimension_numbers = #tpu.dot_dimension_numbers<[1], [0], [0], [1], [0, 0, 1, 1], [], []>} : vector<1x128xf32>, vector<128x384xf32>, vector<1x384xf32> -> vector<1x384xf32>
    %14 = vector.extract_strided_slice %11 {offsets = [0, 0], sizes = [1, 128], strides = [1, 1]} : vector<1x384xf32> to vector<1x128xf32>
    %15 = vector.extract_strided_slice %13 {offsets = [0, 0], sizes = [1, 128], strides = [1, 1]} : vector<1x384xf32> to vector<1x128xf32>
    %16 = arith.addf %14, %15 : vector<1x128xf32>
    %17 = arith.negf %16 : vector<1x128xf32>
    %18 = math.exp %17 : vector<1x128xf32>
    %cst_17 = arith.constant 1.000000e+00 : f32
    %19 = vector.broadcast %cst_17 : f32 to vector<1x128xf32>
    %20 = arith.addf %19, %18 : vector<1x128xf32>
    %21 = arith.divf %19, %20 : vector<1x128xf32>
    %22 = vector.extract_strided_slice %11 {offsets = [0, 128], sizes = [1, 128], strides = [1, 1]} : vector<1x384xf32> to vector<1x128xf32>
    %23 = vector.extract_strided_slice %13 {offsets = [0, 128], sizes = [1, 128], strides = [1, 1]} : vector<1x384xf32> to vector<1x128xf32>
    %24 = arith.addf %22, %23 : vector<1x128xf32>
    %25 = arith.negf %24 : vector<1x128xf32>
    %26 = math.exp %25 : vector<1x128xf32>
    %cst_18 = arith.constant 1.000000e+00 : f32
    %27 = vector.broadcast %cst_18 : f32 to vector<1x128xf32>
    %28 = arith.addf %27, %26 : vector<1x128xf32>
    %29 = arith.divf %27, %28 : vector<1x128xf32>
    %30 = vector.extract_strided_slice %11 {offsets = [0, 256], sizes = [1, 128], strides = [1, 1]} : vector<1x384xf32> to vector<1x128xf32>
    %31 = vector.extract_strided_slice %13 {offsets = [0, 256], sizes = [1, 128], strides = [1, 1]} : vector<1x384xf32> to vector<1x128xf32>
    %32 = arith.addf %31, %6 : vector<1x128xf32>
    %33 = arith.mulf %21, %32 : vector<1x128xf32>
    %34 = arith.addf %30, %33 : vector<1x128xf32>
    %35 = math.tanh %34 : vector<1x128xf32>
    %36 = arith.subf %10, %35 : vector<1x128xf32>
    %37 = arith.mulf %29, %36 : vector<1x128xf32>
    %38 = arith.addf %35, %37 : vector<1x128xf32>
    %c0_19 = arith.constant 0 : index
    %c0_20 = arith.constant 0 : index
    %39 = vector.load %arg6[%c0_19, %c0_20] : memref<128x512xf32, #tpu.memory_space<vmem>>, vector<128x512xf32>
    %cst_21 = arith.constant dense<0.000000e+00> : vector<1x512xf32>
    %40 = tpu.matmul %38, %39, %cst_21 {dimension_numbers = #tpu.dot_dimension_numbers<[1], [0], [0], [1], [0, 0, 1, 1], [], []>} : vector<1x128xf32>, vector<128x512xf32>, vector<1x512xf32> -> vector<1x512xf32>
    %41 = arith.addf %40, %7 : vector<1x512xf32>
    %42 = vector.extract_strided_slice %41 {offsets = [0, 0], sizes = [1, 128], strides = [1, 1]} : vector<1x512xf32> to vector<1x128xf32>
    %43 = arith.negf %42 : vector<1x128xf32>
    %44 = math.exp %43 : vector<1x128xf32>
    %cst_22 = arith.constant 1.000000e+00 : f32
    %45 = vector.broadcast %cst_22 : f32 to vector<1x128xf32>
    %46 = arith.addf %45, %44 : vector<1x128xf32>
    %47 = arith.divf %45, %46 : vector<1x128xf32>
    %48 = vector.extract_strided_slice %41 {offsets = [0, 128], sizes = [1, 128], strides = [1, 1]} : vector<1x512xf32> to vector<1x128xf32>
    %49 = arith.negf %48 : vector<1x128xf32>
    %50 = math.exp %49 : vector<1x128xf32>
    %cst_23 = arith.constant 1.000000e+00 : f32
    %51 = vector.broadcast %cst_23 : f32 to vector<1x128xf32>
    %52 = arith.addf %51, %50 : vector<1x128xf32>
    %53 = arith.divf %51, %52 : vector<1x128xf32>
    %54 = vector.extract_strided_slice %41 {offsets = [0, 256], sizes = [1, 128], strides = [1, 1]} : vector<1x512xf32> to vector<1x128xf32>
    %55 = vector.extract_strided_slice %41 {offsets = [0, 384], sizes = [1, 128], strides = [1, 1]} : vector<1x512xf32> to vector<1x128xf32>
    %56 = arith.mulf %47, %55 : vector<1x128xf32>
    %57 = arith.addf %54, %56 : vector<1x128xf32>
    %58 = math.tanh %57 : vector<1x128xf32>
    %59 = arith.subf %38, %58 : vector<1x128xf32>
    %60 = arith.mulf %53, %59 : vector<1x128xf32>
    %61 = arith.addf %58, %60 : vector<1x128xf32>
    %c0_24 = arith.constant 0 : index
    %c0_25 = arith.constant 0 : index
    %62 = vector.load %arg12[%c0_24, %c0_25] : memref<8x128xf32, #tpu.memory_space<vmem>>, vector<1x128xf32>
    tpu.vector_store %arg12[%c0_24, %c0_25], %61 {strides = array<i32>} : memref<8x128xf32, #tpu.memory_space<vmem>>, vector<1x128xf32>,
    %63 = vector.extract_strided_slice %5 {offsets = [1, 0], sizes = [1, 384], strides = [1, 1]} : vector<8x384xf32> to vector<1x384xf32>
    %c0_26 = arith.constant 0 : index
    %c0_27 = arith.constant 0 : index
    %64 = vector.load %arg4[%c0_26, %c0_27] : memref<128x384xf32, #tpu.memory_space<vmem>>, vector<128x384xf32>
    %cst_28 = arith.constant dense<0.000000e+00> : vector<1x384xf32>
    %65 = tpu.matmul %61, %64, %cst_28 {dimension_numbers = #tpu.dot_dimension_numbers<[1], [0], [0], [1], [0, 0, 1, 1], [], []>} : vector<1x128xf32>, vector<128x384xf32>, vector<1x384xf32> -> vector<1x384xf32>
    %66 = vector.extract_strided_slice %63 {offsets = [0, 0], sizes = [1, 128], strides = [1, 1]} : vector<1x384xf32> to vector<1x128xf32>
    %67 = vector.extract_strided_slice %65 {offsets = [0, 0], sizes = [1, 128], strides = [1, 1]} : vector<1x384xf32> to vector<1x128xf32>
    %68 = arith.addf %66, %67 : vector<1x128xf32>
    %69 = arith.negf %68 : vector<1x128xf32>
    %70 = math.exp %69 : vector<1x128xf32>
    %cst_29 = arith.constant 1.000000e+00 : f32
    %71 = vector.broadcast %cst_29 : f32 to vector<1x128xf32>
    %72 = arith.addf %71, %70 : vector<1x128xf32>
    %73 = arith.divf %71, %72 : vector<1x128xf32>
    %74 = vector.extract_strided_slice %63 {offsets = [0, 128], sizes = [1, 128], strides = [1, 1]} : vector<1x384xf32> to vector<1x128xf32>
    %75 = vector.extract_strided_slice %65 {offsets = [0, 128], sizes = [1, 128], strides = [1, 1]} : vector<1x384xf32> to vector<1x128xf32>
    %76 = arith.addf %74, %75 : vector<1x128xf32>
    %77 = arith.negf %76 : vector<1x128xf32>
    %78 = math.exp %77 : vector<1x128xf32>
    %cst_30 = arith.constant 1.000000e+00 : f32
    %79 = vector.broadcast %cst_30 : f32 to vector<1x128xf32>
    %80 = arith.addf %79, %78 : vector<1x128xf32>
    %81 = arith.divf %79, %80 : vector<1x128xf32>
    %82 = vector.extract_strided_slice %63 {offsets = [0, 256], sizes = [1, 128], strides = [1, 1]} : vector<1x384xf32> to vector<1x128xf32>
    %83 = vector.extract_strided_slice %65 {offsets = [0, 256], sizes = [1, 128], strides = [1, 1]} : vector<1x384xf32> to vector<1x128xf32>
    %84 = arith.addf %83, %6 : vector<1x128xf32>
    %85 = arith.mulf %73, %84 : vector<1x128xf32>
    %86 = arith.addf %82, %85 : vector<1x128xf32>
    %87 = math.tanh %86 : vector<1x128xf32>
    %88 = arith.subf %61, %87 : vector<1x128xf32>
    %89 = arith.mulf %81, %88 : vector<1x128xf32>
    %90 = arith.addf %87, %89 : vector<1x128xf32>
    %c0_31 = arith.constant 0 : index
    %c0_32 = arith.constant 0 : index
    %91 = vector.load %arg6[%c0_31, %c0_32] : memref<128x512xf32, #tpu.memory_space<vmem>>, vector<128x512xf32>
    %cst_33 = arith.constant dense<0.000000e+00> : vector<1x512xf32>
    %92 = tpu.matmul %90, %91, %cst_33 {dimension_numbers = #tpu.dot_dimension_numbers<[1], [0], [0], [1], [0, 0, 1, 1], [], []>} : vector<1x128xf32>, vector<128x512xf32>, vector<1x512xf32> -> vector<1x512xf32>
    %93 = arith.addf %92, %7 : vector<1x512xf32>
    %94 = vector.extract_strided_slice %93 {offsets = [0, 0], sizes = [1, 128], strides = [1, 1]} : vector<1x512xf32> to vector<1x128xf32>
    %95 = arith.negf %94 : vector<1x128xf32>
    %96 = math.exp %95 : vector<1x128xf32>
    %cst_34 = arith.constant 1.000000e+00 : f32
    %97 = vector.broadcast %cst_34 : f32 to vector<1x128xf32>
    %98 = arith.addf %97, %96 : vector<1x128xf32>
    %99 = arith.divf %97, %98 : vector<1x128xf32>
    %100 = vector.extract_strided_slice %93 {offsets = [0, 128], sizes = [1, 128], strides = [1, 1]} : vector<1x512xf32> to vector<1x128xf32>
    %101 = arith.negf %100 : vector<1x128xf32>
    %102 = math.exp %101 : vector<1x128xf32>
    %cst_35 = arith.constant 1.000000e+00 : f32
    %103 = vector.broadcast %cst_35 : f32 to vector<1x128xf32>
    %104 = arith.addf %103, %102 : vector<1x128xf32>
    %105 = arith.divf %103, %104 : vector<1x128xf32>
    %106 = vector.extract_strided_slice %93 {offsets = [0, 256], sizes = [1, 128], strides = [1, 1]} : vector<1x512xf32> to vector<1x128xf32>
    %107 = vector.extract_strided_slice %93 {offsets = [0, 384], sizes = [1, 128], strides = [1, 1]} : vector<1x512xf32> to vector<1x128xf32>
    %108 = arith.mulf %99, %107 : vector<1x128xf32>
    %109 = arith.addf %106, %108 : vector<1x128xf32>
    %110 = math.tanh %109 : vector<1x128xf32>
    %111 = arith.subf %90, %110 : vector<1x128xf32>
    %112 = arith.mulf %105, %111 : vector<1x128xf32>
    %113 = arith.addf %110, %112 : vector<1x128xf32>
    %c1 = arith.constant 1 : index
    %c0_36 = arith.constant 0 : index
    %114 = vector.load %arg12[%c1, %c0_36] : memref<8x128xf32, #tpu.memory_space<vmem>>, vector<1x128xf32>
    tpu.vector_store %arg12[%c1, %c0_36], %113 {strides = array<i32>} : memref<8x128xf32, #tpu.memory_space<vmem>>, vector<1x128xf32>,
    %115 = vector.extract_strided_slice %5 {offsets = [2, 0], sizes = [1, 384], strides = [1, 1]} : vector<8x384xf32> to vector<1x384xf32>
    %c0_37 = arith.constant 0 : index
    %c0_38 = arith.constant 0 : index
    %116 = vector.load %arg4[%c0_37, %c0_38] : memref<128x384xf32, #tpu.memory_space<vmem>>, vector<128x384xf32>
    %cst_39 = arith.constant dense<0.000000e+00> : vector<1x384xf32>
    %117 = tpu.matmul %113, %116, %cst_39 {dimension_numbers = #tpu.dot_dimension_numbers<[1], [0], [0], [1], [0, 0, 1, 1], [], []>} : vector<1x128xf32>, vector<128x384xf32>, vector<1x384xf32> -> vector<1x384xf32>
    %118 = vector.extract_strided_slice %115 {offsets = [0, 0], sizes = [1, 128], strides = [1, 1]} : vector<1x384xf32> to vector<1x128xf32>
    %119 = vector.extract_strided_slice %117 {offsets = [0, 0], sizes = [1, 128], strides = [1, 1]} : vector<1x384xf32> to vector<1x128xf32>
    %120 = arith.addf %118, %119 : vector<1x128xf32>
    %121 = arith.negf %120 : vector<1x128xf32>
    %122 = math.exp %121 : vector<1x128xf32>
    %cst_40 = arith.constant 1.000000e+00 : f32
    %123 = vector.broadcast %cst_40 : f32 to vector<1x128xf32>
    %124 = arith.addf %123, %122 : vector<1x128xf32>
    %125 = arith.divf %123, %124 : vector<1x128xf32>
    %126 = vector.extract_strided_slice %115 {offsets = [0, 128], sizes = [1, 128], strides = [1, 1]} : vector<1x384xf32> to vector<1x128xf32>
    %127 = vector.extract_strided_slice %117 {offsets = [0, 128], sizes = [1, 128], strides = [1, 1]} : vector<1x384xf32> to vector<1x128xf32>
    %128 = arith.addf %126, %127 : vector<1x128xf32>
    %129 = arith.negf %128 : vector<1x128xf32>
    %130 = math.exp %129 : vector<1x128xf32>
    %cst_41 = arith.constant 1.000000e+00 : f32
    %131 = vector.broadcast %cst_41 : f32 to vector<1x128xf32>
    %132 = arith.addf %131, %130 : vector<1x128xf32>
    %133 = arith.divf %131, %132 : vector<1x128xf32>
    %134 = vector.extract_strided_slice %115 {offsets = [0, 256], sizes = [1, 128], strides = [1, 1]} : vector<1x384xf32> to vector<1x128xf32>
    %135 = vector.extract_strided_slice %117 {offsets = [0, 256], sizes = [1, 128], strides = [1, 1]} : vector<1x384xf32> to vector<1x128xf32>
    %136 = arith.addf %135, %6 : vector<1x128xf32>
    %137 = arith.mulf %125, %136 : vector<1x128xf32>
    %138 = arith.addf %134, %137 : vector<1x128xf32>
    %139 = math.tanh %138 : vector<1x128xf32>
    %140 = arith.subf %113, %139 : vector<1x128xf32>
    %141 = arith.mulf %133, %140 : vector<1x128xf32>
    %142 = arith.addf %139, %141 : vector<1x128xf32>
    %c0_42 = arith.constant 0 : index
    %c0_43 = arith.constant 0 : index
    %143 = vector.load %arg6[%c0_42, %c0_43] : memref<128x512xf32, #tpu.memory_space<vmem>>, vector<128x512xf32>
    %cst_44 = arith.constant dense<0.000000e+00> : vector<1x512xf32>
    %144 = tpu.matmul %142, %143, %cst_44 {dimension_numbers = #tpu.dot_dimension_numbers<[1], [0], [0], [1], [0, 0, 1, 1], [], []>} : vector<1x128xf32>, vector<128x512xf32>, vector<1x512xf32> -> vector<1x512xf32>
    %145 = arith.addf %144, %7 : vector<1x512xf32>
    %146 = vector.extract_strided_slice %145 {offsets = [0, 0], sizes = [1, 128], strides = [1, 1]} : vector<1x512xf32> to vector<1x128xf32>
    %147 = arith.negf %146 : vector<1x128xf32>
    %148 = math.exp %147 : vector<1x128xf32>
    %cst_45 = arith.constant 1.000000e+00 : f32
    %149 = vector.broadcast %cst_45 : f32 to vector<1x128xf32>
    %150 = arith.addf %149, %148 : vector<1x128xf32>
    %151 = arith.divf %149, %150 : vector<1x128xf32>
    %152 = vector.extract_strided_slice %145 {offsets = [0, 128], sizes = [1, 128], strides = [1, 1]} : vector<1x512xf32> to vector<1x128xf32>
    %153 = arith.negf %152 : vector<1x128xf32>
    %154 = math.exp %153 : vector<1x128xf32>
    %cst_46 = arith.constant 1.000000e+00 : f32
    %155 = vector.broadcast %cst_46 : f32 to vector<1x128xf32>
    %156 = arith.addf %155, %154 : vector<1x128xf32>
    %157 = arith.divf %155, %156 : vector<1x128xf32>
    %158 = vector.extract_strided_slice %145 {offsets = [0, 256], sizes = [1, 128], strides = [1, 1]} : vector<1x512xf32> to vector<1x128xf32>
    %159 = vector.extract_strided_slice %145 {offsets = [0, 384], sizes = [1, 128], strides = [1, 1]} : vector<1x512xf32> to vector<1x128xf32>
    %160 = arith.mulf %151, %159 : vector<1x128xf32>
    %161 = arith.addf %158, %160 : vector<1x128xf32>
    %162 = math.tanh %161 : vector<1x128xf32>
    %163 = arith.subf %142, %162 : vector<1x128xf32>
    %164 = arith.mulf %157, %163 : vector<1x128xf32>
    %165 = arith.addf %162, %164 : vector<1x128xf32>
    %c2 = arith.constant 2 : index
    %c0_47 = arith.constant 0 : index
    %166 = vector.load %arg12[%c2, %c0_47] : memref<8x128xf32, #tpu.memory_space<vmem>>, vector<1x128xf32>
    tpu.vector_store %arg12[%c2, %c0_47], %165 {strides = array<i32>} : memref<8x128xf32, #tpu.memory_space<vmem>>, vector<1x128xf32>,
    %167 = vector.extract_strided_slice %5 {offsets = [3, 0], sizes = [1, 384], strides = [1, 1]} : vector<8x384xf32> to vector<1x384xf32>
    %c0_48 = arith.constant 0 : index
    %c0_49 = arith.constant 0 : index
    %168 = vector.load %arg4[%c0_48, %c0_49] : memref<128x384xf32, #tpu.memory_space<vmem>>, vector<128x384xf32>
    %cst_50 = arith.constant dense<0.000000e+00> : vector<1x384xf32>
    %169 = tpu.matmul %165, %168, %cst_50 {dimension_numbers = #tpu.dot_dimension_numbers<[1], [0], [0], [1], [0, 0, 1, 1], [], []>} : vector<1x128xf32>, vector<128x384xf32>, vector<1x384xf32> -> vector<1x384xf32>
    %170 = vector.extract_strided_slice %167 {offsets = [0, 0], sizes = [1, 128], strides = [1, 1]} : vector<1x384xf32> to vector<1x128xf32>
    %171 = vector.extract_strided_slice %169 {offsets = [0, 0], sizes = [1, 128], strides = [1, 1]} : vector<1x384xf32> to vector<1x128xf32>
    %172 = arith.addf %170, %171 : vector<1x128xf32>
    %173 = arith.negf %172 : vector<1x128xf32>
    %174 = math.exp %173 : vector<1x128xf32>
    %cst_51 = arith.constant 1.000000e+00 : f32
    %175 = vector.broadcast %cst_51 : f32 to vector<1x128xf32>
    %176 = arith.addf %175, %174 : vector<1x128xf32>
    %177 = arith.divf %175, %176 : vector<1x128xf32>
    %178 = vector.extract_strided_slice %167 {offsets = [0, 128], sizes = [1, 128], strides = [1, 1]} : vector<1x384xf32> to vector<1x128xf32>
    %179 = vector.extract_strided_slice %169 {offsets = [0, 128], sizes = [1, 128], strides = [1, 1]} : vector<1x384xf32> to vector<1x128xf32>
    %180 = arith.addf %178, %179 : vector<1x128xf32>
    %181 = arith.negf %180 : vector<1x128xf32>
    %182 = math.exp %181 : vector<1x128xf32>
    %cst_52 = arith.constant 1.000000e+00 : f32
    %183 = vector.broadcast %cst_52 : f32 to vector<1x128xf32>
    %184 = arith.addf %183, %182 : vector<1x128xf32>
    %185 = arith.divf %183, %184 : vector<1x128xf32>
    %186 = vector.extract_strided_slice %167 {offsets = [0, 256], sizes = [1, 128], strides = [1, 1]} : vector<1x384xf32> to vector<1x128xf32>
    %187 = vector.extract_strided_slice %169 {offsets = [0, 256], sizes = [1, 128], strides = [1, 1]} : vector<1x384xf32> to vector<1x128xf32>
    %188 = arith.addf %187, %6 : vector<1x128xf32>
    %189 = arith.mulf %177, %188 : vector<1x128xf32>
    %190 = arith.addf %186, %189 : vector<1x128xf32>
    %191 = math.tanh %190 : vector<1x128xf32>
    %192 = arith.subf %165, %191 : vector<1x128xf32>
    %193 = arith.mulf %185, %192 : vector<1x128xf32>
    %194 = arith.addf %191, %193 : vector<1x128xf32>
    %c0_53 = arith.constant 0 : index
    %c0_54 = arith.constant 0 : index
    %195 = vector.load %arg6[%c0_53, %c0_54] : memref<128x512xf32, #tpu.memory_space<vmem>>, vector<128x512xf32>
    %cst_55 = arith.constant dense<0.000000e+00> : vector<1x512xf32>
    %196 = tpu.matmul %194, %195, %cst_55 {dimension_numbers = #tpu.dot_dimension_numbers<[1], [0], [0], [1], [0, 0, 1, 1], [], []>} : vector<1x128xf32>, vector<128x512xf32>, vector<1x512xf32> -> vector<1x512xf32>
    %197 = arith.addf %196, %7 : vector<1x512xf32>
    %198 = vector.extract_strided_slice %197 {offsets = [0, 0], sizes = [1, 128], strides = [1, 1]} : vector<1x512xf32> to vector<1x128xf32>
    %199 = arith.negf %198 : vector<1x128xf32>
    %200 = math.exp %199 : vector<1x128xf32>
    %cst_56 = arith.constant 1.000000e+00 : f32
    %201 = vector.broadcast %cst_56 : f32 to vector<1x128xf32>
    %202 = arith.addf %201, %200 : vector<1x128xf32>
    %203 = arith.divf %201, %202 : vector<1x128xf32>
    %204 = vector.extract_strided_slice %197 {offsets = [0, 128], sizes = [1, 128], strides = [1, 1]} : vector<1x512xf32> to vector<1x128xf32>
    %205 = arith.negf %204 : vector<1x128xf32>
    %206 = math.exp %205 : vector<1x128xf32>
    %cst_57 = arith.constant 1.000000e+00 : f32
    %207 = vector.broadcast %cst_57 : f32 to vector<1x128xf32>
    %208 = arith.addf %207, %206 : vector<1x128xf32>
    %209 = arith.divf %207, %208 : vector<1x128xf32>
    %210 = vector.extract_strided_slice %197 {offsets = [0, 256], sizes = [1, 128], strides = [1, 1]} : vector<1x512xf32> to vector<1x128xf32>
    %211 = vector.extract_strided_slice %197 {offsets = [0, 384], sizes = [1, 128], strides = [1, 1]} : vector<1x512xf32> to vector<1x128xf32>
    %212 = arith.mulf %203, %211 : vector<1x128xf32>
    %213 = arith.addf %210, %212 : vector<1x128xf32>
    %214 = math.tanh %213 : vector<1x128xf32>
    %215 = arith.subf %194, %214 : vector<1x128xf32>
    %216 = arith.mulf %209, %215 : vector<1x128xf32>
    %217 = arith.addf %214, %216 : vector<1x128xf32>
    %c3 = arith.constant 3 : index
    %c0_58 = arith.constant 0 : index
    %218 = vector.load %arg12[%c3, %c0_58] : memref<8x128xf32, #tpu.memory_space<vmem>>, vector<1x128xf32>
    tpu.vector_store %arg12[%c3, %c0_58], %217 {strides = array<i32>} : memref<8x128xf32, #tpu.memory_space<vmem>>, vector<1x128xf32>,
    %219 = vector.extract_strided_slice %5 {offsets = [4, 0], sizes = [1, 384], strides = [1, 1]} : vector<8x384xf32> to vector<1x384xf32>
    %c0_59 = arith.constant 0 : index
    %c0_60 = arith.constant 0 : index
    %220 = vector.load %arg4[%c0_59, %c0_60] : memref<128x384xf32, #tpu.memory_space<vmem>>, vector<128x384xf32>
    %cst_61 = arith.constant dense<0.000000e+00> : vector<1x384xf32>
    %221 = tpu.matmul %217, %220, %cst_61 {dimension_numbers = #tpu.dot_dimension_numbers<[1], [0], [0], [1], [0, 0, 1, 1], [], []>} : vector<1x128xf32>, vector<128x384xf32>, vector<1x384xf32> -> vector<1x384xf32>
    %222 = vector.extract_strided_slice %219 {offsets = [0, 0], sizes = [1, 128], strides = [1, 1]} : vector<1x384xf32> to vector<1x128xf32>
    %223 = vector.extract_strided_slice %221 {offsets = [0, 0], sizes = [1, 128], strides = [1, 1]} : vector<1x384xf32> to vector<1x128xf32>
    %224 = arith.addf %222, %223 : vector<1x128xf32>
    %225 = arith.negf %224 : vector<1x128xf32>
    %226 = math.exp %225 : vector<1x128xf32>
    %cst_62 = arith.constant 1.000000e+00 : f32
    %227 = vector.broadcast %cst_62 : f32 to vector<1x128xf32>
    %228 = arith.addf %227, %226 : vector<1x128xf32>
    %229 = arith.divf %227, %228 : vector<1x128xf32>
    %230 = vector.extract_strided_slice %219 {offsets = [0, 128], sizes = [1, 128], strides = [1, 1]} : vector<1x384xf32> to vector<1x128xf32>
    %231 = vector.extract_strided_slice %221 {offsets = [0, 128], sizes = [1, 128], strides = [1, 1]} : vector<1x384xf32> to vector<1x128xf32>
    %232 = arith.addf %230, %231 : vector<1x128xf32>
    %233 = arith.negf %232 : vector<1x128xf32>
    %234 = math.exp %233 : vector<1x128xf32>
    %cst_63 = arith.constant 1.000000e+00 : f32
    %235 = vector.broadcast %cst_63 : f32 to vector<1x128xf32>
    %236 = arith.addf %235, %234 : vector<1x128xf32>
    %237 = arith.divf %235, %236 : vector<1x128xf32>
    %238 = vector.extract_strided_slice %219 {offsets = [0, 256], sizes = [1, 128], strides = [1, 1]} : vector<1x384xf32> to vector<1x128xf32>
    %239 = vector.extract_strided_slice %221 {offsets = [0, 256], sizes = [1, 128], strides = [1, 1]} : vector<1x384xf32> to vector<1x128xf32>
    %240 = arith.addf %239, %6 : vector<1x128xf32>
    %241 = arith.mulf %229, %240 : vector<1x128xf32>
    %242 = arith.addf %238, %241 : vector<1x128xf32>
    %243 = math.tanh %242 : vector<1x128xf32>
    %244 = arith.subf %217, %243 : vector<1x128xf32>
    %245 = arith.mulf %237, %244 : vector<1x128xf32>
    %246 = arith.addf %243, %245 : vector<1x128xf32>
    %c0_64 = arith.constant 0 : index
    %c0_65 = arith.constant 0 : index
    %247 = vector.load %arg6[%c0_64, %c0_65] : memref<128x512xf32, #tpu.memory_space<vmem>>, vector<128x512xf32>
    %cst_66 = arith.constant dense<0.000000e+00> : vector<1x512xf32>
    %248 = tpu.matmul %246, %247, %cst_66 {dimension_numbers = #tpu.dot_dimension_numbers<[1], [0], [0], [1], [0, 0, 1, 1], [], []>} : vector<1x128xf32>, vector<128x512xf32>, vector<1x512xf32> -> vector<1x512xf32>
    %249 = arith.addf %248, %7 : vector<1x512xf32>
    %250 = vector.extract_strided_slice %249 {offsets = [0, 0], sizes = [1, 128], strides = [1, 1]} : vector<1x512xf32> to vector<1x128xf32>
    %251 = arith.negf %250 : vector<1x128xf32>
    %252 = math.exp %251 : vector<1x128xf32>
    %cst_67 = arith.constant 1.000000e+00 : f32
    %253 = vector.broadcast %cst_67 : f32 to vector<1x128xf32>
    %254 = arith.addf %253, %252 : vector<1x128xf32>
    %255 = arith.divf %253, %254 : vector<1x128xf32>
    %256 = vector.extract_strided_slice %249 {offsets = [0, 128], sizes = [1, 128], strides = [1, 1]} : vector<1x512xf32> to vector<1x128xf32>
    %257 = arith.negf %256 : vector<1x128xf32>
    %258 = math.exp %257 : vector<1x128xf32>
    %cst_68 = arith.constant 1.000000e+00 : f32
    %259 = vector.broadcast %cst_68 : f32 to vector<1x128xf32>
    %260 = arith.addf %259, %258 : vector<1x128xf32>
    %261 = arith.divf %259, %260 : vector<1x128xf32>
    %262 = vector.extract_strided_slice %249 {offsets = [0, 256], sizes = [1, 128], strides = [1, 1]} : vector<1x512xf32> to vector<1x128xf32>
    %263 = vector.extract_strided_slice %249 {offsets = [0, 384], sizes = [1, 128], strides = [1, 1]} : vector<1x512xf32> to vector<1x128xf32>
    %264 = arith.mulf %255, %263 : vector<1x128xf32>
    %265 = arith.addf %262, %264 : vector<1x128xf32>
    %266 = math.tanh %265 : vector<1x128xf32>
    %267 = arith.subf %246, %266 : vector<1x128xf32>
    %268 = arith.mulf %261, %267 : vector<1x128xf32>
    %269 = arith.addf %266, %268 : vector<1x128xf32>
    %c4 = arith.constant 4 : index
    %c0_69 = arith.constant 0 : index
    %270 = vector.load %arg12[%c4, %c0_69] : memref<8x128xf32, #tpu.memory_space<vmem>>, vector<1x128xf32>
    tpu.vector_store %arg12[%c4, %c0_69], %269 {strides = array<i32>} : memref<8x128xf32, #tpu.memory_space<vmem>>, vector<1x128xf32>,
    %271 = vector.extract_strided_slice %5 {offsets = [5, 0], sizes = [1, 384], strides = [1, 1]} : vector<8x384xf32> to vector<1x384xf32>
    %c0_70 = arith.constant 0 : index
    %c0_71 = arith.constant 0 : index
    %272 = vector.load %arg4[%c0_70, %c0_71] : memref<128x384xf32, #tpu.memory_space<vmem>>, vector<128x384xf32>
    %cst_72 = arith.constant dense<0.000000e+00> : vector<1x384xf32>
    %273 = tpu.matmul %269, %272, %cst_72 {dimension_numbers = #tpu.dot_dimension_numbers<[1], [0], [0], [1], [0, 0, 1, 1], [], []>} : vector<1x128xf32>, vector<128x384xf32>, vector<1x384xf32> -> vector<1x384xf32>
    %274 = vector.extract_strided_slice %271 {offsets = [0, 0], sizes = [1, 128], strides = [1, 1]} : vector<1x384xf32> to vector<1x128xf32>
    %275 = vector.extract_strided_slice %273 {offsets = [0, 0], sizes = [1, 128], strides = [1, 1]} : vector<1x384xf32> to vector<1x128xf32>
    %276 = arith.addf %274, %275 : vector<1x128xf32>
    %277 = arith.negf %276 : vector<1x128xf32>
    %278 = math.exp %277 : vector<1x128xf32>
    %cst_73 = arith.constant 1.000000e+00 : f32
    %279 = vector.broadcast %cst_73 : f32 to vector<1x128xf32>
    %280 = arith.addf %279, %278 : vector<1x128xf32>
    %281 = arith.divf %279, %280 : vector<1x128xf32>
    %282 = vector.extract_strided_slice %271 {offsets = [0, 128], sizes = [1, 128], strides = [1, 1]} : vector<1x384xf32> to vector<1x128xf32>
    %283 = vector.extract_strided_slice %273 {offsets = [0, 128], sizes = [1, 128], strides = [1, 1]} : vector<1x384xf32> to vector<1x128xf32>
    %284 = arith.addf %282, %283 : vector<1x128xf32>
    %285 = arith.negf %284 : vector<1x128xf32>
    %286 = math.exp %285 : vector<1x128xf32>
    %cst_74 = arith.constant 1.000000e+00 : f32
    %287 = vector.broadcast %cst_74 : f32 to vector<1x128xf32>
    %288 = arith.addf %287, %286 : vector<1x128xf32>
    %289 = arith.divf %287, %288 : vector<1x128xf32>
    %290 = vector.extract_strided_slice %271 {offsets = [0, 256], sizes = [1, 128], strides = [1, 1]} : vector<1x384xf32> to vector<1x128xf32>
    %291 = vector.extract_strided_slice %273 {offsets = [0, 256], sizes = [1, 128], strides = [1, 1]} : vector<1x384xf32> to vector<1x128xf32>
    %292 = arith.addf %291, %6 : vector<1x128xf32>
    %293 = arith.mulf %281, %292 : vector<1x128xf32>
    %294 = arith.addf %290, %293 : vector<1x128xf32>
    %295 = math.tanh %294 : vector<1x128xf32>
    %296 = arith.subf %269, %295 : vector<1x128xf32>
    %297 = arith.mulf %289, %296 : vector<1x128xf32>
    %298 = arith.addf %295, %297 : vector<1x128xf32>
    %c0_75 = arith.constant 0 : index
    %c0_76 = arith.constant 0 : index
    %299 = vector.load %arg6[%c0_75, %c0_76] : memref<128x512xf32, #tpu.memory_space<vmem>>, vector<128x512xf32>
    %cst_77 = arith.constant dense<0.000000e+00> : vector<1x512xf32>
    %300 = tpu.matmul %298, %299, %cst_77 {dimension_numbers = #tpu.dot_dimension_numbers<[1], [0], [0], [1], [0, 0, 1, 1], [], []>} : vector<1x128xf32>, vector<128x512xf32>, vector<1x512xf32> -> vector<1x512xf32>
    %301 = arith.addf %300, %7 : vector<1x512xf32>
    %302 = vector.extract_strided_slice %301 {offsets = [0, 0], sizes = [1, 128], strides = [1, 1]} : vector<1x512xf32> to vector<1x128xf32>
    %303 = arith.negf %302 : vector<1x128xf32>
    %304 = math.exp %303 : vector<1x128xf32>
    %cst_78 = arith.constant 1.000000e+00 : f32
    %305 = vector.broadcast %cst_78 : f32 to vector<1x128xf32>
    %306 = arith.addf %305, %304 : vector<1x128xf32>
    %307 = arith.divf %305, %306 : vector<1x128xf32>
    %308 = vector.extract_strided_slice %301 {offsets = [0, 128], sizes = [1, 128], strides = [1, 1]} : vector<1x512xf32> to vector<1x128xf32>
    %309 = arith.negf %308 : vector<1x128xf32>
    %310 = math.exp %309 : vector<1x128xf32>
    %cst_79 = arith.constant 1.000000e+00 : f32
    %311 = vector.broadcast %cst_79 : f32 to vector<1x128xf32>
    %312 = arith.addf %311, %310 : vector<1x128xf32>
    %313 = arith.divf %311, %312 : vector<1x128xf32>
    %314 = vector.extract_strided_slice %301 {offsets = [0, 256], sizes = [1, 128], strides = [1, 1]} : vector<1x512xf32> to vector<1x128xf32>
    %315 = vector.extract_strided_slice %301 {offsets = [0, 384], sizes = [1, 128], strides = [1, 1]} : vector<1x512xf32> to vector<1x128xf32>
    %316 = arith.mulf %307, %315 : vector<1x128xf32>
    %317 = arith.addf %314, %316 : vector<1x128xf32>
    %318 = math.tanh %317 : vector<1x128xf32>
    %319 = arith.subf %298, %318 : vector<1x128xf32>
    %320 = arith.mulf %313, %319 : vector<1x128xf32>
    %321 = arith.addf %318, %320 : vector<1x128xf32>
    %c5 = arith.constant 5 : index
    %c0_80 = arith.constant 0 : index
    %322 = vector.load %arg12[%c5, %c0_80] : memref<8x128xf32, #tpu.memory_space<vmem>>, vector<1x128xf32>
    tpu.vector_store %arg12[%c5, %c0_80], %321 {strides = array<i32>} : memref<8x128xf32, #tpu.memory_space<vmem>>, vector<1x128xf32>,
    %323 = vector.extract_strided_slice %5 {offsets = [6, 0], sizes = [1, 384], strides = [1, 1]} : vector<8x384xf32> to vector<1x384xf32>
    %c0_81 = arith.constant 0 : index
    %c0_82 = arith.constant 0 : index
    %324 = vector.load %arg4[%c0_81, %c0_82] : memref<128x384xf32, #tpu.memory_space<vmem>>, vector<128x384xf32>
    %cst_83 = arith.constant dense<0.000000e+00> : vector<1x384xf32>
    %325 = tpu.matmul %321, %324, %cst_83 {dimension_numbers = #tpu.dot_dimension_numbers<[1], [0], [0], [1], [0, 0, 1, 1], [], []>} : vector<1x128xf32>, vector<128x384xf32>, vector<1x384xf32> -> vector<1x384xf32>
    %326 = vector.extract_strided_slice %323 {offsets = [0, 0], sizes = [1, 128], strides = [1, 1]} : vector<1x384xf32> to vector<1x128xf32>
    %327 = vector.extract_strided_slice %325 {offsets = [0, 0], sizes = [1, 128], strides = [1, 1]} : vector<1x384xf32> to vector<1x128xf32>
    %328 = arith.addf %326, %327 : vector<1x128xf32>
    %329 = arith.negf %328 : vector<1x128xf32>
    %330 = math.exp %329 : vector<1x128xf32>
    %cst_84 = arith.constant 1.000000e+00 : f32
    %331 = vector.broadcast %cst_84 : f32 to vector<1x128xf32>
    %332 = arith.addf %331, %330 : vector<1x128xf32>
    %333 = arith.divf %331, %332 : vector<1x128xf32>
    %334 = vector.extract_strided_slice %323 {offsets = [0, 128], sizes = [1, 128], strides = [1, 1]} : vector<1x384xf32> to vector<1x128xf32>
    %335 = vector.extract_strided_slice %325 {offsets = [0, 128], sizes = [1, 128], strides = [1, 1]} : vector<1x384xf32> to vector<1x128xf32>
    %336 = arith.addf %334, %335 : vector<1x128xf32>
    %337 = arith.negf %336 : vector<1x128xf32>
    %338 = math.exp %337 : vector<1x128xf32>
    %cst_85 = arith.constant 1.000000e+00 : f32
    %339 = vector.broadcast %cst_85 : f32 to vector<1x128xf32>
    %340 = arith.addf %339, %338 : vector<1x128xf32>
    %341 = arith.divf %339, %340 : vector<1x128xf32>
    %342 = vector.extract_strided_slice %323 {offsets = [0, 256], sizes = [1, 128], strides = [1, 1]} : vector<1x384xf32> to vector<1x128xf32>
    %343 = vector.extract_strided_slice %325 {offsets = [0, 256], sizes = [1, 128], strides = [1, 1]} : vector<1x384xf32> to vector<1x128xf32>
    %344 = arith.addf %343, %6 : vector<1x128xf32>
    %345 = arith.mulf %333, %344 : vector<1x128xf32>
    %346 = arith.addf %342, %345 : vector<1x128xf32>
    %347 = math.tanh %346 : vector<1x128xf32>
    %348 = arith.subf %321, %347 : vector<1x128xf32>
    %349 = arith.mulf %341, %348 : vector<1x128xf32>
    %350 = arith.addf %347, %349 : vector<1x128xf32>
    %c0_86 = arith.constant 0 : index
    %c0_87 = arith.constant 0 : index
    %351 = vector.load %arg6[%c0_86, %c0_87] : memref<128x512xf32, #tpu.memory_space<vmem>>, vector<128x512xf32>
    %cst_88 = arith.constant dense<0.000000e+00> : vector<1x512xf32>
    %352 = tpu.matmul %350, %351, %cst_88 {dimension_numbers = #tpu.dot_dimension_numbers<[1], [0], [0], [1], [0, 0, 1, 1], [], []>} : vector<1x128xf32>, vector<128x512xf32>, vector<1x512xf32> -> vector<1x512xf32>
    %353 = arith.addf %352, %7 : vector<1x512xf32>
    %354 = vector.extract_strided_slice %353 {offsets = [0, 0], sizes = [1, 128], strides = [1, 1]} : vector<1x512xf32> to vector<1x128xf32>
    %355 = arith.negf %354 : vector<1x128xf32>
    %356 = math.exp %355 : vector<1x128xf32>
    %cst_89 = arith.constant 1.000000e+00 : f32
    %357 = vector.broadcast %cst_89 : f32 to vector<1x128xf32>
    %358 = arith.addf %357, %356 : vector<1x128xf32>
    %359 = arith.divf %357, %358 : vector<1x128xf32>
    %360 = vector.extract_strided_slice %353 {offsets = [0, 128], sizes = [1, 128], strides = [1, 1]} : vector<1x512xf32> to vector<1x128xf32>
    %361 = arith.negf %360 : vector<1x128xf32>
    %362 = math.exp %361 : vector<1x128xf32>
    %cst_90 = arith.constant 1.000000e+00 : f32
    %363 = vector.broadcast %cst_90 : f32 to vector<1x128xf32>
    %364 = arith.addf %363, %362 : vector<1x128xf32>
    %365 = arith.divf %363, %364 : vector<1x128xf32>
    %366 = vector.extract_strided_slice %353 {offsets = [0, 256], sizes = [1, 128], strides = [1, 1]} : vector<1x512xf32> to vector<1x128xf32>
    %367 = vector.extract_strided_slice %353 {offsets = [0, 384], sizes = [1, 128], strides = [1, 1]} : vector<1x512xf32> to vector<1x128xf32>
    %368 = arith.mulf %359, %367 : vector<1x128xf32>
    %369 = arith.addf %366, %368 : vector<1x128xf32>
    %370 = math.tanh %369 : vector<1x128xf32>
    %371 = arith.subf %350, %370 : vector<1x128xf32>
    %372 = arith.mulf %365, %371 : vector<1x128xf32>
    %373 = arith.addf %370, %372 : vector<1x128xf32>
    %c6 = arith.constant 6 : index
    %c0_91 = arith.constant 0 : index
    %374 = vector.load %arg12[%c6, %c0_91] : memref<8x128xf32, #tpu.memory_space<vmem>>, vector<1x128xf32>
    tpu.vector_store %arg12[%c6, %c0_91], %373 {strides = array<i32>} : memref<8x128xf32, #tpu.memory_space<vmem>>, vector<1x128xf32>,
    %375 = vector.extract_strided_slice %5 {offsets = [7, 0], sizes = [1, 384], strides = [1, 1]} : vector<8x384xf32> to vector<1x384xf32>
    %c0_92 = arith.constant 0 : index
    %c0_93 = arith.constant 0 : index
    %376 = vector.load %arg4[%c0_92, %c0_93] : memref<128x384xf32, #tpu.memory_space<vmem>>, vector<128x384xf32>
    %cst_94 = arith.constant dense<0.000000e+00> : vector<1x384xf32>
    %377 = tpu.matmul %373, %376, %cst_94 {dimension_numbers = #tpu.dot_dimension_numbers<[1], [0], [0], [1], [0, 0, 1, 1], [], []>} : vector<1x128xf32>, vector<128x384xf32>, vector<1x384xf32> -> vector<1x384xf32>
    %378 = vector.extract_strided_slice %375 {offsets = [0, 0], sizes = [1, 128], strides = [1, 1]} : vector<1x384xf32> to vector<1x128xf32>
    %379 = vector.extract_strided_slice %377 {offsets = [0, 0], sizes = [1, 128], strides = [1, 1]} : vector<1x384xf32> to vector<1x128xf32>
    %380 = arith.addf %378, %379 : vector<1x128xf32>
    %381 = arith.negf %380 : vector<1x128xf32>
    %382 = math.exp %381 : vector<1x128xf32>
    %cst_95 = arith.constant 1.000000e+00 : f32
    %383 = vector.broadcast %cst_95 : f32 to vector<1x128xf32>
    %384 = arith.addf %383, %382 : vector<1x128xf32>
    %385 = arith.divf %383, %384 : vector<1x128xf32>
    %386 = vector.extract_strided_slice %375 {offsets = [0, 128], sizes = [1, 128], strides = [1, 1]} : vector<1x384xf32> to vector<1x128xf32>
    %387 = vector.extract_strided_slice %377 {offsets = [0, 128], sizes = [1, 128], strides = [1, 1]} : vector<1x384xf32> to vector<1x128xf32>
    %388 = arith.addf %386, %387 : vector<1x128xf32>
    %389 = arith.negf %388 : vector<1x128xf32>
    %390 = math.exp %389 : vector<1x128xf32>
    %cst_96 = arith.constant 1.000000e+00 : f32
    %391 = vector.broadcast %cst_96 : f32 to vector<1x128xf32>
    %392 = arith.addf %391, %390 : vector<1x128xf32>
    %393 = arith.divf %391, %392 : vector<1x128xf32>
    %394 = vector.extract_strided_slice %375 {offsets = [0, 256], sizes = [1, 128], strides = [1, 1]} : vector<1x384xf32> to vector<1x128xf32>
    %395 = vector.extract_strided_slice %377 {offsets = [0, 256], sizes = [1, 128], strides = [1, 1]} : vector<1x384xf32> to vector<1x128xf32>
    %396 = arith.addf %395, %6 : vector<1x128xf32>
    %397 = arith.mulf %385, %396 : vector<1x128xf32>
    %398 = arith.addf %394, %397 : vector<1x128xf32>
    %399 = math.tanh %398 : vector<1x128xf32>
    %400 = arith.subf %373, %399 : vector<1x128xf32>
    %401 = arith.mulf %393, %400 : vector<1x128xf32>
    %402 = arith.addf %399, %401 : vector<1x128xf32>
    %c0_97 = arith.constant 0 : index
    %c0_98 = arith.constant 0 : index
    %403 = vector.load %arg6[%c0_97, %c0_98] : memref<128x512xf32, #tpu.memory_space<vmem>>, vector<128x512xf32>
    %cst_99 = arith.constant dense<0.000000e+00> : vector<1x512xf32>
    %404 = tpu.matmul %402, %403, %cst_99 {dimension_numbers = #tpu.dot_dimension_numbers<[1], [0], [0], [1], [0, 0, 1, 1], [], []>} : vector<1x128xf32>, vector<128x512xf32>, vector<1x512xf32> -> vector<1x512xf32>
    %405 = arith.addf %404, %7 : vector<1x512xf32>
    %406 = vector.extract_strided_slice %405 {offsets = [0, 0], sizes = [1, 128], strides = [1, 1]} : vector<1x512xf32> to vector<1x128xf32>
    %407 = arith.negf %406 : vector<1x128xf32>
    %408 = math.exp %407 : vector<1x128xf32>
    %cst_100 = arith.constant 1.000000e+00 : f32
    %409 = vector.broadcast %cst_100 : f32 to vector<1x128xf32>
    %410 = arith.addf %409, %408 : vector<1x128xf32>
    %411 = arith.divf %409, %410 : vector<1x128xf32>
    %412 = vector.extract_strided_slice %405 {offsets = [0, 128], sizes = [1, 128], strides = [1, 1]} : vector<1x512xf32> to vector<1x128xf32>
    %413 = arith.negf %412 : vector<1x128xf32>
    %414 = math.exp %413 : vector<1x128xf32>
    %cst_101 = arith.constant 1.000000e+00 : f32
    %415 = vector.broadcast %cst_101 : f32 to vector<1x128xf32>
    %416 = arith.addf %415, %414 : vector<1x128xf32>
    %417 = arith.divf %415, %416 : vector<1x128xf32>
    %418 = vector.extract_strided_slice %405 {offsets = [0, 256], sizes = [1, 128], strides = [1, 1]} : vector<1x512xf32> to vector<1x128xf32>
    %419 = vector.extract_strided_slice %405 {offsets = [0, 384], sizes = [1, 128], strides = [1, 1]} : vector<1x512xf32> to vector<1x128xf32>
    %420 = arith.mulf %411, %419 : vector<1x128xf32>
    %421 = arith.addf %418, %420 : vector<1x128xf32>
    %422 = math.tanh %421 : vector<1x128xf32>
    %423 = arith.subf %402, %422 : vector<1x128xf32>
    %424 = arith.mulf %417, %423 : vector<1x128xf32>
    %425 = arith.addf %422, %424 : vector<1x128xf32>
    %c7 = arith.constant 7 : index
    %c0_102 = arith.constant 0 : index
    %426 = vector.load %arg12[%c7, %c0_102] : memref<8x128xf32, #tpu.memory_space<vmem>>, vector<1x128xf32>
    tpu.vector_store %arg12[%c7, %c0_102], %425 {strides = array<i32>} : memref<8x128xf32, #tpu.memory_space<vmem>>, vector<1x128xf32>,
    %c0_103 = arith.constant 0 : index
    %c0_104 = arith.constant 0 : index
    %427 = vector.load %arg12[%c0_103, %c0_104] : memref<8x128xf32, #tpu.memory_space<vmem>>, vector<8x128xf32>
    %c0_105 = arith.constant 0 : index
    %c0_106 = arith.constant 0 : index
    %428 = vector.load %arg8[%c0_105, %c0_106] : memref<128x128xf32, #tpu.memory_space<vmem>>, vector<128x128xf32>
    %cst_107 = arith.constant dense<0.000000e+00> : vector<8x128xf32>
    %429 = tpu.matmul %427, %428, %cst_107 {dimension_numbers = #tpu.dot_dimension_numbers<[1], [0], [0], [1], [0, 0, 1, 1], [], []>} : vector<8x128xf32>, vector<128x128xf32>, vector<8x128xf32> -> vector<8x128xf32>
    %c0_108 = arith.constant 0 : index
    %c0_109 = arith.constant 0 : index
    %430 = vector.load %arg9[%c0_108, %c0_109] : memref<1x128xf32, #tpu.memory_space<vmem>>, vector<1x128xf32>
    %431 = vector.broadcast %430 : vector<1x128xf32> to vector<8x128xf32>
    %432 = arith.addf %429, %431 : vector<8x128xf32>
    %433 = arith.negf %432 : vector<8x128xf32>
    %434 = math.exp %433 : vector<8x128xf32>
    %cst_110 = arith.constant 1.000000e+00 : f32
    %435 = vector.broadcast %cst_110 : f32 to vector<8x128xf32>
    %436 = arith.addf %435, %434 : vector<8x128xf32>
    %437 = arith.divf %435, %436 : vector<8x128xf32>
    %c0_111 = arith.constant 0 : index
    %c0_112 = arith.constant 0 : index
    %438 = vector.load %arg10[%c0_111, %c0_112] : memref<8x128xf32, #tpu.memory_space<vmem>>, vector<8x128xf32>
    tpu.vector_store %arg10[%c0_111, %c0_112], %437 {strides = array<i32>} : memref<8x128xf32, #tpu.memory_space<vmem>>, vector<8x128xf32>,
    %c0_113 = arith.constant 0 : index
    %c0_114 = arith.constant 0 : index
    %439 = vector.load %arg11[%c0_113, %c0_114] : memref<1x128xf32, #tpu.memory_space<vmem>>, vector<1x128xf32>
    tpu.vector_store %arg11[%c0_113, %c0_114], %425 {strides = array<i32>} : memref<1x128xf32, #tpu.memory_space<vmem>>, vector<1x128xf32>,
    return
  }
}

</mosaic_0001>

<bundles_post_ra>
// kernel: tpu_custom_call.1
= control target key start
LH: loop header
LB: loop body
LE: loop exit
PB: predicated region body
PF: predicated region fallthrough
CT: control target
= control target key end

     0   :  { %17 = vsyncpa [#allocation4], 0  ;;  %s5891_s0 = inlined_call_operand.hbm [shape: f32[8,128], index: 0, kind: input, shape index: {}]   ;;  %s5892_s1 = inlined_call_operand.hbm [shape: f32[1,128], index: 1, kind: input, shape index: {}]   ;;  %s5893_s2 = inlined_call_operand.hbm [shape: f32[128,384], index: 2, kind: input, shape index: {}]   ;;  %s5894_s3 = inlined_call_operand.hbm [shape: f32[1,384], index: 3, kind: input, shape index: {}]   ;;  %s5895_s4 = inlined_call_operand.hbm [shape: f32[128,384], index: 4, kind: input, shape index: {}]   ;;  %s5896_s5 = inlined_call_operand.vmem [shape: f32[1,128], index: 5, kind: input, shape index: {}]   ;;  %s5897_s6 = inlined_call_operand.hbm [shape: f32[128,512], index: 6, kind: input, shape index: {}]   ;;  %s5898_s7 = inlined_call_operand.vmem [shape: f32[1,512], index: 7, kind: input, shape index: {}]   ;;  %s5899_s8 = inlined_call_operand.hbm [shape: f32[128,128], index: 8, kind: input, shape index: {}]   ;;  %s5900_s9 = inlined_call_operand.vmem [shape: f32[1,128], index: 9, kind: input, shape index: {}]   ;;  %s5901_s10 = inlined_call_operand.hbm [shape: f32[8,128], index: 10, kind: output, shape index: {0}]   ;;  %s5902_s11 = inlined_call_operand.hbm [shape: f32[1,128], index: 11, kind: output, shape index: {1}]  }
   0x1   :  { %18 = vsyncpa [#allocation7], 0 }
   0x2   :  { %19 = vsyncpa [#allocation10], 0 }
   0x3   :  { %20 = vsyncpa [#allocation13], 0 }
   0x4   :  { %21 = vsyncpa [#allocation5], 0  ;;  %s39_s19 = sshll.u32 %s5892_s1, 4  ;;  %s40_s19 = int_to_ptr.hbm [resolvable:$true] %s39_s19 }
   0x5   :  { %22 = vsyncpa [#allocation17], 0  ;;  %s3735_s20 = smov [#allocation6]   ;;  %s63_s24 = sshll.u32 %s5894_s3, 4  ;;  %s64_s24 = int_to_ptr.hbm [resolvable:$true] %s63_s24 }
   0x6   :  { %s41_s21 = sshll.u32 %s3735_s20, 4  ;;  %s3736_s25 = smov [#allocation9]   ;;  %s42_s21 = int_to_ptr.vmem [resolvable:$true] %s41_s21 }
   0x7   :  { %44 = dma.hbm_to_vmem [thread:$0]  %s40_s19, 16, %s42_s21, [#allocation7]  }
   0x8   :  { %s65_s26 = sshll.u32 %s3736_s25, 4  ;;  %s88_s29 = sshll.u32 %s5897_s6, 4  ;;  %s66_s26 = int_to_ptr.vmem [resolvable:$true] %s65_s26  ;;  %s89_s29 = int_to_ptr.hbm [resolvable:$true] %s88_s29 }
   0x9   :  { %68 = dma.hbm_to_vmem [thread:$0]  %s64_s24, 48, %s66_s26, [#allocation10]  }
   0xa   :  { %s3737_s1 = smov [#allocation12]   ;;  %s28_s14 = sshll.u32 %s5891_s0, 4  ;;  %s29_s14 = int_to_ptr.hbm [resolvable:$true] %s28_s14 }
   0xb   :  { %s90_s30 = sshll.u32 %s3737_s1, 4  ;;  %s3738_s15 = smov 512   ;;  %s91_s30 = int_to_ptr.vmem [resolvable:$true] %s90_s30 }
   0xc   :  { %s3739_s3 = smov 32   ;;  %s3740_s16 = smov [#allocation3]  }
   0xd   :  { %96 = dma.hbm_to_vmem [thread:$0]  %s89_s29, 8192, %s91_s30, [#allocation13], %s3738_s15, %s3738_s15, %s3739_s3  }
   0xe   :  { %s30_s17 = sshll.u32 %s3740_s16, 4  ;;  %s49_s6 = sshll.u32 %s5893_s2, 4  ;;  %s31_s17 = int_to_ptr.vmem [resolvable:$true] %s30_s17  ;;  %s50_s6 = int_to_ptr.hbm [resolvable:$true] %s49_s6 }
   0xf   :  { %33 = dma.hbm_to_vmem [thread:$0]  %s29_s14, 128, %s31_s17, [#allocation4]  }
  0x10   :  { %s3741_s20 = smov [#allocation8]   ;;  %s73_s0 = sshll.u32 %s5895_s4, 4  ;;  %s74_s0 = int_to_ptr.hbm [resolvable:$true] %s73_s0 }
  0x11   :  { %s51_s21 = sshll.u32 %s3741_s20, 4  ;;  %s3742_s24 = smov 384   ;;  %s52_s21 = int_to_ptr.vmem [resolvable:$true] %s51_s21 }
  0x12   :  { %s3743_s25 = smov 24   ;;  %s3744_s26 = smov [#allocation11]  }
  0x13   :  { %57 = dma.hbm_to_vmem [thread:$0]  %s50_s6, 6144, %s52_s21, [#allocation7], %s3742_s24, %s3742_s24, %s3743_s25  }
  0x14   :  { %s75_s27 = sshll.u32 %s3744_s26, 4  ;;  %s103_s2 = sshll.u32 %s5899_s8, 4  ;;  %s76_s27 = int_to_ptr.vmem [resolvable:$true] %s75_s27  ;;  %s104_s2 = int_to_ptr.hbm [resolvable:$true] %s103_s2 }
  0x15   :  { %81 = dma.hbm_to_vmem [thread:$0]  %s74_s0, 6144, %s76_s27, [#allocation10], %s3742_s24, %s3742_s24, %s3743_s25  }
  0x16   :  { %s3745_s1 = smov [#allocation14]   ;;  %s3746_s12 = smov 128  }
  0x17   :  { %s105_s30 = sshll.u32 %s3745_s1, 4  ;;  %s3747_s13 = smov 8   ;;  %s106_s30 = int_to_ptr.vmem [resolvable:$true] %s105_s30 }
  0x18   :  { %111 = dma.hbm_to_vmem [thread:$0]  %s104_s2, 2048, %s106_s30, [#allocation13], %s3746_s12, %s3746_s12, %s3747_s13  }
  0x19   :  { %3723 = dma.done.wait [#allocation4], 128  }
  0x1a   :  { %3724 = vsyncadd [#allocation4], 4294967168 }
  0x1b   :  { %3725 = dma.done.wait [#allocation7], 6160  }
  0x1c   :  { %3726 = vsyncadd [#allocation7], 4294961136 }
  0x1d   :  { %3727 = dma.done.wait [#allocation10], 6192  }
  0x1e   :  { %3728 = vsyncadd [#allocation10], 4294961104 }
  0x1f   :  { %3729 = dma.done.wait [#allocation13], 10240  }
  0x20   :  { %3730 = vsyncadd [#allocation13], 4294957056  ;;  %v188_v0 = vld [vmem:[#allocation8 + $0x168] sm:$0xff]  ;;  %v185_v2 = vld [vmem:[#allocation8 + $0x150] sm:$0xff]  ;;  %s3272_s22 = sshll.u32 %s5902_s11, 4  ;;  %s3750_s11 = smov [#allocation15]   ;;  %s3273_s22 = int_to_ptr.hbm [resolvable:$true] %s3272_s22 }
  0x21   :  { %v3832_v1 = vld [vmem:[#allocation11 + $0x168] sm:$0xff]  ;;  %199 = vmatpush.msra.mxu0 %v188_v0  ;;  %v3835_v3 = vld [vmem:[#allocation11 + $0x150] sm:$0xff]  ;;  %v3837_v6 = vld [vmem:[#allocation11 + $0x138] sm:$0xff]  ;;  %s3259_s24 = sshll.u32 %s3750_s11, 4  ;;  %s3260_s24 = int_to_ptr.vmem [resolvable:$true] %s3259_s24 }
  0x22   :  { %311 = vmatpush.msra.mxu3 %v3832_v1  ;;  %v189_v4 = vld [vmem:[#allocation8 + $0x170] sm:$0xff]  ;;  %v182_v5 = vld [vmem:[#allocation8 + $0x138] sm:$0xff]  ;;  %v183_v8 = vld [vmem:[#allocation8 + $0x140] sm:$0xff] }
  0x23   :  { %219 = vmatpush.msra.mxu1 %v189_v4  ;;  %v186_v7 = vld [vmem:[#allocation8 + $0x158] sm:$0xff]  ;;  %200 = vmatpush.msra.mxu0 %v185_v2  ;;  %v179_v9 = vld [vmem:[#allocation8 + $0x120] sm:$0xff]  ;;  %v180_v11 = vld [vmem:[#allocation8 + $0x128] sm:$0xff] }
  0x24   :  { %312 = vmatpush.msra.mxu3 %v3835_v3  ;;  %v3840_v10 = vld [vmem:[#allocation11 + $0x120] sm:$0xff]  ;;  %v3843_v13 = vld [vmem:[#allocation11 + $0x108] sm:$0xff]  ;;  %v3846_v16 = vld [vmem:[#allocation11 + $0xf0] sm:$0xff] }
  0x25   :  { %220 = vmatpush.msra.mxu1 %v186_v7  ;;  %201 = vmatpush.msra.mxu0 %v182_v5  ;;  %v176_v12 = vld [vmem:[#allocation8 + $0x108] sm:$0xff]  ;;  %v177_v14 = vld [vmem:[#allocation8 + $0x110] sm:$0xff]  ;;  %v174_v17 = vld [vmem:[#allocation8 + $0xf8] sm:$0xff] }
  0x26   :  { %313 = vmatpush.msra.mxu3 %v3837_v6  ;;  %v173_v15 = vld [vmem:[#allocation8 + $0xf0] sm:$0xff]  ;;  %v170_v18 = vld [vmem:[#allocation8 + $0xd8] sm:$0xff]  ;;  %v171_v20 = vld [vmem:[#allocation8 + $0xe0] sm:$0xff] }
  0x27   :  { %221 = vmatpush.msra.mxu1 %v183_v8  ;;  %202 = vmatpush.msra.mxu0 %v179_v9  ;;  %v3849_v19 = vld [vmem:[#allocation11 + $0xd8] sm:$0xff]  ;;  %v3852_v22 = vld [vmem:[#allocation11 + $0xc0] sm:$0xff]  ;;  %v3855_v25 = vld [vmem:[#allocation11 + $0xa8] sm:$0xff] }
  0x28   :  { %314 = vmatpush.msra.mxu3 %v3840_v10  ;;  %v167_v21 = vld [vmem:[#allocation8 + $0xc0] sm:$0xff]  ;;  %v168_v23 = vld [vmem:[#allocation8 + $0xc8] sm:$0xff]  ;;  %v165_v26 = vld [vmem:[#allocation8 + $0xb0] sm:$0xff] }
  0x29   :  { %222 = vmatpush.msra.mxu1 %v180_v11  ;;  %203 = vmatpush.msra.mxu0 %v176_v12  ;;  %v164_v24 = vld [vmem:[#allocation8 + $0xa8] sm:$0xff]  ;;  %v190_v27 = vld [vmem:[#allocation8 + $0x178] sm:$0xff]  ;;  %v161_v28 = vld [vmem:[#allocation8 + $0x90] sm:$0xff] }
  0x2a   :  { %315 = vmatpush.msra.mxu3 %v3843_v13  ;;  %v3858_v29 = vld [vmem:[#allocation11 + $0x90] sm:$0xff]  ;;  %239 = vmatpush.msra.mxu2 %v190_v27  ;;  %v187_v30 = vld [vmem:[#allocation8 + $0x160] sm:$0xff]  ;;  %v184_v32 = vld [vmem:[#allocation8 + $0x148] sm:$0xff] }
  0x2b   :  { %223 = vmatpush.msra.mxu1 %v177_v14  ;;  %204 = vmatpush.msra.mxu0 %v173_v15  ;;  %v162_v31 = vld [vmem:[#allocation8 + $0x98] sm:$0xff]  ;;  %v159_v35 = vld [vmem:[#allocation8 + $0x80] sm:$0xff]  ;;  %v181_v36 = vld [vmem:[#allocation8 + $0x130] sm:$0xff] }
  0x2c   :  { %316 = vmatpush.msra.mxu3 %v3846_v16  ;;  %v158_v33 = vld [vmem:[#allocation8 + $0x78] sm:$0xff]  ;;  %240 = vmatpush.msra.mxu2 %v187_v30  ;;  %v155_v37 = vld [vmem:[#allocation8 + $0x60] sm:$0xff]  ;;  %v156_v39 = vld [vmem:[#allocation8 + $0x68] sm:$0xff] }
  0x2d   :  { %224 = vmatpush.msra.mxu1 %v174_v17  ;;  %205 = vmatpush.msra.mxu0 %v170_v18  ;;  %v3861_v34 = vld [vmem:[#allocation11 + $0x78] sm:$0xff]  ;;  %v3864_v38 = vld [vmem:[#allocation11 + $0x60] sm:$0xff]  ;;  %v3867_v42 = vld [vmem:[#allocation11 + $0x48] sm:$0xff] }
  0x2e   :  { %317 = vmatpush.msra.mxu3 %v3849_v19  ;;  %241 = vmatpush.msra.mxu2 %v184_v32  ;;  %v178_v40 = vld [vmem:[#allocation8 + $0x118] sm:$0xff]  ;;  %v152_v41 = vld [vmem:[#allocation8 + $0x48] sm:$0xff]  ;;  %6172 = vst [vmem:[#allocation24_spill] sm:$0xff] %v3867_v42  ;;  %v153_v43 = vld [vmem:[#allocation8 + $0x50] sm:$0xff] }
  0x2f   :  { %225 = vmatpush.msra.mxu1 %v171_v20  ;;  %206 = vmatpush.msra.mxu0 %v167_v21  ;;  %v175_v44 = vld [vmem:[#allocation8 + $0x100] sm:$0xff]  ;;  %v149_v45 = vld [vmem:[#allocation8 + $0x30] sm:$0xff]  ;;  %v150_v47 = vld [vmem:[#allocation8 + $0x38] sm:$0xff] }
  0x30   :  { %318 = vmatpush.msra.mxu3 %v3852_v22  ;;  %242 = vmatpush.msra.mxu2 %v181_v36  ;;  %v3870_v46 = vld [vmem:[#allocation11 + $0x30] sm:$0xff]  ;;  %v172_v48 = vld [vmem:[#allocation8 + $0xe8] sm:$0xff]  ;;  %v3873_v50 = vld [vmem:[#allocation11 + $0x18] sm:$0xff] }
  0x31   :  { %226 = vmatpush.msra.mxu1 %v168_v23  ;;  %207 = vmatpush.msra.mxu0 %v164_v24  ;;  %6173 = vst [vmem:[#allocation25_spill] sm:$0xff] %v3870_v46  ;;  %v146_v49 = vld [vmem:[#allocation8 + $0x18] sm:$0xff]  ;;  %v147_v51 = vld [vmem:[#allocation8 + $0x20] sm:$0xff]  ;;  %v169_v52 = vld [vmem:[#allocation8 + $0xd0] sm:$0xff] }
  0x32   :  { %319 = vmatpush.msra.mxu3 %v3855_v25  ;;  %243 = vmatpush.msra.mxu2 %v178_v40  ;;  %6174 = vst [vmem:[#allocation26_spill] sm:$0xff] %v3873_v50  ;;  %v143_v53 = vld [vmem:[#allocation8] sm:$0xff]  ;;  %v3879_v55 = vld [vmem:[#allocation6] sm:$0x1]  ;;  %v3881_v56 = vld [vmem:[#allocation11 + $0x170] sm:$0xff] }
  0x33   :  { %227 = vmatpush.msra.mxu1 %v165_v26  ;;  %208 = vmatpush.msra.mxu0 %v161_v28  ;;  %v3876_v54 = vld [vmem:[#allocation11] sm:$0xff]  ;;  %6176 = vst [vmem:[#allocation28_spill] sm:$0xff] %v3879_v55  ;;  %v3883_v58 = vld [vmem:[#allocation3] sm:$0xff]  ;;  %v3899_v2 = vld [vmem:[#allocation11 + $0x128] sm:$0xff] }
  0x34   :  { %320 = vmatpush.msra.mxu3 %v3858_v29  ;;  %244 = vmatpush.msra.mxu2 %v175_v44  ;;  %6175 = vst [vmem:[#allocation27_spill] sm:$0xff] %v3876_v54  ;;  %v144_v57 = vld [vmem:[#allocation8 + $0x8] sm:$0xff]  ;;  %v3886_v59 = vld [vmem:[#allocation11 + $0x158] sm:$0xff]  ;;  %v3906_v7 = vld [vmem:[#allocation11 + $0x110] sm:$0xff] }
  0x35   :  { %228 = vmatpush.msra.mxu1 %v162_v31  ;;  %209 = vmatpush.msra.mxu0 %v158_v33  ;;  %v3888_v60 = vld [vmem:[#allocation11 + $0x178] sm:$0xff]  ;;  %v3893_v62 = vld [vmem:[#allocation11 + $0x140] sm:$0xff]  ;;  %v3901_v4 = vld [vmem:[#allocation11 + $0x148] sm:$0xff] }
  0x36   :  { %321 = vmatpush.msra.mxu3 %v3861_v34  ;;  %245 = vmatpush.msra.mxu2 %v172_v48  ;;  %v166_v61 = vld [vmem:[#allocation8 + $0xb8] sm:$0xff]  ;;  %v3895_v63 = vld [vmem:[#allocation11 + $0x160] sm:$0xff]  ;;  %v157_v9 = vld [vmem:[#allocation8 + $0x70] sm:$0xff] }
  0x37   :  { %229 = vmatpush.msra.mxu1 %v159_v35  ;;  %210 = vmatpush.msra.mxu0 %v155_v37  ;;  %v163_v0 = vld [vmem:[#allocation8 + $0xa0] sm:$0xff]  ;;  %v160_v5 = vld [vmem:[#allocation8 + $0x88] sm:$0xff]  ;;  %v3908_v8 = vld [vmem:[#allocation11 + $0x130] sm:$0xff] }
  0x38   :  { %322 = vmatpush.msra.mxu3 %v3864_v38  ;;  %246 = vmatpush.msra.mxu2 %v169_v52  ;;  %v3912_v11 = vld [vmem:[#allocation11 + $0xf8] sm:$0xff]  ;;  %v3918_v15 = vld [vmem:[#allocation11 + $0xe0] sm:$0xff]  ;;  %v3924_v20 = vld [vmem:[#allocation11 + $0xc8] sm:$0xff] }
  0x39   :  { %230 = vmatpush.msra.mxu1 %v156_v39  ;;  %211 = vmatpush.msra.mxu0 %v152_v41  ;;  %v3914_v12 = vld [vmem:[#allocation11 + $0x118] sm:$0xff]  ;;  %v3920_v17 = vld [vmem:[#allocation11 + $0x100] sm:$0xff]  ;;  %v3926_v21 = vld [vmem:[#allocation11 + $0xe8] sm:$0xff] }
  0x3a   :  { %323 = vmatpush.msra.mxu3 %v3867_v42  ;;  %247 = vmatpush.msra.mxu2 %v166_v61  ;;  %v154_v14 = vld [vmem:[#allocation8 + $0x58] sm:$0xff]  ;;  %v151_v18 = vld [vmem:[#allocation8 + $0x40] sm:$0xff]  ;;  %v148_v23 = vld [vmem:[#allocation8 + $0x28] sm:$0xff] }
  0x3b   :  { %231 = vmatpush.msra.mxu1 %v153_v43  ;;  %212 = vmatpush.msra.mxu0 %v149_v45  ;;  %v3930_v24 = vld [vmem:[#allocation11 + $0xb0] sm:$0xff]  ;;  %v3936_v28 = vld [vmem:[#allocation11 + $0x98] sm:$0xff]  ;;  %v3942_v31 = vld [vmem:[#allocation11 + $0x80] sm:$0xff] }
  0x3c   :  { %324 = vmatpush.msra.mxu3 %v3870_v46  ;;  %248 = vmatpush.msra.mxu2 %v163_v0  ;;  %v3932_v26 = vld [vmem:[#allocation11 + $0xd0] sm:$0xff]  ;;  %v3938_v30 = vld [vmem:[#allocation11 + $0xb8] sm:$0xff]  ;;  %v3944_v32 = vld [vmem:[#allocation11 + $0xa0] sm:$0xff] }
  0x3d   :  { %232 = vmatpush.msra.mxu1 %v150_v47  ;;  %213 = vmatpush.msra.mxu0 %v146_v49  ;;  %v145_v27 = vld [vmem:[#allocation8 + $0x10] sm:$0xff]  ;;  %v3961_v39 = vld [vmem:[#allocation11 + $0x38] sm:$0xff]  ;;  %v3967_v41 = vld [vmem:[#allocation11 + $0x20] sm:$0xff] }
  0x3e   :  { %325 = vmatpush.msra.mxu3 %v3873_v50  ;;  %249 = vmatpush.msra.mxu2 %v160_v5  ;;  %v3948_v33 = vld [vmem:[#allocation11 + $0x68] sm:$0xff]  ;;  %v3955_v36 = vld [vmem:[#allocation11 + $0x50] sm:$0xff]  ;;  %6179 = vst [vmem:[#allocation31_spill] sm:$0xff] %v3961_v39  ;;  %v3963_v40 = vld [vmem:[#allocation11 + $0x58] sm:$0xff] }
  0x3f   :  { %233 = vmatpush.msra.mxu1 %v147_v51  ;;  %214 = vmatpush.msra.mxu0 %v143_v53  ;;  %v3950_v35 = vld [vmem:[#allocation11 + $0x88] sm:$0xff]  ;;  %6177 = vst [vmem:[#allocation29_spill] sm:$0xff] %v3955_v36  ;;  %v3957_v37 = vld [vmem:[#allocation11 + $0x70] sm:$0xff]  ;;  %v3969_v43 = vld [vmem:[#allocation11 + $0x40] sm:$0xff] }
  0x40   :  { %326 = vmatpush.msra.mxu3 %v3876_v54  ;;  %215 = vmatmul.f32.vlgmr.msra.gmra.mxu0 %v3883_v58  ;;  %6178 = vst [vmem:[#allocation30_spill] sm:$0xff] %v3957_v37  ;;  %v3973_v44 = vld [vmem:[#allocation11 + $0x8] sm:$0xff]  ;;  %v3979_v47 = vld [vmem:[#allocation11 + $0x10] sm:$0xff]  ;;  %v3986_v48 = vld [vmem:[#allocation9] sm:$0x7] }
  0x41   :  { %327 = vmatmul.f32.vlgmr.msra.gmra.mxu3 %v3879_v55  ;;  %331 = vmatpush.msrb.mxu0 %v3881_v56  ;;  %6180 = vst [vmem:[#allocation32_spill] sm:$0xff] %v3963_v40  ;;  %v3975_v45 = vld [vmem:[#allocation11 + $0x28] sm:$0xff]  ;;  %v193_v49 = vperm.slane %v3986_v48, 0  ;;  %v3989_v52 = vld [vmem:[#allocation12 + $0x1e0] sm:$0xff]  ;;  %v3999_v61 = vld [vmem:[#allocation12 + $0x1f8] sm:$0xff] }
  0x42   :  { %234 = vmatpush.msra.mxu1 %v144_v57  ;;  %250 = vmatpush.msra.mxu2 %v157_v9  ;;  %6181 = vst [vmem:[#allocation33_spill] sm:$0xff] %v3967_v41  ;;  %v3991_v53 = vld [vmem:[#allocation12 + $0x1e8] sm:$0xff]  ;;  %v4003_v0 = vld [vmem:[#allocation12 + $0x1c0] sm:$0xff]  ;;  %v4007_v9 = vld [vmem:[#allocation12 + $0x1d0] sm:$0xff] }
  0x43   :  { %332 = vmatpush.msrb.mxu0 %v3886_v59  ;;  %235 = vmatmul.f32.vlgmr.msra.gmra.mxu1 %v3883_v58  ;;  %6182 = vst [vmem:[#allocation34_spill] sm:$0xff] %v3969_v43  ;;  %v4005_v5 = vld [vmem:[#allocation12 + $0x1c8] sm:$0xff]  ;;  %v4098_v54 = vld [vmem:[#allocation12 + $0xf8] sm:$0xff] }
  0x44   :  { %351 = vmatpush.msrb.mxu1 %v3888_v60  ;;  %251 = vmatpush.msra.mxu2 %v154_v14  ;;  %6183 = vst [vmem:[#allocation35_spill] sm:$0xff] %v3973_v44  ;;  %v4011_v14 = vld [vmem:[#allocation12 + $0x1d8] sm:$0xff] }
  0x45   :  { %333 = vmatpush.msrb.mxu0 %v3893_v62  ;;  %6184 = vst [vmem:[#allocation36_spill] sm:$0xff] %v3975_v45  ;;  %511 = vmatpush.msrb.mxu3 %v3991_v53  ;;  %v4136_v50 = vld [vmem:[#allocation12 + $0x98] sm:$0xff] }
  0x46   :  { %352 = vmatpush.msrb.mxu1 %v3895_v63  ;;  %252 = vmatpush.msra.mxu2 %v151_v18  ;;  %6185 = vst [vmem:[#allocation37_spill] sm:$0xff] %v3979_v47 }
  0x47   :  { %334 = vmatpush.msrb.mxu0 %v3899_v2  ;;  %6186 = vst [vmem:[#allocation38_spill] sm:$0xff] %v3991_v53  ;;  %512 = vmatpush.msrb.mxu3 %v4005_v5 }
  0x48   :  { %353 = vmatpush.msrb.mxu1 %v3901_v4  ;;  %253 = vmatpush.msra.mxu2 %v148_v23  ;;  %6189 = vst [vmem:[#allocation41_spill] sm:$0xff] %v3999_v61  ;;  %v4015_v23 = vld [vmem:[#allocation12 + $0x1a0] sm:$0xff] }
  0x49   :  { %335 = vmatpush.msrb.mxu0 %v3906_v7  ;;  %6190 = vst [vmem:[#allocation42_spill] sm:$0xff] %v4005_v5  ;;  %v4024_v5 = vld [vmem:[#allocation12 + $0x1b8] sm:$0xff] }
  0x4a   :  { %354 = vmatpush.msrb.mxu1 %v3908_v8  ;;  %254 = vmatpush.msra.mxu2 %v145_v27  ;;  %6191 = vst [vmem:[#allocation43_spill] sm:$0xff] %v4007_v9  ;;  %v4017_v27 = vld [vmem:[#allocation12 + $0x1a8] sm:$0xff] }
  0x4b   :  { %336 = vmatpush.msrb.mxu0 %v3912_v11  ;;  %255 = vmatmul.f32.vlgmr.msra.gmra.mxu2 %v3883_v58  ;;  %v3997_v58 = vld [vmem:[#allocation12 + $0x1f0] sm:$0xff]  ;;  %6192 = vst [vmem:[#allocation44_spill] sm:$0xff] %v4011_v14 }
  0x4c   :  { %355 = vmatpush.msrb.mxu1 %v3914_v12  ;;  %491 = vmatpush.msrb.mxu2 %v3989_v52  ;;  %6188 = vst [vmem:[#allocation40_spill] sm:$0xff] %v3997_v58 }
  0x4d   :  { %337 = vmatpush.msrb.mxu0 %v3918_v15  ;;  %6193 = vst [vmem:[#allocation45_spill] sm:$0xff] %v4017_v27  ;;  %513 = vmatpush.msrb.mxu3 %v4017_v27  ;;  %v4072_v27 = vld [vmem:[#allocation12 + $0x138] sm:$0xff] }
  0x4e   :  { %356 = vmatpush.msrb.mxu1 %v3920_v17  ;;  %492 = vmatpush.msrb.mxu2 %v4003_v0  ;;  %6195 = vst [vmem:[#allocation47_spill] sm:$0xff] %v4024_v5 }
  0x4f   :  { %338 = vmatpush.msrb.mxu0 %v3924_v20  ;;  %6207 = vst [vmem:[#allocation59_spill] sm:$0xff] %v4072_v27 }
  0x50   :  { %357 = vmatpush.msrb.mxu1 %v3926_v21  ;;  %493 = vmatpush.msrb.mxu2 %v4015_v23  ;;  %6213 = vst [vmem:[#allocation65_spill] sm:$0xff] %v4098_v54 }
  0x51   :  { %339 = vmatpush.msrb.mxu0 %v3930_v24  ;;  %6223 = vst [vmem:[#allocation75_spill] sm:$0xff] %v4136_v50 }
  0x52   :  { %358 = vmatpush.msrb.mxu1 %v3932_v26 }
  0x53   :  { %340 = vmatpush.msrb.mxu0 %v3936_v28 }
  0x54   :  { %359 = vmatpush.msrb.mxu1 %v3938_v30 }
  0x55   :  { %341 = vmatpush.msrb.mxu0 %v3942_v31 }
  0x56   :  { %360 = vmatpush.msrb.mxu1 %v3944_v32 }
  0x57   :  { %342 = vmatpush.msrb.mxu0 %v3948_v33 }
  0x58   :  { %361 = vmatpush.msrb.mxu1 %v3950_v35 }
  0x59   :  { %343 = vmatpush.msrb.mxu0 %v3955_v36  ;;  %v4164_v36 = vld [vmem:[#allocation12 + $0x58] sm:$0xff] }
  0x5a   :  { %362 = vmatpush.msrb.mxu1 %v3957_v37  ;;  %6232 = vst [vmem:[#allocation84_spill] sm:$0xff] %v4164_v36 }
  0x5b   :  { %344 = vmatpush.msrb.mxu0 %v3961_v39  ;;  %v4146_v39 = vld [vmem:[#allocation12 + $0x70] sm:$0xff] }
  0x5c   :  { %363 = vmatpush.msrb.mxu1 %v3963_v40  ;;  %6226 = vst [vmem:[#allocation78_spill] sm:$0xff] %v4146_v39  ;;  %v4154_v40 = vld [vmem:[#allocation12 + $0x40] sm:$0xff] }
  0x5d   :  { %345 = vmatpush.msrb.mxu0 %v3967_v41  ;;  %v4132_v41 = vld [vmem:[#allocation12 + $0x90] sm:$0xff]  ;;  %6228 = vst [vmem:[#allocation80_spill] sm:$0xff] %v4154_v40 }
  0x5e   :  { %364 = vmatpush.msrb.mxu1 %v3969_v43  ;;  %6222 = vst [vmem:[#allocation74_spill] sm:$0xff] %v4132_v41 }
  0x5f   :  { %346 = vmatpush.msrb.mxu0 %v3973_v44  ;;  %v4094_v44 = vld [vmem:[#allocation12 + $0xf0] sm:$0xff] }
  0x60   :  { %365 = vmatpush.msrb.mxu1 %v3975_v45  ;;  %347 = vmatmul.f32.vlgmr.msrb.gmra.mxu0 %v3879_v55  ;;  %6212 = vst [vmem:[#allocation64_spill] sm:$0xff] %v4094_v44  ;;  %v4123_v45 = vld [vmem:[#allocation12 + $0xb8] sm:$0xff] }
  0x61   :  { %531 = vmatpush.msra.mxu0 %v3997_v58  ;;  %6219 = vst [vmem:[#allocation71_spill] sm:$0xff] %v4123_v45 }
  0x62   :  { %366 = vmatpush.msrb.mxu1 %v3979_v47  ;;  %v4084_v47 = vld [vmem:[#allocation12 + $0x118] sm:$0xff] }
  0x63   :  { %367 = vmatmul.f32.vlgmr.msrb.gmra.mxu1 %v3879_v55  ;;  %532 = vmatpush.msra.mxu0 %v4007_v9  ;;  %v4028_v9 = vld [vmem:[#allocation12 + $0x180] sm:$0xff]  ;;  %6210 = vst [vmem:[#allocation62_spill] sm:$0xff] %v4084_v47  ;;  %v4162_v55 = vld [vmem:[#allocation12 + $0x50] sm:$0xff] }
  0x64   :  { %551 = vmatpush.msra.mxu1 %v3999_v61  ;;  %v4032_v61 = vld [vmem:[#allocation12 + $0x190] sm:$0xff]  ;;  %494 = vmatpush.msrb.mxu2 %v4028_v9  ;;  %6231 = vst [vmem:[#allocation83_spill] sm:$0xff] %v4162_v55 }
  0x65   :  { %6197 = vst [vmem:[#allocation49_spill] sm:$0xff] %v4032_v61 }
  0x66   :  { %552 = vmatpush.msra.mxu1 %v4011_v14  ;;  %v4030_v14 = vld [vmem:[#allocation12 + $0x188] sm:$0xff] }
  0x67   :  { %6196 = vst [vmem:[#allocation48_spill] sm:$0xff] %v4030_v14  ;;  %514 = vmatpush.msrb.mxu3 %v4030_v14  ;;  %v4056_v14 = vld [vmem:[#allocation12 + $0x150] sm:$0xff] }
  0x68   :  { %553 = vmatpush.msra.mxu1 %v4024_v5  ;;  %v4042_v5 = vld [vmem:[#allocation12 + $0x168] sm:$0xff]  ;;  %6203 = vst [vmem:[#allocation55_spill] sm:$0xff] %v4056_v14 }
  0x69   :  { %6199 = vst [vmem:[#allocation51_spill] sm:$0xff] %v4042_v5  ;;  %515 = vmatpush.msrb.mxu3 %v4042_v5  ;;  %v4064_v5 = vld [vmem:[#allocation12 + $0x120] sm:$0xff] }
  0xbd   :  { %v216_v51 = vpop.f32.mrf.mxu0 }
  0xbe   :  { %v3993_v57 = vadd.f32 %v216_v51, %v193_v49  ;;  %v4019_v49 = vld [vmem:[#allocation12 + $0x1b0] sm:$0xff] }
  0xbf   :  { %6194 = vst [vmem:[#allocation46_spill] sm:$0xff] %v4019_v49  ;;  %533 = vmatpush.msra.mxu0 %v4019_v49  ;;  %v4044_v49 = vld [vmem:[#allocation12 + $0x170] sm:$0xff] }
  0xc0   :  { %6187 = vst [vmem:[#allocation39_spill] sm:$0xff] %v3993_v57  ;;  %v236_v43 = vpop.f32.mrf.mxu1 }
  0xc1   :  { %534 = vmatpush.msra.mxu0 %v4032_v61  ;;  %6200 = vst [vmem:[#allocation52_spill] sm:$0xff] %v4044_v49  ;;  %v4052_v61 = vld [vmem:[#allocation12 + $0x140] sm:$0xff] }
  0xc3   :  { %535 = vmatpush.msra.mxu0 %v4044_v49  ;;  %v4066_v49 = vld [vmem:[#allocation12 + $0x128] sm:$0xff] }
  0xc4   :  { %v328_v18 = vpop.f32.mrf.mxu3  ;;  %6205 = vst [vmem:[#allocation57_spill] sm:$0xff] %v4066_v49 }
  0xc5   :  { %v371_v51 = vadd.f32 %v328_v18, %v3993_v57  ;;  %v4036_v18 = vld [vmem:[#allocation12 + $0x198] sm:$0xff]  ;;  %v4040_v57 = vld [vmem:[#allocation12 + $0x160] sm:$0xff]  ;;  %536 = vmatpush.msra.mxu0 %v4056_v14  ;;  %v4078_v14 = vld [vmem:[#allocation12 + $0x108] sm:$0xff] }
  0xc6   :  { %6198 = vst [vmem:[#allocation50_spill] sm:$0xff] %v4036_v18  ;;  %554 = vmatpush.msra.mxu1 %v4036_v18  ;;  %495 = vmatpush.msrb.mxu2 %v4040_v57  ;;  %v4054_v18 = vld [vmem:[#allocation12 + $0x148] sm:$0xff] }
  0xc7   :  { %v3290_v58 = vmul.f32 -1.442695, %v371_v51  ;;  %v4048_v51 = vld [vmem:[#allocation12 + $0x178] sm:$0xff]  ;;  %6202 = vst [vmem:[#allocation54_spill] sm:$0xff] %v4054_v18  ;;  %516 = vmatpush.msrb.mxu3 %v4054_v18  ;;  %v4076_v18 = vld [vmem:[#allocation12 + $0x100] sm:$0xff] }
  0xc8   :  { %6201 = vst [vmem:[#allocation53_spill] sm:$0xff] %v4048_v51  ;;  %555 = vmatpush.msra.mxu1 %v4048_v51  ;;  %496 = vmatpush.msrb.mxu2 %v4052_v61  ;;  %v4068_v51 = vld [vmem:[#allocation12 + $0x130] sm:$0xff] }
  0xc9   :  { %3340 = vpow2.f32 %v3290_v58  ;;  %v4060_v58 = vld [vmem:[#allocation12 + $0x158] sm:$0xff]  ;;  %6206 = vst [vmem:[#allocation58_spill] sm:$0xff] %v4068_v51  ;;  %517 = vmatpush.msrb.mxu3 %v4066_v49  ;;  %537 = vmatpush.msra.mxu0 %v4068_v51  ;;  %v4092_v51 = vld [vmem:[#allocation12 + $0xe8] sm:$0xff] }
  0xca   :  { %6204 = vst [vmem:[#allocation56_spill] sm:$0xff] %v4060_v58  ;;  %556 = vmatpush.msra.mxu1 %v4060_v58  ;;  %497 = vmatpush.msrb.mxu2 %v4064_v5  ;;  %v4080_v58 = vld [vmem:[#allocation12 + $0x110] sm:$0xff] }
  0xcb   :  { %6208 = vst [vmem:[#allocation60_spill] sm:$0xff] %v4078_v14  ;;  %518 = vmatpush.msrb.mxu3 %v4078_v14  ;;  %538 = vmatpush.msra.mxu0 %v4080_v58  ;;  %v4111_v14 = vld [vmem:[#allocation12 + $0xd8] sm:$0xff] }
  0xcc   :  { %557 = vmatpush.msra.mxu1 %v4072_v27  ;;  %6209 = vst [vmem:[#allocation61_spill] sm:$0xff] %v4080_v58  ;;  %498 = vmatpush.msrb.mxu2 %v4076_v18  ;;  %v4090_v27 = vld [vmem:[#allocation12 + $0xe0] sm:$0xff]  ;;  %v4107_v58 = vld [vmem:[#allocation12 + $0xd0] sm:$0xff] }
  0xcd   :  { %6211 = vst [vmem:[#allocation63_spill] sm:$0xff] %v4092_v51  ;;  %519 = vmatpush.msrb.mxu3 %v4092_v51  ;;  %539 = vmatpush.msra.mxu0 %v4094_v44  ;;  %v4115_v51 = vld [vmem:[#allocation12 + $0xa0] sm:$0xff]  ;;  %v4117_v44 = vld [vmem:[#allocation12 + $0xa8] sm:$0xff] }
  0xce   :  { %558 = vmatpush.msra.mxu1 %v4084_v47  ;;  %499 = vmatpush.msrb.mxu2 %v4090_v27  ;;  %v4105_v47 = vld [vmem:[#allocation12 + $0xc8] sm:$0xff]  ;;  %6215 = vst [vmem:[#allocation67_spill] sm:$0xff] %v4107_v58 }
  0xcf   :  { %v3341_v53 = vpop.eup %3340  ;;  %6214 = vst [vmem:[#allocation66_spill] sm:$0xff] %v4105_v47  ;;  %520 = vmatpush.msrb.mxu3 %v4105_v47  ;;  %540 = vmatpush.msra.mxu0 %v4107_v58  ;;  %v194_v47 = vperm.slane %v3986_v48, 1  ;;  %v4128_v58 = vld [vmem:[#allocation12 + $0x80] sm:$0xff] }
  0xd0   :  { %v4086_v49 = vadd.f32 1.0, %v3341_v53  ;;  %559 = vmatpush.msra.mxu1 %v4098_v54  ;;  %v4103_v53 = vld [vmem:[#allocation12 + $0xc0] sm:$0xff]  ;;  %6216 = vst [vmem:[#allocation68_spill] sm:$0xff] %v4111_v14  ;;  %v4119_v54 = vld [vmem:[#allocation12 + $0xb0] sm:$0xff] }
  0xd1   :  { %500 = vmatpush.msrb.mxu2 %v4103_v53  ;;  %6217 = vst [vmem:[#allocation69_spill] sm:$0xff] %v4117_v44  ;;  %521 = vmatpush.msrb.mxu3 %v4117_v44 }
  0xd2   :  { %3342 = vrcp.f32 %v4086_v49  ;;  %560 = vmatpush.msra.mxu1 %v4111_v14  ;;  %6218 = vst [vmem:[#allocation70_spill] sm:$0xff] %v4119_v54  ;;  %541 = vmatpush.msra.mxu0 %v4119_v54  ;;  %v4130_v14 = vld [vmem:[#allocation12 + $0x88] sm:$0xff]  ;;  %vm381_vm0 = vweird.f32 %v4086_v49  ;;  %v385_v37 = vand.u32 2147483647, %v4086_v49 }
  0xd3   :  { %501 = vmatpush.msrb.mxu2 %v4115_v51  ;;  %6220 = vst [vmem:[#allocation72_spill] sm:$0xff] %v4128_v58  ;;  %522 = vmatpush.msrb.mxu3 %v4130_v14  ;;  %v4144_v54 = vld [vmem:[#allocation12 + $0x68] sm:$0xff] }
  0xd4   :  { %561 = vmatpush.msra.mxu1 %v4123_v45  ;;  %6221 = vst [vmem:[#allocation73_spill] sm:$0xff] %v4130_v14  ;;  %542 = vmatpush.msra.mxu0 %v4132_v41  ;;  %v4142_v45 = vld [vmem:[#allocation12 + $0x60] sm:$0xff]  ;;  %v4152_v14 = vld [vmem:[#allocation12 + $0x78] sm:$0xff]  ;;  %v4156_v41 = vld [vmem:[#allocation12 + $0x48] sm:$0xff]  ;;  %vm386_vm3 = vcmp.eq.f32.partialorder %v385_v37, 8.507059e+37 }
  0xd5   :  { %502 = vmatpush.msrb.mxu2 %v4128_v58  ;;  %6224 = vst [vmem:[#allocation76_spill] sm:$0xff] %v4142_v45  ;;  %523 = vmatpush.msrb.mxu3 %v4144_v54  ;;  %v4172_v58 = vld [vmem:[#allocation12 + $0x30] sm:$0xff] }
  0xd6   :  { %562 = vmatpush.msra.mxu1 %v4136_v50  ;;  %6225 = vst [vmem:[#allocation77_spill] sm:$0xff] %v4144_v54  ;;  %v4158_v50 = vadd.f32 %v236_v43, %v194_v47  ;;  %543 = vmatpush.msra.mxu0 %v4146_v39  ;;  %v4168_v54 = vld [vmem:[#allocation12 + $0x20] sm:$0xff]  ;;  %v4176_v43 = vld [vmem:[#allocation12 + $0x38] sm:$0xff]  ;;  %v6250_v37 = vld [vmem:[#allocation36_spill] sm:$0xff] }
  0xd7   :  { %503 = vmatpush.msrb.mxu2 %v4142_v45  ;;  %6227 = vst [vmem:[#allocation79_spill] sm:$0xff] %v4152_v14  ;;  %524 = vmatpush.msrb.mxu3 %v4156_v41  ;;  %v4170_v45 = vld [vmem:[#allocation12 + $0x28] sm:$0xff]  ;;  %v4178_v47 = vld [vmem:[#allocation12] sm:$0xff] }
  0xd8   :  { %v4138_v44 = vpop.eup %3342  ;;  %6229 = vst [vmem:[#allocation81_spill] sm:$0xff] %v4156_v41  ;;  %563 = vmatpush.msra.mxu1 %v4152_v14  ;;  %544 = vmatpush.msra.mxu0 %v4162_v55  ;;  %v4180_v14 = vld [vmem:[#allocation12 + $0x8] sm:$0xff]  ;;  %v4187_v55 = vld [vmem:[#allocation12 + $0x10] sm:$0xff] }
  0xd9   :  { %v377_v46 = vmul.f32 %v4138_v44, %v4086_v49  ;;  %6230 = vst [vmem:[#allocation82_spill] sm:$0xff] %v4158_v50  ;;  %504 = vmatpush.msrb.mxu2 %v4154_v40  ;;  %vm382_vm1 = vweird.f32 %v4138_v44  ;;  %525 = vmatpush.msrb.mxu3 %v4170_v45  ;;  %v387_v40 = vand.u32 2147483648, %v4086_v49 }
  0xda   :  { %6233 = vst [vmem:[#allocation85_spill] sm:$0xff] %v4168_v54  ;;  %564 = vmatpush.msra.mxu1 %v4164_v36  ;;  %v4189_v36 = vld [vmem:[#allocation12 + $0x18] sm:$0xff]  ;;  %545 = vmatpush.msra.mxu0 %v4172_v58  ;;  %vm4201_vm2 = vmor %vm381_vm0, %vm382_vm1 }
  0xdb   :  { %v378_v42 = vsub.f32 1.0, %v377_v46  ;;  %6234 = vst [vmem:[#allocation86_spill] sm:$0xff] %v4170_v45  ;;  %505 = vmatpush.msrb.mxu2 %v4168_v54  ;;  %526 = vmatpush.msrb.mxu3 %v4180_v14  ;;  %v388_v49 = vor.u32 1.1754944e-38, %v387_v40  ;;  %v256_v54 = vpop.f32.mrf.mxu2 }
  0xdc   :  { %565 = vmatpush.msra.mxu1 %v4176_v43  ;;  %546 = vmatpush.msra.mxu0 %v4187_v55 }
  0xdd   :  { %v348_v46 = vpop.f32.mrf.mxu0  ;;  %v379_v39 = vmul.f32 %v4138_v44, %v378_v42  ;;  %506 = vmatpush.msrb.mxu2 %v4178_v47  ;;  %684 = vmatpush.msra.mxu3 %v3881_v56  ;;  %v195_v56 = vperm.slane %v3986_v48, 2  ;;  %v6254_v48 = vld [vmem:[#allocation37_spill] sm:$0xff] }
  0xde   :  { %v391_v41 = vadd.f32 %v348_v46, %v4158_v50  ;;  %566 = vmatpush.msra.mxu1 %v4189_v36  ;;  %704 = vmatpush.msrb.mxu0 %v3888_v60 }
  0xdf   :  { %v380_v42 = vadd.f32 %v4138_v44, %v379_v39  ;;  %664 = vmatpush.msra.mxu2 %v3832_v1  ;;  %v4212_v39 = vld [vmem:[%s5896_s5] sm:$0x1]  ;;  %685 = vmatpush.msra.mxu3 %v3886_v59 }
  0xe0   :  { %v3291_v45 = vmul.f32 -1.442695, %v391_v41  ;;  %v368_v41 = vpop.f32.mrf.mxu1  ;;  %853 = vmatpush.msrb.mxu1 %v3989_v52  ;;  %705 = vmatpush.msrb.mxu0 %v3895_v63  ;;  %v6255_v52 = vld [vmem:[#allocation38_spill] sm:$0xff] }
  0xe1   :  { %v384_v46 = vsel %vm4201_vm2, %v4138_v44, %v380_v42  ;;  %665 = vmatpush.msra.mxu2 %v3835_v3  ;;  %v411_v1 = vadd.f32 %v368_v41, %v4212_v39  ;;  %686 = vmatpush.msra.mxu3 %v3893_v62  ;;  %v6251_v40 = vld [vmem:[#allocation85_spill] sm:$0xff]  ;;  %v6252_v44 = vld [vmem:[#allocation27_spill] sm:$0xff]  ;;  %v6266_v42 = vld [vmem:[#allocation50_spill] sm:$0xff] }
  0xe2   :  { %3344 = vpow2.f32 %v3291_v45  ;;  %854 = vmatpush.msrb.mxu1 %v4003_v0  ;;  %v389_v60 = vsel %vm386_vm3, %v388_v49, %v384_v46  ;;  %706 = vmatpush.msrb.mxu0 %v3901_v4  ;;  %v6237_v4 = vld [vmem:[#allocation30_spill] sm:$0xff]  ;;  %v6253_v45 = vld [vmem:[#allocation35_spill] sm:$0xff]  ;;  %v6268_v49 = vld [vmem:[#allocation52_spill] sm:$0xff] }
  0xe3   :  { %666 = vmatpush.msra.mxu2 %v3837_v6  ;;  %687 = vmatpush.msra.mxu3 %v3899_v2  ;;  %v412_v63 = vmul.f32 %v411_v1, %v389_v60  ;;  %v4233_v6 = vadd.f32 %v256_v54, %v195_v56  ;;  %v6258_v0 = vld [vmem:[#allocation42_spill] sm:$0xff]  ;;  %v6267_v41 = vld [vmem:[#allocation51_spill] sm:$0xff]  ;;  %v6272_v56 = vld [vmem:[#allocation56_spill] sm:$0xff] }
  0xe4   :  { %855 = vmatpush.msrb.mxu1 %v4015_v23  ;;  %707 = vmatpush.msrb.mxu0 %v3908_v8  ;;  %v6239_v8 = vld [vmem:[#allocation24_spill] sm:$0xff]  ;;  %v6261_v23 = vld [vmem:[#allocation45_spill] sm:$0xff]  ;;  %v6270_v46 = vld [vmem:[#allocation54_spill] sm:$0xff] }
  0xe5   :  { %667 = vmatpush.msra.mxu2 %v3840_v10  ;;  %688 = vmatpush.msra.mxu3 %v3906_v7  ;;  %v413_v10 = vadd.f32 %v412_v63, %v4233_v6  ;;  %v6238_v7 = vld [vmem:[#allocation72_spill] sm:$0xff]  ;;  %v6271_v1 = vld [vmem:[#allocation55_spill] sm:$0xff]  ;;  %v6273_v60 = vld [vmem:[#allocation57_spill] sm:$0xff] }
  0xe6   :  { %856 = vmatpush.msrb.mxu1 %v4028_v9  ;;  %708 = vmatpush.msrb.mxu0 %v3914_v12  ;;  %v6260_v9 = vld [vmem:[#allocation44_spill] sm:$0xff]  ;;  %v6274_v54 = vld [vmem:[#allocation58_spill] sm:$0xff]  ;;  %v6277_v63 = vld [vmem:[#allocation61_spill] sm:$0xff] }
  0xe7   :  { %668 = vmatpush.msra.mxu2 %v3843_v13  ;;  %689 = vmatpush.msra.mxu3 %v3912_v11  ;;  %v6240_v11 = vld [vmem:[#allocation29_spill] sm:$0xff] }
  0xe8   :  { %v3345_v3 = vpop.eup %3344  ;;  %857 = vmatpush.msrb.mxu1 %v4040_v57  ;;  %709 = vmatpush.msrb.mxu0 %v3920_v17  ;;  %v6256_v57 = vld [vmem:[#allocation40_spill] sm:$0xff] }
  0xe9   :  { %v395_v59 = vadd.f32 1.0, %v3345_v3  ;;  %669 = vmatpush.msra.mxu2 %v3846_v16  ;;  %690 = vmatpush.msra.mxu3 %v3918_v15  ;;  %v6241_v15 = vld [vmem:[#allocation28_spill] sm:$0xff]  ;;  %v6275_v3 = vld [vmem:[#allocation59_spill] sm:$0xff] }
  0xea   :  { %858 = vmatpush.msrb.mxu1 %v4052_v61  ;;  %710 = vmatpush.msrb.mxu0 %v3926_v21  ;;  %v6257_v61 = vld [vmem:[#allocation41_spill] sm:$0xff] }
  0xeb   :  { %3346 = vrcp.f32 %v395_v59  ;;  %670 = vmatpush.msra.mxu2 %v3849_v19  ;;  %691 = vmatpush.msra.mxu3 %v3924_v20  ;;  %v405_v62 = vand.u32 2147483647, %v395_v59  ;;  %vm401_vm5 = vweird.f32 %v395_v59  ;;  %v6242_v20 = vld [vmem:[#allocation32_spill] sm:$0xff] }
  0xec   :  { %859 = vmatpush.msrb.mxu1 %v4064_v5  ;;  %711 = vmatpush.msrb.mxu0 %v3932_v26  ;;  %3348 = vtanh.f32 %v413_v10  ;;  %v6245_v26 = vld [vmem:[#allocation31_spill] sm:$0xff]  ;;  %v6278_v10 = vld [vmem:[#allocation62_spill] sm:$0xff] }
  0xed   :  { %671 = vmatpush.msra.mxu2 %v3852_v22  ;;  %692 = vmatpush.msra.mxu3 %v3930_v24  ;;  %v407_v22 = vand.u32 2147483648, %v395_v59  ;;  %vm406_vm7 = vcmp.eq.f32.partialorder %v405_v62, 8.507059e+37  ;;  %v6244_v24 = vld [vmem:[#allocation25_spill] sm:$0xff]  ;;  %v6259_v5 = vld [vmem:[#allocation43_spill] sm:$0xff]  ;;  %v6284_v62 = vld [vmem:[#allocation68_spill] sm:$0xff] }
  0xee   :  { %860 = vmatpush.msrb.mxu1 %v4076_v18  ;;  %712 = vmatpush.msrb.mxu0 %v3938_v30  ;;  %v6246_v30 = vld [vmem:[#allocation34_spill] sm:$0xff]  ;;  %v6263_v18 = vld [vmem:[#allocation47_spill] sm:$0xff] }
  0xef   :  { %672 = vmatpush.msra.mxu2 %v3855_v25  ;;  %693 = vmatpush.msra.mxu3 %v3936_v28 }
  0xf0   :  { %861 = vmatpush.msrb.mxu1 %v4090_v27  ;;  %713 = vmatpush.msrb.mxu0 %v3944_v32  ;;  %v6248_v32 = vld [vmem:[#allocation26_spill] sm:$0xff] }
  0xf1   :  { %v3347_v13 = vpop.eup %3346  ;;  %673 = vmatpush.msra.mxu2 %v3858_v29  ;;  %694 = vmatpush.msra.mxu3 %v3942_v31  ;;  %v6247_v31 = vld [vmem:[#allocation80_spill] sm:$0xff]  ;;  %v6262_v27 = vld [vmem:[#allocation46_spill] sm:$0xff] }
  0xf2   :  { %v397_v16 = vmul.f32 %v3347_v13, %v395_v59  ;;  %862 = vmatpush.msrb.mxu1 %v4103_v53  ;;  %vm402_vm4 = vweird.f32 %v3347_v13  ;;  %714 = vmatpush.msrb.mxu0 %v3950_v35  ;;  %v3349_v29 = vpop.eup %3348  ;;  %v6265_v53 = vld [vmem:[#allocation49_spill] sm:$0xff]  ;;  %v6276_v59 = vld [vmem:[#allocation60_spill] sm:$0xff] }
  0xf3   :  { %674 = vmatpush.msra.mxu2 %v3861_v34  ;;  %695 = vmatpush.msra.mxu3 %v3948_v33  ;;  %vm403_vm6 = vmor %vm401_vm5, %vm402_vm4  ;;  %v408_v34 = vor.u32 1.1754944e-38, %v407_v22  ;;  %v415_v17 = vsub.f32 %v6241_v15, %v3349_v29  ;;  %v6249_v33 = vld [vmem:[#allocation33_spill] sm:$0xff]  ;;  %v6282_v22 = vld [vmem:[#allocation66_spill] sm:$0xff] }
  0xf4   :  { %v398_v19 = vsub.f32 1.0, %v397_v16  ;;  %863 = vmatpush.msrb.mxu1 %v4115_v51  ;;  %715 = vmatpush.msrb.mxu0 %v6237_v4  ;;  %v6264_v51 = vld [vmem:[#allocation48_spill] sm:$0xff]  ;;  %v6287_v4 = vld [vmem:[#allocation71_spill] sm:$0xff] }
  0xf5   :  { %675 = vmatpush.msra.mxu2 %v3864_v38  ;;  %696 = vmatpush.msra.mxu3 %v6240_v11  ;;  %v6243_v38 = vld [vmem:[#allocation76_spill] sm:$0xff]  ;;  %v6291_v11 = vld [vmem:[#allocation77_spill] sm:$0xff]  ;;  %v6293_v15 = vld [vmem:[#allocation79_spill] sm:$0xff] }
  0xf6   :  { %v399_v25 = vmul.f32 %v3347_v13, %v398_v19  ;;  %864 = vmatpush.msrb.mxu1 %v6238_v7  ;;  %716 = vmatpush.msrb.mxu0 %v6242_v20  ;;  %v6280_v16 = vld [vmem:[#allocation64_spill] sm:$0xff]  ;;  %v6281_v19 = vld [vmem:[#allocation65_spill] sm:$0xff]  ;;  %v6295_v20 = vld [vmem:[#allocation83_spill] sm:$0xff] }
  0xf7   :  { %676 = vmatpush.msra.mxu2 %v6239_v8  ;;  %697 = vmatpush.msra.mxu3 %v6245_v26  ;;  %v6288_v7 = vld [vmem:[#allocation73_spill] sm:$0xff]  ;;  %v6290_v8 = vld [vmem:[#allocation75_spill] sm:$0xff] }
  0xf8   :  { %v400_v2 = vadd.f32 %v3347_v13, %v399_v25  ;;  %865 = vmatpush.msrb.mxu1 %v6243_v38  ;;  %717 = vmatpush.msrb.mxu0 %v6246_v30  ;;  %v6283_v25 = vld [vmem:[#allocation67_spill] sm:$0xff]  ;;  %v6296_v38 = vld [vmem:[#allocation84_spill] sm:$0xff] }
  0xf9   :  { %677 = vmatpush.msra.mxu2 %v6244_v24  ;;  %698 = vmatpush.msra.mxu3 %v6249_v33  ;;  %v260_v24 = vld [vmem:[%s5898_s7] sm:$0xf] }
  0xfa   :  { %v404_v12 = vsel %vm403_vm6, %v3347_v13, %v400_v2  ;;  %866 = vmatpush.msrb.mxu1 %v6247_v31  ;;  %718 = vmatpush.msrb.mxu0 %v6250_v37  ;;  %v6279_v13 = vld [vmem:[#allocation63_spill] sm:$0xff]  ;;  %v6286_v2 = vld [vmem:[#allocation70_spill] sm:$0xff]  ;;  %v4342_v26 = vperm.slane %v260_v24, 0 }
  0xfb   :  { %v409_v21 = vsel %vm406_vm7, %v408_v34, %v404_v12  ;;  %678 = vmatpush.msra.mxu2 %v6248_v32  ;;  %699 = vmatpush.msra.mxu3 %v6253_v45  ;;  %v6289_v34 = vld [vmem:[#allocation74_spill] sm:$0xff]  ;;  %v3748_v32 = vmov 0.0  }
  0xfc   :  { %v416_v28 = vmul.f32 %v415_v17, %v409_v21  ;;  %867 = vmatpush.msrb.mxu1 %v6251_v40  ;;  %719 = vmatpush.msrb.mxu0 %v6254_v48  ;;  %v6292_v12 = vld [vmem:[#allocation78_spill] sm:$0xff]  ;;  %v6294_v17 = vld [vmem:[#allocation81_spill] sm:$0xff]  ;;  %6298 = vst [vmem:[#allocation30_spill] sm:$0xff] %v4342_v26 }
  0xfd   :  { %679 = vmatpush.msra.mxu2 %v6252_v44  ;;  %v6297_v21 = vld [vmem:[#allocation86_spill] sm:$0xff]  ;;  %261 = vst [vmem:[#allocation2] sm:$0xff] %v3748_v32 }
  0xfe   :  { %v4279_v35 = vadd.f32 %v3349_v29, %v416_v28  ;;  %868 = vmatpush.msrb.mxu1 %v4178_v47  ;;  %v6269_v47 = vld [vmem:[#allocation53_spill] sm:$0xff]  ;;  %v4344_v28 = vperm.slane %v260_v24, 1 }
  0xff   :  { %v6285_v29 = vld [vmem:[#allocation69_spill] sm:$0xff] }
 0x100   :  { %507 = vmatmul.f32.vlgmr.msrb.gmra.mxu2 %v4279_v35  ;;  %527 = vmatmul.f32.vlgmr.msrb.gmra.mxu3 %v4279_v35  ;;  %6299 = vst [vmem:[#allocation72_spill] sm:$0xff] %v4344_v28 }
 0x101   :  { %547 = vmatmul.f32.vlgmr.msra.gmra.mxu0 %v4279_v35  ;;  %567 = vmatmul.f32.vlgmr.msra.gmra.mxu1 %v4279_v35 }
 0x102   :  { %873 = vmatpush.msrb.mxu2 %v6255_v52  ;;  %893 = vmatpush.msrb.mxu3 %v6256_v57 }
 0x103   :  { %913 = vmatpush.msra.mxu0 %v6257_v61 }
 0x104   :  { %874 = vmatpush.msrb.mxu2 %v6258_v0  ;;  %894 = vmatpush.msrb.mxu3 %v6259_v5  ;;  %v4348_v0 = vperm.slane %v260_v24, 3 }
 0x105   :  { %914 = vmatpush.msra.mxu0 %v6260_v9 }
 0x106   :  { %875 = vmatpush.msrb.mxu2 %v6261_v23  ;;  %895 = vmatpush.msrb.mxu3 %v6262_v27  ;;  %6300 = vst [vmem:[#allocation24_spill] sm:$0xff] %v4348_v0  ;;  %v4350_v27 = vperm.slane %v260_v24, 2 }
 0x107   :  { %915 = vmatpush.msra.mxu0 %v6263_v18 }
 0x108   :  { %876 = vmatpush.msrb.mxu2 %v6264_v51  ;;  %896 = vmatpush.msrb.mxu3 %v6265_v53  ;;  %6301 = vst [vmem:[#allocation29_spill] sm:$0xff] %v4350_v27 }
 0x109   :  { %916 = vmatpush.msra.mxu0 %v6266_v42 }
 0x10a   :  { %877 = vmatpush.msrb.mxu2 %v6267_v41  ;;  %897 = vmatpush.msrb.mxu3 %v6268_v49 }
 0x10b   :  { %917 = vmatpush.msra.mxu0 %v6269_v47 }
 0x10c   :  { %878 = vmatpush.msrb.mxu2 %v6270_v46  ;;  %898 = vmatpush.msrb.mxu3 %v6271_v1 }
 0x10d   :  { %918 = vmatpush.msra.mxu0 %v6272_v56 }
 0x10e   :  { %879 = vmatpush.msrb.mxu2 %v6273_v60  ;;  %899 = vmatpush.msrb.mxu3 %v6274_v54 }
 0x10f   :  { %919 = vmatpush.msra.mxu0 %v6275_v3 }
 0x110   :  { %880 = vmatpush.msrb.mxu2 %v6276_v59  ;;  %900 = vmatpush.msrb.mxu3 %v6277_v63 }
 0x111   :  { %920 = vmatpush.msra.mxu0 %v6278_v10 }
 0x112   :  { %881 = vmatpush.msrb.mxu2 %v6279_v13  ;;  %901 = vmatpush.msrb.mxu3 %v6280_v16 }
 0x113   :  { %921 = vmatpush.msra.mxu0 %v6281_v19 }
 0x114   :  { %882 = vmatpush.msrb.mxu2 %v6282_v22  ;;  %902 = vmatpush.msrb.mxu3 %v6283_v25 }
 0x115   :  { %922 = vmatpush.msra.mxu0 %v6284_v62 }
 0x116   :  { %883 = vmatpush.msrb.mxu2 %v6285_v29  ;;  %903 = vmatpush.msrb.mxu3 %v6286_v2 }
 0x117   :  { %923 = vmatpush.msra.mxu0 %v6287_v4 }
 0x118   :  { %884 = vmatpush.msrb.mxu2 %v6288_v7  ;;  %904 = vmatpush.msrb.mxu3 %v6289_v34  ;;  %v6302_v7 = vld [vmem:[#allocation39_spill] sm:$0xff] }
 0x119   :  { %924 = vmatpush.msra.mxu0 %v6290_v8 }
 0x11a   :  { %885 = vmatpush.msrb.mxu2 %v6291_v11  ;;  %905 = vmatpush.msrb.mxu3 %v6292_v12 }
 0x11b   :  { %925 = vmatpush.msra.mxu0 %v6293_v15 }
 0x11c   :  { %886 = vmatpush.msrb.mxu2 %v6294_v17  ;;  %906 = vmatpush.msrb.mxu3 %v6295_v20 }
 0x11d   :  { %926 = vmatpush.msra.mxu0 %v6296_v38 }
 0x11e   :  { %887 = vmatpush.msrb.mxu2 %v6297_v21  ;;  %907 = vmatpush.msrb.mxu3 %v4172_v58 }
 0x11f   :  { %927 = vmatpush.msra.mxu0 %v4176_v43 }
 0x120   :  { %888 = vmatpush.msrb.mxu2 %v4180_v14  ;;  %908 = vmatpush.msrb.mxu3 %v4187_v55 }
 0x121   :  { %928 = vmatpush.msra.mxu0 %v4189_v36 }
 0x17e   :  { %v568_v23 = vpop.f32.mrf.mxu1  ;;  %v548_v51 = vpop.f32.mrf.mxu0 }
 0x17f   :  { %v569_v41 = vadd.f32 %v568_v23, %v4348_v0  ;;  %v549_v46 = vadd.f32 %v548_v51, %v4350_v27 }
 0x183   :  { %v508_v30 = vpop.f32.mrf.mxu2  ;;  %v528_v31 = vpop.f32.mrf.mxu3 }
 0x184   :  { %v509_v58 = vadd.f32 %v508_v30, %v4342_v26  ;;  %v529_v14 = vadd.f32 %v528_v31, %v4344_v28 }
 0x186   :  { %v3292_v43 = vmul.f32 -1.442695, %v509_v58  ;;  %v3293_v55 = vmul.f32 -1.442695, %v529_v14 }
 0x188   :  { %3350 = vpow2.f32 %v3292_v43 }
 0x189   :  { %3352 = vpow2.f32 %v3293_v55 }
 0x18e   :  { %v3351_v36 = vpop.eup %3350 }
 0x18f   :  { %v3353_v33 = vpop.eup %3352  ;;  %v574_v37 = vadd.f32 1.0, %v3351_v36 }
 0x190   :  { %v593_v40 = vadd.f32 1.0, %v3353_v33 }
 0x191   :  { %3354 = vrcp.f32 %v574_v37  ;;  %v586_v57 = vand.u32 2147483648, %v574_v37  ;;  %v584_v9 = vand.u32 2147483647, %v574_v37  ;;  %vm580_vm9 = vweird.f32 %v574_v37 }
 0x192   :  { %3356 = vrcp.f32 %v593_v40  ;;  %v605_v3 = vand.u32 2147483648, %v593_v40  ;;  %vm599_vm13 = vweird.f32 %v593_v40  ;;  %v603_v59 = vand.u32 2147483647, %v593_v40 }
 0x193   :  { %v587_v53 = vor.u32 1.1754944e-38, %v586_v57  ;;  %vm585_vm11 = vcmp.eq.f32.partialorder %v584_v9, 8.507059e+37 }
 0x194   :  { %v606_v13 = vor.u32 1.1754944e-38, %v605_v3  ;;  %vm604_vm15 = vcmp.eq.f32.partialorder %v603_v59, 8.507059e+37  ;;  %v4373_v3 = vld [vmem:[#allocation11 + $0x158] sm:$0xff]  ;;  %v4375_v59 = vld [vmem:[#allocation11 + $0x160] sm:$0xff] }
 0x197   :  { %v3355_v44 = vpop.eup %3354 }
 0x198   :  { %v3357_v45 = vpop.eup %3356  ;;  %v576_v48 = vmul.f32 %v3355_v44, %v574_v37  ;;  %vm581_vm8 = vweird.f32 %v3355_v44 }
 0x199   :  { %v595_v61 = vmul.f32 %v3357_v45, %v593_v40  ;;  %vm582_vm10 = vmor %vm580_vm9, %vm581_vm8  ;;  %vm600_vm12 = vweird.f32 %v3357_v45 }
 0x19a   :  { %v577_v52 = vsub.f32 1.0, %v576_v48  ;;  %vm601_vm14 = vmor %vm599_vm13, %vm600_vm12 }
 0x19b   :  { %v596_v42 = vsub.f32 1.0, %v595_v61 }
 0x19c   :  { %v578_v5 = vmul.f32 %v3355_v44, %v577_v52 }
 0x19d   :  { %v597_v56 = vmul.f32 %v3357_v45, %v596_v42 }
 0x19e   :  { %v579_v18 = vadd.f32 %v3355_v44, %v578_v5 }
 0x19f   :  { %v598_v54 = vadd.f32 %v3357_v45, %v597_v56  ;;  %v4364_v56 = vld [vmem:[#allocation11 + $0x170] sm:$0xff] }
 0x1a0   :  { %v583_v49 = vsel %vm582_vm10, %v3355_v44, %v579_v18 }
 0x1a1   :  { %v588_v47 = vsel %vm585_vm11, %v587_v53, %v583_v49  ;;  %v602_v63 = vsel %vm601_vm14, %v3357_v45, %v598_v54  ;;  %v4371_v54 = vld [vmem:[#allocation11 + $0x150] sm:$0xff] }
 0x1a2   :  { %v609_v1 = vmul.f32 %v588_v47, %v569_v41  ;;  %v607_v19 = vsel %vm604_vm15, %v606_v13, %v602_v63  ;;  %v4380_v63 = vld [vmem:[#allocation11 + $0x138] sm:$0xff]  ;;  %v4384_v13 = vld [vmem:[#allocation11 + $0x148] sm:$0xff] }
 0x1a4   :  { %v610_v60 = vadd.f32 %v609_v1, %v549_v46  ;;  %v4362_v1 = vld [vmem:[#allocation11 + $0x168] sm:$0xff] }
 0x1a5   :  { %1032 = vmatpush.msra.mxu1 %v4362_v1 }
 0x1a6   :  { %3358 = vtanh.f32 %v610_v60  ;;  %v4366_v60 = vld [vmem:[#allocation11 + $0x178] sm:$0xff] }
 0x1a7   :  { %1033 = vmatpush.msra.mxu1 %v4371_v54 }
 0x1a9   :  { %1034 = vmatpush.msra.mxu1 %v4380_v63 }
 0x1ac   :  { %v3359_v10 = vpop.eup %3358 }
 0x1ad   :  { %v612_v16 = vsub.f32 %v4279_v35, %v3359_v10 }
 0x1af   :  { %v613_v22 = vmul.f32 %v612_v16, %v607_v19  ;;  %v4389_v16 = vld [vmem:[#allocation11 + $0x120] sm:$0xff]  ;;  %v4391_v19 = vld [vmem:[#allocation11 + $0x128] sm:$0xff] }
 0x1b0   :  { %1035 = vmatpush.msra.mxu1 %v4389_v16 }
 0x1b1   :  { %v614_v25 = vadd.f32 %v3359_v10, %v613_v22  ;;  %v4382_v10 = vld [vmem:[#allocation11 + $0x140] sm:$0xff]  ;;  %v4393_v22 = vld [vmem:[#allocation11 + $0x130] sm:$0xff] }
 0x1b3   :  { %615 = vst [vmem:[#allocation2] sm:$0x1] %v614_v25  ;;  %680 = vmatmul.f32.vlgmr.msra.gmra.mxu2 %v614_v25  ;;  %700 = vmatmul.f32.vlgmr.msra.gmra.mxu3 %v614_v25 }
 0x1b4   :  { %720 = vmatmul.f32.vlgmr.msrb.gmra.mxu0 %v614_v25  ;;  %1052 = vmatpush.msra.mxu2 %v4364_v56 }
 0x1b5   :  { %1072 = vmatpush.msra.mxu3 %v4366_v60 }
 0x1b6   :  { %1053 = vmatpush.msra.mxu2 %v4373_v3 }
 0x1b7   :  { %1073 = vmatpush.msra.mxu3 %v4375_v59 }
 0x1b8   :  { %1054 = vmatpush.msra.mxu2 %v4382_v10 }
 0x1b9   :  { %1074 = vmatpush.msra.mxu3 %v4384_v13 }
 0x1ba   :  { %1055 = vmatpush.msra.mxu2 %v4391_v19 }
 0x1bb   :  { %1075 = vmatpush.msra.mxu3 %v4393_v22 }
 0x231   :  { %v721_v24 = vpop.f32.mrf.mxu0 }
 0x232   :  { %v770_v58 = vadd.f32 %v721_v24, %v4212_v39  ;;  %v4435_v24 = vld [vmem:[#allocation11 + $0xa8] sm:$0xff] }
 0x234   :  { %v772_v37 = vrot.slane %v770_v58, 7 }
 0x236   :  { %v681_v62 = vpop.f32.mrf.mxu2  ;;  %v701_v29 = vpop.f32.mrf.mxu3 }
 0x237   :  { %v725_v2 = vrot.slane %v681_v62, 7  ;;  %v748_v4 = vrot.slane %v701_v29, 7  ;;  %v4400_v62 = vld [vmem:[#allocation11 + $0x110] sm:$0xff]  ;;  %v4402_v29 = vld [vmem:[#allocation11 + $0x118] sm:$0xff] }
 0x238   :  { %1056 = vmatpush.msra.mxu2 %v4400_v62  ;;  %1076 = vmatpush.msra.mxu3 %v4402_v29 }
 0x239   :  { %v727_v34 = vadd.f32 %v725_v2, %v6302_v7  ;;  %v750_v8 = vadd.f32 %v748_v4, %v4158_v50  ;;  %v4407_v2 = vld [vmem:[#allocation11 + $0xf0] sm:$0xff]  ;;  %v4409_v4 = vld [vmem:[#allocation11 + $0xf8] sm:$0xff] }
 0x23a   :  { %1057 = vmatpush.msra.mxu2 %v4409_v4 }
 0x23b   :  { %v3294_v11 = vmul.f32 -1.442695, %v727_v34  ;;  %v3295_v12 = vmul.f32 -1.442695, %v750_v8  ;;  %v4411_v34 = vld [vmem:[#allocation11 + $0x100] sm:$0xff] }
 0x23c   :  { %1077 = vmatpush.msra.mxu3 %v4411_v34 }
 0x23d   :  { %3360 = vpow2.f32 %v3294_v11 }
 0x23e   :  { %3362 = vpow2.f32 %v3295_v12  ;;  %v4417_v12 = vld [vmem:[#allocation11 + $0xd8] sm:$0xff] }
 0x243   :  { %v3361_v35 = vpop.eup %3360 }
 0x244   :  { %v3363_v15 = vpop.eup %3362  ;;  %v731_v17 = vadd.f32 1.0, %v3361_v35  ;;  %v4419_v35 = vld [vmem:[#allocation11 + $0xe0] sm:$0xff] }
 0x245   :  { %v754_v20 = vadd.f32 1.0, %v3363_v15  ;;  %v4421_v15 = vld [vmem:[#allocation11 + $0xe8] sm:$0xff]  ;;  %1058 = vmatpush.msra.mxu2 %v4419_v35 }
 0x246   :  { %3364 = vrcp.f32 %v731_v17  ;;  %v743_v31 = vand.u32 2147483648, %v731_v17  ;;  %v741_v43 = vand.u32 2147483647, %v731_v17  ;;  %vm737_vm1 = vweird.f32 %v731_v17  ;;  %1078 = vmatpush.msra.mxu3 %v4421_v15 }
 0x247   :  { %3366 = vrcp.f32 %v754_v20  ;;  %v766_v5 = vand.u32 2147483648, %v754_v20  ;;  %vm760_vm5 = vweird.f32 %v754_v20  ;;  %v764_v9 = vand.u32 2147483647, %v754_v20 }
 0x248   :  { %v744_v36 = vor.u32 1.1754944e-38, %v743_v31  ;;  %vm742_vm3 = vcmp.eq.f32.partialorder %v741_v43, 8.507059e+37  ;;  %v4439_v31 = vld [vmem:[#allocation11 + $0xb8] sm:$0xff] }
 0x249   :  { %v767_v53 = vor.u32 1.1754944e-38, %v766_v5  ;;  %vm765_vm7 = vcmp.eq.f32.partialorder %v764_v9, 8.507059e+37  ;;  %v4447_v43 = vld [vmem:[#allocation11 + $0x98] sm:$0xff]  ;;  %v4481_v9 = vld [vmem:[#allocation11 + $0x30] sm:$0xff] }
 0x24a   :  { %v4476_v5 = vld [vmem:[#allocation11 + $0x58] sm:$0xff]  ;;  %6307 = vst [vmem:[#allocation31_spill] sm:$0xff] %v4481_v9 }
 0x24b   :  { %6306 = vst [vmem:[#allocation25_spill] sm:$0xff] %v4476_v5 }
 0x24c   :  { %v3365_v38 = vpop.eup %3364 }
 0x24d   :  { %v733_v21 = vmul.f32 %v3365_v38, %v731_v17  ;;  %v3367_v32 = vpop.eup %3366  ;;  %vm738_vm0 = vweird.f32 %v3365_v38 }
 0x24e   :  { %vm739_vm2 = vmor %vm737_vm1, %vm738_vm0  ;;  %v756_v33 = vmul.f32 %v3367_v32, %v754_v20  ;;  %vm761_vm4 = vweird.f32 %v3367_v32  ;;  %v4426_v20 = vld [vmem:[#allocation11 + $0xc0] sm:$0xff] }
 0x24f   :  { %v734_v30 = vsub.f32 1.0, %v733_v21  ;;  %vm762_vm6 = vmor %vm760_vm5, %vm761_vm4  ;;  %v4430_v21 = vld [vmem:[#allocation11 + $0xd0] sm:$0xff] }
 0x250   :  { %v757_v48 = vsub.f32 1.0, %v756_v33  ;;  %1079 = vmatpush.msra.mxu3 %v4430_v21  ;;  %v4454_v33 = vld [vmem:[#allocation11 + $0x78] sm:$0xff] }
 0x251   :  { %v735_v14 = vmul.f32 %v3365_v38, %v734_v30  ;;  %v4437_v30 = vld [vmem:[#allocation11 + $0xb0] sm:$0xff] }
 0x252   :  { %v758_v57 = vmul.f32 %v3367_v32, %v757_v48  ;;  %1080 = vmatpush.msra.mxu3 %v4439_v31  ;;  %v4465_v48 = vld [vmem:[#allocation11 + $0x68] sm:$0xff] }
 0x253   :  { %v736_v55 = vadd.f32 %v3365_v38, %v735_v14  ;;  %v4445_v14 = vld [vmem:[#allocation11 + $0x90] sm:$0xff] }
 0x254   :  { %v759_v61 = vadd.f32 %v3367_v32, %v758_v57 }
 0x255   :  { %v740_v40 = vsel %vm739_vm2, %v3365_v38, %v736_v55  ;;  %v4428_v38 = vld [vmem:[#allocation11 + $0xc8] sm:$0xff]  ;;  %v4449_v55 = vld [vmem:[#allocation11 + $0xa0] sm:$0xff] }
 0x256   :  { %v745_v44 = vsel %vm742_vm3, %v744_v36, %v740_v40  ;;  %v763_v18 = vsel %vm762_vm6, %v3367_v32, %v759_v61  ;;  %1059 = vmatpush.msra.mxu2 %v4428_v38  ;;  %1081 = vmatpush.msra.mxu3 %v4449_v55  ;;  %v4458_v40 = vld [vmem:[#allocation11 + $0x88] sm:$0xff] }
 0x257   :  { %v774_v45 = vmul.f32 %v772_v37, %v745_v44  ;;  %v768_v41 = vsel %vm765_vm7, %v767_v53, %v763_v18  ;;  %v4456_v37 = vld [vmem:[#allocation11 + $0x80] sm:$0xff]  ;;  %v4472_v61 = vld [vmem:[#allocation11 + $0x48] sm:$0xff]  ;;  %v4490_v53 = vld [vmem:[#allocation11 + $0x18] sm:$0xff] }
 0x258   :  { %1060 = vmatpush.msra.mxu2 %v4437_v30  ;;  %1082 = vmatpush.msra.mxu3 %v4458_v40  ;;  %6304 = vst [vmem:[#allocation32_spill] sm:$0xff] %v4472_v61  ;;  %v4485_v18 = vld [vmem:[#allocation11 + $0x40] sm:$0xff] }
 0x259   :  { %v775_v52 = vadd.f32 %v774_v45, %v4233_v6  ;;  %v4463_v45 = vld [vmem:[#allocation11 + $0x60] sm:$0xff]  ;;  %6309 = vst [vmem:[#allocation80_spill] sm:$0xff] %v4485_v18 }
 0x25a   :  { %1061 = vmatpush.msra.mxu2 %v4447_v43  ;;  %6310 = vst [vmem:[#allocation26_spill] sm:$0xff] %v4490_v53 }
 0x25b   :  { %3368 = vtanh.f32 %v775_v52  ;;  %v4467_v52 = vld [vmem:[#allocation11 + $0x70] sm:$0xff] }
 0x25c   :  { %1062 = vmatpush.msra.mxu2 %v4456_v37  ;;  %6303 = vst [vmem:[#allocation28_spill] sm:$0xff] %v4467_v52  ;;  %1083 = vmatpush.msra.mxu3 %v4467_v52 }
 0x25e   :  { %1063 = vmatpush.msra.mxu2 %v4465_v48  ;;  %1084 = vmatpush.msra.mxu3 %v4476_v5 }
 0x260   :  { %1085 = vmatpush.msra.mxu3 %v4485_v18 }
 0x261   :  { %v3369_v39 = vpop.eup %3368 }
 0x262   :  { %v778_v23 = vrot.slane %v3369_v39, 1 }
 0x264   :  { %v780_v51 = vsub.f32 %v614_v25, %v778_v23  ;;  %v4398_v25 = vld [vmem:[#allocation11 + $0x108] sm:$0xff]  ;;  %v4483_v23 = vld [vmem:[#allocation11 + $0x38] sm:$0xff] }
 0x265   :  { %1036 = vmatpush.msra.mxu1 %v4398_v25  ;;  %6308 = vst [vmem:[#allocation34_spill] sm:$0xff] %v4483_v23 }
 0x266   :  { %v782_v42 = vrot.slane %v780_v51, 7 }
 0x267   :  { %1037 = vmatpush.msra.mxu1 %v4407_v2 }
 0x268   :  { %v784_v49 = vmul.f32 %v782_v42, %v768_v41  ;;  %v4492_v42 = vld [vmem:[#allocation11 + $0x20] sm:$0xff]  ;;  %v4494_v41 = vld [vmem:[#allocation11 + $0x28] sm:$0xff] }
 0x269   :  { %1038 = vmatpush.msra.mxu1 %v4417_v12  ;;  %6311 = vst [vmem:[#allocation33_spill] sm:$0xff] %v4492_v42  ;;  %1086 = vmatpush.msra.mxu3 %v4494_v41 }
 0x26a   :  { %v4359_v47 = vadd.f32 %v3369_v39, %v784_v49  ;;  %v4474_v39 = vld [vmem:[#allocation11 + $0x50] sm:$0xff]  ;;  %6312 = vst [vmem:[#allocation36_spill] sm:$0xff] %v4494_v41 }
 0x26b   :  { %1039 = vmatpush.msra.mxu1 %v4426_v20  ;;  %6305 = vst [vmem:[#allocation76_spill] sm:$0xff] %v4474_v39  ;;  %1064 = vmatpush.msra.mxu2 %v4474_v39 }
 0x26c   :  { %v851_v46 = vrot.slane %v4359_v47, 1 }
 0x26d   :  { %1040 = vmatpush.msra.mxu1 %v4435_v24  ;;  %1065 = vmatpush.msra.mxu2 %v4483_v23 }
 0x26e   :  { %869 = vmatmul.f32.vlgmr.msrb.gmra.mxu1 %v851_v46  ;;  %889 = vmatmul.f32.vlgmr.msrb.gmra.mxu2 %v851_v46 }
 0x26f   :  { %909 = vmatmul.f32.vlgmr.msrb.gmra.mxu3 %v851_v46  ;;  %929 = vmatmul.f32.vlgmr.msra.gmra.mxu0 %v851_v46  ;;  %v4499_v46 = vld [vmem:[#allocation11] sm:$0xff] }
 0x270   :  { %1041 = vmatpush.msra.mxu1 %v4445_v14  ;;  %1066 = vmatpush.msra.mxu2 %v4492_v42  ;;  %6313 = vst [vmem:[#allocation85_spill] sm:$0xff] %v4499_v46 }
 0x272   :  { %1042 = vmatpush.msra.mxu1 %v4454_v33 }
 0x274   :  { %1043 = vmatpush.msra.mxu1 %v4463_v45 }
 0x276   :  { %1044 = vmatpush.msra.mxu1 %v4472_v61 }
 0x278   :  { %1045 = vmatpush.msra.mxu1 %v4481_v9 }
 0x27a   :  { %1046 = vmatpush.msra.mxu1 %v4490_v53 }
 0x27c   :  { %1047 = vmatpush.msra.mxu1 %v4499_v46 }
 0x2eb   :  { %v870_v8 = vpop.f32.mrf.mxu1 }
 0x2ec   :  { %v871_v11 = vadd.f32 %v870_v8, %v4342_v26  ;;  %v4501_v8 = vld [vmem:[#allocation11 + $0x8] sm:$0xff]  ;;  %v930_v26 = vpop.f32.mrf.mxu0 }
 0x2ed   :  { %6314 = vst [vmem:[#allocation27_spill] sm:$0xff] %v4501_v8  ;;  %1067 = vmatpush.msra.mxu2 %v4501_v8  ;;  %v931_v46 = vadd.f32 %v930_v26, %v4348_v0  ;;  %v4582_v0 = vld [vmem:[#allocation12 + $0x150] sm:$0xff] }
 0x2ee   :  { %v3296_v17 = vmul.f32 -1.442695, %v871_v11  ;;  %v4503_v11 = vld [vmem:[#allocation11 + $0x10] sm:$0xff]  ;;  %6332 = vst [vmem:[#allocation54_spill] sm:$0xff] %v4582_v0 }
 0x2ef   :  { %6315 = vst [vmem:[#allocation35_spill] sm:$0xff] %v4503_v11  ;;  %1087 = vmatpush.msra.mxu3 %v4503_v11 }
 0x2f0   :  { %3370 = vpow2.f32 %v3296_v17 }
 0x2f1   :  { %v890_v32 = vpop.f32.mrf.mxu2 }
 0x2f2   :  { %v891_v58 = vadd.f32 %v890_v32, %v4344_v28  ;;  %v910_v18 = vpop.f32.mrf.mxu3 }
 0x2f4   :  { %v3297_v36 = vmul.f32 -1.442695, %v891_v58 }
 0x2f6   :  { %v3371_v44 = vpop.eup %3370  ;;  %3372 = vpow2.f32 %v3297_v36 }
 0x2f7   :  { %v936_v57 = vadd.f32 1.0, %v3371_v44 }
 0x2f9   :  { %3374 = vrcp.f32 %v936_v57  ;;  %v948_v36 = vand.u32 2147483648, %v936_v57  ;;  %vm942_vm9 = vweird.f32 %v936_v57 }
 0x2fb   :  { %v949_v42 = vor.u32 1.1754944e-38, %v948_v36 }
 0x2fc   :  { %v3373_v51 = vpop.eup %3372 }
 0x2fd   :  { %v955_v49 = vadd.f32 1.0, %v3373_v51  ;;  %v946_v51 = vand.u32 2147483647, %v936_v57 }
 0x2ff   :  { %v3375_v17 = vpop.eup %3374  ;;  %3376 = vrcp.f32 %v955_v49  ;;  %vm947_vm11 = vcmp.eq.f32.partialorder %v946_v51, 8.507059e+37  ;;  %vm961_vm13 = vweird.f32 %v955_v49  ;;  %v965_v36 = vand.u32 2147483647, %v955_v49  ;;  %v4553_v51 = vld [vmem:[#allocation12 + $0x180] sm:$0xff] }
 0x300   :  { %v938_v32 = vmul.f32 %v3375_v17, %v936_v57  ;;  %vm943_vm8 = vweird.f32 %v3375_v17  ;;  %v967_v57 = vand.u32 2147483648, %v955_v49 }
 0x301   :  { %vm944_vm10 = vmor %vm942_vm9, %vm943_vm8  ;;  %vm966_vm15 = vcmp.eq.f32.partialorder %v965_v36, 8.507059e+37 }
 0x302   :  { %v939_v58 = vsub.f32 1.0, %v938_v32  ;;  %v911_v32 = vadd.f32 %v910_v18, %v4350_v27  ;;  %v4580_v27 = vld [vmem:[#allocation12 + $0x148] sm:$0xff] }
 0x303   :  { %6331 = vst [vmem:[#allocation53_spill] sm:$0xff] %v4580_v27 }
 0x304   :  { %v940_v44 = vmul.f32 %v3375_v17, %v939_v58 }
 0x305   :  { %v3377_v28 = vpop.eup %3376 }
 0x306   :  { %v941_v41 = vadd.f32 %v3375_v17, %v940_v44  ;;  %v957_v53 = vmul.f32 %v3377_v28, %v955_v49  ;;  %vm962_vm12 = vweird.f32 %v3377_v28  ;;  %v4537_v49 = vld [vmem:[#allocation12 + $0x1d8] sm:$0xff] }
 0x307   :  { %vm963_vm14 = vmor %vm961_vm13, %vm962_vm12  ;;  %6321 = vst [vmem:[#allocation43_spill] sm:$0xff] %v4537_v49 }
 0x308   :  { %v945_v23 = vsel %vm944_vm10, %v3375_v17, %v941_v41  ;;  %v958_v11 = vsub.f32 1.0, %v957_v53  ;;  %v968_v41 = vor.u32 1.1754944e-38, %v967_v57  ;;  %v4549_v17 = vld [vmem:[#allocation12 + $0x1b8] sm:$0xff] }
 0x309   :  { %v950_v8 = vsel %vm947_vm11, %v949_v42, %v945_v23  ;;  %6324 = vst [vmem:[#allocation46_spill] sm:$0xff] %v4549_v17  ;;  %v4561_v57 = vld [vmem:[#allocation12 + $0x198] sm:$0xff] }
 0x30a   :  { %v971_v9 = vmul.f32 %v950_v8, %v931_v46  ;;  %v959_v5 = vmul.f32 %v3377_v28, %v958_v11  ;;  %v4541_v46 = vld [vmem:[#allocation12 + $0x1a0] sm:$0xff]  ;;  %v4543_v8 = vld [vmem:[#allocation12 + $0x1a8] sm:$0xff]  ;;  %v4545_v11 = vld [vmem:[#allocation12 + $0x1b0] sm:$0xff]  ;;  %6327 = vst [vmem:[#allocation49_spill] sm:$0xff] %v4561_v57 }
 0x30b   :  { %6322 = vst [vmem:[#allocation44_spill] sm:$0xff] %v4543_v8 }
 0x30c   :  { %v972_v58 = vadd.f32 %v971_v9, %v911_v32  ;;  %v960_v39 = vadd.f32 %v3377_v28, %v959_v5  ;;  %v4517_v5 = vld [vmem:[#allocation12 + $0x1e0] sm:$0xff]  ;;  %v4533_v9 = vld [vmem:[#allocation12 + $0x1d0] sm:$0xff]  ;;  %6323 = vst [vmem:[#allocation45_spill] sm:$0xff] %v4545_v11  ;;  %v4555_v32 = vld [vmem:[#allocation12 + $0x188] sm:$0xff] }
 0x30d   :  { %1221 = vmatpush.msrb.mxu0 %v4517_v5  ;;  %6320 = vst [vmem:[#allocation42_spill] sm:$0xff] %v4533_v9 }
 0x30e   :  { %3378 = vtanh.f32 %v972_v58  ;;  %v964_v52 = vsel %vm963_vm14, %v3377_v28, %v960_v39  ;;  %v4519_v28 = vld [vmem:[#allocation12 + $0x1e8] sm:$0xff]  ;;  %6325 = vst [vmem:[#allocation47_spill] sm:$0xff] %v4555_v32  ;;  %v4557_v58 = vld [vmem:[#allocation12 + $0x190] sm:$0xff] }
 0x30f   :  { %v969_v42 = vsel %vm966_vm15, %v968_v41, %v964_v52  ;;  %6316 = vst [vmem:[#allocation37_spill] sm:$0xff] %v4519_v28  ;;  %1241 = vmatpush.msrb.mxu1 %v4519_v28  ;;  %v4525_v52 = vld [vmem:[#allocation12 + $0x1f8] sm:$0xff]  ;;  %v4531_v39 = vld [vmem:[#allocation12 + $0x1c8] sm:$0xff] }
 0x310   :  { %6318 = vst [vmem:[#allocation40_spill] sm:$0xff] %v4525_v52  ;;  %1281 = vmatpush.msrb.mxu3 %v4525_v52  ;;  %v4567_v41 = vld [vmem:[#allocation12 + $0x168] sm:$0xff] }
 0x311   :  { %6319 = vst [vmem:[#allocation41_spill] sm:$0xff] %v4531_v39  ;;  %1242 = vmatpush.msrb.mxu1 %v4531_v39  ;;  %v4682_v39 = vld [vmem:[#allocation12 + $0x58] sm:$0xff] }
 0x312   :  { %1282 = vmatpush.msrb.mxu3 %v4537_v49  ;;  %6326 = vst [vmem:[#allocation48_spill] sm:$0xff] %v4557_v58  ;;  %v4655_v49 = vld [vmem:[#allocation12 + $0x90] sm:$0xff] }
 0x313   :  { %1243 = vmatpush.msrb.mxu1 %v4543_v8  ;;  %6328 = vst [vmem:[#allocation50_spill] sm:$0xff] %v4567_v41 }
 0x314   :  { %v3379_v44 = vpop.eup %3378  ;;  %1283 = vmatpush.msrb.mxu3 %v4549_v17  ;;  %v4639_v17 = vld [vmem:[#allocation12 + $0xa8] sm:$0xff]  ;;  %6350 = vst [vmem:[#allocation73_spill] sm:$0xff] %v4655_v49 }
 0x315   :  { %v975_v61 = vrot.slane %v3379_v44, 7  ;;  %1244 = vmatpush.msrb.mxu1 %v4555_v32  ;;  %v4610_v32 = vld [vmem:[#allocation12 + $0x118] sm:$0xff]  ;;  %6346 = vst [vmem:[#allocation68_spill] sm:$0xff] %v4639_v17 }
 0x316   :  { %1284 = vmatpush.msrb.mxu3 %v4561_v57  ;;  %v4586_v57 = vld [vmem:[#allocation12 + $0x158] sm:$0xff]  ;;  %6339 = vst [vmem:[#allocation61_spill] sm:$0xff] %v4610_v32 }
 0x317   :  { %v977_v26 = vsub.f32 %v4359_v47, %v975_v61  ;;  %v4521_v47 = vld [vmem:[#allocation12 + $0x1f0] sm:$0xff]  ;;  %v4529_v61 = vld [vmem:[#allocation12 + $0x1c0] sm:$0xff]  ;;  %1245 = vmatpush.msrb.mxu1 %v4567_v41  ;;  %6333 = vst [vmem:[#allocation55_spill] sm:$0xff] %v4586_v57 }
 0x318   :  { %6317 = vst [vmem:[#allocation38_spill] sm:$0xff] %v4521_v47  ;;  %1261 = vmatpush.msrb.mxu2 %v4521_v47  ;;  %1222 = vmatpush.msrb.mxu0 %v4529_v61  ;;  %v4696_v47 = vld [vmem:[#allocation12 + $0x38] sm:$0xff] }
 0x319   :  { %v979_v23 = vrot.slane %v977_v26, 1  ;;  %v4565_v26 = vld [vmem:[#allocation12 + $0x160] sm:$0xff]  ;;  %1246 = vmatpush.msrb.mxu1 %v4580_v27  ;;  %6358 = vst [vmem:[#allocation84_spill] sm:$0xff] %v4682_v39 }
 0x31a   :  { %1262 = vmatpush.msrb.mxu2 %v4533_v9  ;;  %1223 = vmatpush.msrb.mxu0 %v4541_v46  ;;  %v4680_v9 = vld [vmem:[#allocation12 + $0x50] sm:$0xff]  ;;  %6362 = vst [vmem:[#allocation89_spill] sm:$0xff] %v4696_v47 }
 0x31b   :  { %v981_v18 = vmul.f32 %v979_v23, %v969_v42  ;;  %v4569_v23 = vld [vmem:[#allocation12 + $0x170] sm:$0xff]  ;;  %v4573_v42 = vld [vmem:[#allocation12 + $0x178] sm:$0xff]  ;;  %6357 = vst [vmem:[#allocation83_spill] sm:$0xff] %v4680_v9 }
 0x31c   :  { %1263 = vmatpush.msrb.mxu2 %v4545_v11  ;;  %1224 = vmatpush.msrb.mxu0 %v4553_v51  ;;  %6329 = vst [vmem:[#allocation51_spill] sm:$0xff] %v4569_v23  ;;  %v4647_v11 = vld [vmem:[#allocation12 + $0x80] sm:$0xff] }
 0x31d   :  { %v4511_v53 = vadd.f32 %v3379_v44, %v981_v18  ;;  %6330 = vst [vmem:[#allocation52_spill] sm:$0xff] %v4573_v42  ;;  %1285 = vmatpush.msrb.mxu3 %v4573_v42  ;;  %v4594_v42 = vld [vmem:[#allocation12 + $0x130] sm:$0xff] }
 0x31e   :  { %1264 = vmatpush.msrb.mxu2 %v4557_v58  ;;  %1225 = vmatpush.msrb.mxu0 %v4565_v26  ;;  %6335 = vst [vmem:[#allocation57_spill] sm:$0xff] %v4594_v42  ;;  %v4598_v58 = vld [vmem:[#allocation12 + $0x138] sm:$0xff] }
 0x31f   :  { %983 = vst [vmem:[#allocation2 + $0x1] sm:$0x1] %v4511_v53  ;;  %1048 = vmatmul.f32.vlgmr.msra.gmra.mxu1 %v4511_v53  ;;  %1068 = vmatmul.f32.vlgmr.msra.gmra.mxu2 %v4511_v53 }
 0x320   :  { %1088 = vmatmul.f32.vlgmr.msra.gmra.mxu3 %v4511_v53  ;;  %1265 = vmatpush.msrb.mxu2 %v4569_v23  ;;  %6336 = vst [vmem:[#allocation58_spill] sm:$0xff] %v4598_v58 }
 0x321   :  { %1286 = vmatpush.msrb.mxu3 %v4586_v57  ;;  %v4604_v57 = vld [vmem:[#allocation12 + $0x108] sm:$0xff] }
 0x322   :  { %1266 = vmatpush.msrb.mxu2 %v4582_v0  ;;  %6337 = vst [vmem:[#allocation59_spill] sm:$0xff] %v4604_v57  ;;  %v4606_v0 = vld [vmem:[#allocation12 + $0x110] sm:$0xff] }
 0x323   :  { %1287 = vmatpush.msrb.mxu3 %v4598_v58  ;;  %6338 = vst [vmem:[#allocation60_spill] sm:$0xff] %v4606_v0  ;;  %v4619_v58 = vld [vmem:[#allocation12 + $0xf0] sm:$0xff] }
 0x324   :  { %1267 = vmatpush.msrb.mxu2 %v4594_v42  ;;  %6341 = vst [vmem:[#allocation63_spill] sm:$0xff] %v4619_v58  ;;  %v4623_v42 = vld [vmem:[#allocation12 + $0xf8] sm:$0xff] }
 0x325   :  { %1288 = vmatpush.msrb.mxu3 %v4610_v32  ;;  %6342 = vst [vmem:[#allocation64_spill] sm:$0xff] %v4623_v42  ;;  %v4631_v32 = vld [vmem:[#allocation12 + $0xd0] sm:$0xff] }
 0x326   :  { %1268 = vmatpush.msrb.mxu2 %v4606_v0  ;;  %6344 = vst [vmem:[#allocation66_spill] sm:$0xff] %v4631_v32  ;;  %v4635_v0 = vld [vmem:[#allocation12 + $0xd8] sm:$0xff] }
 0x327   :  { %1289 = vmatpush.msrb.mxu3 %v4623_v42  ;;  %6345 = vst [vmem:[#allocation67_spill] sm:$0xff] %v4635_v0  ;;  %v4643_v42 = vld [vmem:[#allocation12 + $0xb0] sm:$0xff] }
 0x328   :  { %1269 = vmatpush.msrb.mxu2 %v4619_v58  ;;  %6347 = vst [vmem:[#allocation69_spill] sm:$0xff] %v4643_v42  ;;  %v4645_v58 = vld [vmem:[#allocation12 + $0xb8] sm:$0xff] }
 0x329   :  { %1290 = vmatpush.msrb.mxu3 %v4635_v0  ;;  %6348 = vst [vmem:[#allocation70_spill] sm:$0xff] %v4645_v58  ;;  %v4661_v0 = vld [vmem:[#allocation12 + $0x60] sm:$0xff] }
 0x32a   :  { %1270 = vmatpush.msrb.mxu2 %v4631_v32  ;;  %v4663_v32 = vld [vmem:[#allocation12 + $0x68] sm:$0xff] }
 0x32b   :  { %1291 = vmatpush.msrb.mxu3 %v4645_v58  ;;  %6352 = vst [vmem:[#allocation75_spill] sm:$0xff] %v4663_v32  ;;  %v4676_v58 = vld [vmem:[#allocation12 + $0x48] sm:$0xff] }
 0x32c   :  { %1271 = vmatpush.msrb.mxu2 %v4643_v42  ;;  %v4674_v42 = vld [vmem:[#allocation12 + $0x40] sm:$0xff]  ;;  %6356 = vst [vmem:[#allocation81_spill] sm:$0xff] %v4676_v58 }
 0x32d   :  { %6355 = vst [vmem:[#allocation79_spill] sm:$0xff] %v4674_v42 }
 0x32e   :  { %1272 = vmatpush.msrb.mxu2 %v4655_v49  ;;  %v4686_v49 = vld [vmem:[#allocation12 + $0x20] sm:$0xff] }
 0x32f   :  { %6359 = vst [vmem:[#allocation86_spill] sm:$0xff] %v4686_v49 }
 0x39c   :  { %v1049_v44 = vpop.f32.mrf.mxu1 }
 0x39d   :  { %v1093_v36 = vrot.slane %v1049_v44, 6  ;;  %v4578_v44 = vld [vmem:[#allocation12 + $0x140] sm:$0xff] }
 0x39e   :  { %1226 = vmatpush.msrb.mxu0 %v4578_v44 }
 0x39f   :  { %v1095_v18 = vadd.f32 %v1093_v36, %v6302_v7  ;;  %v4590_v36 = vld [vmem:[#allocation12 + $0x120] sm:$0xff]  ;;  %v4592_v7 = vld [vmem:[#allocation12 + $0x128] sm:$0xff] }
 0x3a0   :  { %6334 = vst [vmem:[#allocation56_spill] sm:$0xff] %v4592_v7  ;;  %1227 = vmatpush.msrb.mxu0 %v4590_v36  ;;  %1247 = vmatpush.msrb.mxu1 %v4592_v7 }
 0x3a1   :  { %v3298_v41 = vmul.f32 -1.442695, %v1095_v18  ;;  %v4602_v18 = vld [vmem:[#allocation12 + $0x100] sm:$0xff] }
 0x3a2   :  { %v1069_v23 = vpop.f32.mrf.mxu2  ;;  %1228 = vmatpush.msrb.mxu0 %v4602_v18  ;;  %1248 = vmatpush.msrb.mxu1 %v4604_v57 }
 0x3a3   :  { %3380 = vpow2.f32 %v3298_v41  ;;  %v1116_v27 = vrot.slane %v1069_v23, 6  ;;  %v4615_v41 = vld [vmem:[#allocation12 + $0xe0] sm:$0xff]  ;;  %v4617_v23 = vld [vmem:[#allocation12 + $0xe8] sm:$0xff] }
 0x3a4   :  { %6340 = vst [vmem:[#allocation62_spill] sm:$0xff] %v4617_v23  ;;  %1229 = vmatpush.msrb.mxu0 %v4615_v41  ;;  %1249 = vmatpush.msrb.mxu1 %v4617_v23  ;;  %v4637_v23 = vld [vmem:[#allocation12 + $0xa0] sm:$0xff] }
 0x3a5   :  { %v1118_v7 = vadd.f32 %v1116_v27, %v4158_v50  ;;  %v4627_v27 = vld [vmem:[#allocation12 + $0xc0] sm:$0xff]  ;;  %v4629_v50 = vld [vmem:[#allocation12 + $0xc8] sm:$0xff] }
 0x3a6   :  { %6343 = vst [vmem:[#allocation65_spill] sm:$0xff] %v4629_v50  ;;  %1230 = vmatpush.msrb.mxu0 %v4627_v27  ;;  %1250 = vmatpush.msrb.mxu1 %v4629_v50  ;;  %v4653_v50 = vld [vmem:[#allocation12 + $0x88] sm:$0xff] }
 0x3a7   :  { %v3299_v57 = vmul.f32 -1.442695, %v1118_v7  ;;  %6349 = vst [vmem:[#allocation71_spill] sm:$0xff] %v4653_v50 }
 0x3a8   :  { %1231 = vmatpush.msrb.mxu0 %v4637_v23  ;;  %1251 = vmatpush.msrb.mxu1 %v4639_v17  ;;  %v4670_v17 = vld [vmem:[#allocation12 + $0x78] sm:$0xff] }
 0x3a9   :  { %v3381_v7 = vpop.eup %3380  ;;  %3382 = vpow2.f32 %v3299_v57  ;;  %v4657_v57 = vld [vmem:[#allocation12 + $0x98] sm:$0xff]  ;;  %6354 = vst [vmem:[#allocation78_spill] sm:$0xff] %v4670_v17 }
 0x3aa   :  { %v4649_v8 = vadd.f32 1.0, %v3381_v7  ;;  %6351 = vst [vmem:[#allocation74_spill] sm:$0xff] %v4657_v57  ;;  %1232 = vmatpush.msrb.mxu0 %v4647_v11  ;;  %1252 = vmatpush.msrb.mxu1 %v4653_v50  ;;  %v4668_v7 = vld [vmem:[#allocation12 + $0x70] sm:$0xff] }
 0x3ab   :  { %6353 = vst [vmem:[#allocation77_spill] sm:$0xff] %v4668_v7  ;;  %1292 = vmatpush.msrb.mxu3 %v4657_v57  ;;  %1273 = vmatpush.msrb.mxu2 %v4668_v7  ;;  %v4688_v57 = vld [vmem:[#allocation12 + $0x28] sm:$0xff]  ;;  %v4700_v7 = vld [vmem:[#allocation12] sm:$0xff] }
 0x3ac   :  { %3384 = vrcp.f32 %v4649_v8  ;;  %1233 = vmatpush.msrb.mxu0 %v4661_v0  ;;  %1253 = vmatpush.msrb.mxu1 %v4663_v32  ;;  %6360 = vst [vmem:[#allocation87_spill] sm:$0xff] %v4688_v57  ;;  %v4694_v32 = vld [vmem:[#allocation12 + $0x30] sm:$0xff]  ;;  %vm1105_vm1 = vweird.f32 %v4649_v8 }
 0x3ad   :  { %1293 = vmatpush.msrb.mxu3 %v4670_v17  ;;  %6361 = vst [vmem:[#allocation88_spill] sm:$0xff] %v4694_v32  ;;  %1274 = vmatpush.msrb.mxu2 %v4680_v9  ;;  %v4702_v17 = vld [vmem:[#allocation12 + $0x8] sm:$0xff] }
 0x3ae   :  { %1234 = vmatpush.msrb.mxu0 %v4674_v42  ;;  %1254 = vmatpush.msrb.mxu1 %v4676_v58  ;;  %v4709_v58 = vld [vmem:[#allocation12 + $0x18] sm:$0xff] }
 0x3af   :  { %v3383_v50 = vpop.eup %3382  ;;  %1294 = vmatpush.msrb.mxu3 %v4682_v39  ;;  %6363 = vst [vmem:[#allocation90_spill] sm:$0xff] %v4709_v58  ;;  %1275 = vmatpush.msrb.mxu2 %v4694_v32  ;;  %v1089_v39 = vpop.f32.mrf.mxu3  ;;  %v4725_v32 = vld [vmem:[%s5896_s5] sm:$0x1] }
 0x3b0   :  { %v4690_v52 = vadd.f32 1.0, %v3383_v50  ;;  %1235 = vmatpush.msrb.mxu0 %v4686_v49  ;;  %1255 = vmatpush.msrb.mxu1 %v4688_v57  ;;  %v4707_v50 = vld [vmem:[#allocation12 + $0x10] sm:$0xff]  ;;  %v1111_v57 = vand.u32 2147483648, %v4649_v8 }
 0x3b1   :  { %1295 = vmatpush.msrb.mxu3 %v4696_v47  ;;  %1276 = vmatpush.msrb.mxu2 %v4707_v50  ;;  %v1109_v47 = vand.u32 2147483647, %v4649_v8 }
 0x3b2   :  { %v3385_v28 = vpop.eup %3384  ;;  %3386 = vrcp.f32 %v4690_v52  ;;  %1236 = vmatpush.msrb.mxu0 %v4700_v7  ;;  %1256 = vmatpush.msrb.mxu1 %v4702_v17  ;;  %vm1128_vm5 = vweird.f32 %v4690_v52 }
 0x3b3   :  { %v1101_v42 = vmul.f32 %v3385_v28, %v4649_v8  ;;  %1296 = vmatpush.msrb.mxu3 %v4709_v58  ;;  %vm1106_vm0 = vweird.f32 %v3385_v28  ;;  %1440 = vmatpush.msra.mxu2 %v4366_v60  ;;  %v1112_v60 = vor.u32 1.1754944e-38, %v1111_v57  ;;  %vm1110_vm3 = vcmp.eq.f32.partialorder %v1109_v47, 8.507059e+37  ;;  %v6380_v47 = vld [vmem:[#allocation38_spill] sm:$0xff]  ;;  %v6398_v57 = vld [vmem:[#allocation57_spill] sm:$0xff] }
 0x3b4   :  { %1400 = vmatpush.msra.mxu0 %v4362_v1  ;;  %1420 = vmatpush.msra.mxu1 %v4364_v56  ;;  %vm1107_vm2 = vmor %vm1105_vm1, %vm1106_vm0  ;;  %v6387_v8 = vld [vmem:[#allocation46_spill] sm:$0xff] }
 0x3b5   :  { %v1102_v9 = vsub.f32 1.0, %v1101_v42  ;;  %v1138_v42 = vadd.f32 %v4725_v32, %v1089_v39  ;;  %1589 = vmatpush.msra.mxu3 %v4517_v5  ;;  %1441 = vmatpush.msra.mxu2 %v4375_v59  ;;  %v6383_v39 = vld [vmem:[#allocation42_spill] sm:$0xff] }
 0x3b6   :  { %1401 = vmatpush.msra.mxu0 %v4371_v54  ;;  %1421 = vmatpush.msra.mxu1 %v4373_v3 }
 0x3b7   :  { %v1103_v49 = vmul.f32 %v3385_v28, %v1102_v9  ;;  %1590 = vmatpush.msra.mxu3 %v4529_v61  ;;  %v1140_v54 = vrot.slane %v1138_v42, 6  ;;  %1442 = vmatpush.msra.mxu2 %v4384_v13  ;;  %v6382_v61 = vld [vmem:[#allocation41_spill] sm:$0xff]  ;;  %v6384_v9 = vld [vmem:[#allocation43_spill] sm:$0xff] }
 0x3b8   :  { %v4730_v58 = vpop.eup %3386  ;;  %1402 = vmatpush.msra.mxu0 %v4380_v63  ;;  %1422 = vmatpush.msra.mxu1 %v4382_v10  ;;  %v6400_v42 = vld [vmem:[#allocation59_spill] sm:$0xff] }
 0x3b9   :  { %v1104_v1 = vadd.f32 %v3385_v28, %v1103_v49  ;;  %v1124_v56 = vmul.f32 %v4730_v58, %v4690_v52  ;;  %1591 = vmatpush.msra.mxu3 %v4541_v46  ;;  %1443 = vmatpush.msra.mxu2 %v4393_v22  ;;  %vm1129_vm4 = vweird.f32 %v4730_v58  ;;  %v1134_v22 = vand.u32 2147483648, %v4690_v52  ;;  %v6385_v49 = vld [vmem:[#allocation44_spill] sm:$0xff]  ;;  %v6386_v46 = vld [vmem:[#allocation45_spill] sm:$0xff] }
 0x3ba   :  { %1403 = vmatpush.msra.mxu0 %v4389_v16  ;;  %1423 = vmatpush.msra.mxu1 %v4391_v19  ;;  %vm1130_vm6 = vmor %vm1128_vm5, %vm1129_vm4 }
 0x3bb   :  { %v1108_v5 = vsel %vm1107_vm2, %v3385_v28, %v1104_v1  ;;  %1592 = vmatpush.msra.mxu3 %v4553_v51  ;;  %v1125_v63 = vsub.f32 1.0, %v1124_v56  ;;  %1444 = vmatpush.msra.mxu2 %v4402_v29  ;;  %v6379_v28 = vld [vmem:[#allocation37_spill] sm:$0xff]  ;;  %v6389_v51 = vld [vmem:[#allocation48_spill] sm:$0xff] }
 0x3bc   :  { %v1113_v3 = vsel %vm1110_vm3, %v1112_v60, %v1108_v5  ;;  %1404 = vmatpush.msra.mxu0 %v4398_v25  ;;  %1424 = vmatpush.msra.mxu1 %v4400_v62  ;;  %v1132_v62 = vand.u32 2147483647, %v4690_v52  ;;  %v6381_v52 = vld [vmem:[#allocation40_spill] sm:$0xff]  ;;  %v6402_v56 = vld [vmem:[#allocation61_spill] sm:$0xff]  ;;  %v6403_v60 = vld [vmem:[#allocation62_spill] sm:$0xff] }
 0x3bd   :  { %v1142_v59 = vmul.f32 %v1140_v54, %v1113_v3  ;;  %1593 = vmatpush.msra.mxu3 %v4565_v26  ;;  %1445 = vmatpush.msra.mxu2 %v4411_v34  ;;  %v1126_v13 = vmul.f32 %v4730_v58, %v1125_v63  ;;  %v6391_v26 = vld [vmem:[#allocation50_spill] sm:$0xff]  ;;  %v6401_v1 = vld [vmem:[#allocation60_spill] sm:$0xff]  ;;  %v6404_v5 = vld [vmem:[#allocation63_spill] sm:$0xff] }
 0x3be   :  { %1405 = vmatpush.msra.mxu0 %v4407_v2  ;;  %1425 = vmatpush.msra.mxu1 %v4409_v4  ;;  %v1135_v4 = vor.u32 1.1754944e-38, %v1134_v22  ;;  %vm1133_vm7 = vcmp.eq.f32.partialorder %v1132_v62, 8.507059e+37  ;;  %v6405_v54 = vld [vmem:[#allocation64_spill] sm:$0xff]  ;;  %v6406_v3 = vld [vmem:[#allocation65_spill] sm:$0xff]  ;;  %v6408_v63 = vld [vmem:[#allocation67_spill] sm:$0xff] }
 0x3bf   :  { %v1143_v10 = vadd.f32 %v1142_v59, %v4233_v6  ;;  %1594 = vmatpush.msra.mxu3 %v4578_v44  ;;  %1446 = vmatpush.msra.mxu2 %v4421_v15  ;;  %v1127_v16 = vadd.f32 %v4730_v58, %v1126_v13  ;;  %v6392_v44 = vld [vmem:[#allocation51_spill] sm:$0xff]  ;;  %v6407_v59 = vld [vmem:[#allocation66_spill] sm:$0xff]  ;;  %v6410_v13 = vld [vmem:[#allocation69_spill] sm:$0xff] }
 0x3c0   :  { %1406 = vmatpush.msra.mxu0 %v4417_v12  ;;  %1426 = vmatpush.msra.mxu1 %v4419_v35  ;;  %v6364_v35 = vld [vmem:[#allocation28_spill] sm:$0xff]  ;;  %v6413_v22 = vld [vmem:[#allocation73_spill] sm:$0xff]  ;;  %v6415_v62 = vld [vmem:[#allocation75_spill] sm:$0xff] }
 0x3c1   :  { %3388 = vtanh.f32 %v1143_v10  ;;  %1595 = vmatpush.msra.mxu3 %v4590_v36  ;;  %1447 = vmatpush.msra.mxu2 %v4430_v21  ;;  %v1131_v29 = vsel %vm1130_vm6, %v4730_v58, %v1127_v16  ;;  %v6367_v21 = vld [vmem:[#allocation25_spill] sm:$0xff]  ;;  %v6393_v36 = vld [vmem:[#allocation52_spill] sm:$0xff]  ;;  %v6411_v16 = vld [vmem:[#allocation70_spill] sm:$0xff] }
 0x3c2   :  { %1407 = vmatpush.msra.mxu0 %v4426_v20  ;;  %1427 = vmatpush.msra.mxu1 %v4428_v38  ;;  %v1136_v12 = vsel %vm1133_vm7, %v1135_v4, %v1131_v29  ;;  %v6365_v20 = vld [vmem:[#allocation32_spill] sm:$0xff]  ;;  %v6390_v58 = vld [vmem:[#allocation49_spill] sm:$0xff] }
 0x3c3   :  { %1596 = vmatpush.msra.mxu3 %v4602_v18  ;;  %1448 = vmatpush.msra.mxu2 %v4439_v31  ;;  %v6366_v38 = vld [vmem:[#allocation76_spill] sm:$0xff]  ;;  %v6369_v31 = vld [vmem:[#allocation34_spill] sm:$0xff]  ;;  %v6394_v18 = vld [vmem:[#allocation53_spill] sm:$0xff] }
 0x3c4   :  { %1408 = vmatpush.msra.mxu0 %v4435_v24  ;;  %1428 = vmatpush.msra.mxu1 %v4437_v30  ;;  %v6368_v30 = vld [vmem:[#allocation31_spill] sm:$0xff]  ;;  %v6409_v10 = vld [vmem:[#allocation68_spill] sm:$0xff]  ;;  %v6416_v29 = vld [vmem:[#allocation77_spill] sm:$0xff] }
 0x3c5   :  { %1597 = vmatpush.msra.mxu3 %v4615_v41  ;;  %1449 = vmatpush.msra.mxu2 %v4449_v55  ;;  %v6395_v41 = vld [vmem:[#allocation54_spill] sm:$0xff]  ;;  %v6418_v4 = vld [vmem:[#allocation81_spill] sm:$0xff] }
 0x3c6   :  { %1409 = vmatpush.msra.mxu0 %v4445_v14  ;;  %1429 = vmatpush.msra.mxu1 %v4447_v43  ;;  %v6370_v14 = vld [vmem:[#allocation80_spill] sm:$0xff]  ;;  %v6371_v43 = vld [vmem:[#allocation79_spill] sm:$0xff] }
 0x3c7   :  { %v3389_v19 = vpop.eup %3388  ;;  %1598 = vmatpush.msra.mxu3 %v4627_v27  ;;  %1450 = vmatpush.msra.mxu2 %v4458_v40  ;;  %v6374_v40 = vld [vmem:[#allocation36_spill] sm:$0xff] }
 0x3c8   :  { %v1146_v25 = vrot.slane %v3389_v19, 2  ;;  %1410 = vmatpush.msra.mxu0 %v4454_v33  ;;  %1430 = vmatpush.msra.mxu1 %v4456_v37  ;;  %v6372_v33 = vld [vmem:[#allocation26_spill] sm:$0xff]  ;;  %v6373_v37 = vld [vmem:[#allocation33_spill] sm:$0xff]  ;;  %v6397_v27 = vld [vmem:[#allocation56_spill] sm:$0xff] }
 0x3c9   :  { %1599 = vmatpush.msra.mxu3 %v4637_v23  ;;  %1451 = vmatpush.msra.mxu2 %v6364_v35  ;;  %v6396_v23 = vld [vmem:[#allocation55_spill] sm:$0xff] }
 0x3ca   :  { %v1148_v2 = vsub.f32 %v4511_v53, %v1146_v25  ;;  %1411 = vmatpush.msra.mxu0 %v4463_v45  ;;  %1431 = vmatpush.msra.mxu1 %v4465_v48  ;;  %v6375_v45 = vld [vmem:[#allocation86_spill] sm:$0xff]  ;;  %v6377_v48 = vld [vmem:[#allocation27_spill] sm:$0xff] }
 0x3cb   :  { %1600 = vmatpush.msra.mxu3 %v4647_v11  ;;  %1452 = vmatpush.msra.mxu2 %v6367_v21  ;;  %v6378_v53 = vld [vmem:[#allocation35_spill] sm:$0xff]  ;;  %v6414_v25 = vld [vmem:[#allocation74_spill] sm:$0xff] }
 0x3cc   :  { %v1150_v34 = vrot.slane %v1148_v2, 6  ;;  %1412 = vmatpush.msra.mxu0 %v6365_v20  ;;  %1432 = vmatpush.msra.mxu1 %v6366_v38  ;;  %v6388_v11 = vld [vmem:[#allocation47_spill] sm:$0xff]  ;;  %v6417_v2 = vld [vmem:[#allocation78_spill] sm:$0xff]  ;;  %v6423_v20 = vld [vmem:[#allocation89_spill] sm:$0xff] }
 0x3cd   :  { %1601 = vmatpush.msra.mxu3 %v4661_v0  ;;  %1453 = vmatpush.msra.mxu2 %v6370_v14  ;;  %v6376_v0 = vld [vmem:[#allocation85_spill] sm:$0xff]  ;;  %v6421_v35 = vld [vmem:[#allocation87_spill] sm:$0xff]  ;;  %v6424_v38 = vld [vmem:[#allocation90_spill] sm:$0xff] }
 0x3ce   :  { %v1152_v15 = vmul.f32 %v1150_v34, %v1136_v12  ;;  %1413 = vmatpush.msra.mxu0 %v6368_v30  ;;  %1433 = vmatpush.msra.mxu1 %v6369_v31  ;;  %v6419_v34 = vld [vmem:[#allocation83_spill] sm:$0xff]  ;;  %v6420_v12 = vld [vmem:[#allocation84_spill] sm:$0xff]  ;;  %v6425_v31 = vld [vmem:[#allocation30_spill] sm:$0xff] }
 0x3cf   :  { %1602 = vmatpush.msra.mxu3 %v6371_v43  ;;  %1454 = vmatpush.msra.mxu2 %v6374_v40  ;;  %v6426_v43 = vld [vmem:[#allocation72_spill] sm:$0xff] }
 0x3d0   :  { %v4792_v24 = vadd.f32 %v3389_v19, %v1152_v15  ;;  %1414 = vmatpush.msra.mxu0 %v6372_v33  ;;  %1434 = vmatpush.msra.mxu1 %v6373_v37  ;;  %v6412_v19 = vld [vmem:[#allocation71_spill] sm:$0xff]  ;;  %v6422_v15 = vld [vmem:[#allocation88_spill] sm:$0xff] }
 0x3d1   :  { %1603 = vmatpush.msra.mxu3 %v6375_v45  ;;  %1455 = vmatpush.msra.mxu2 %v6378_v53 }
 0x3d2   :  { %v1219_v55 = vrot.slane %v4792_v24, 2  ;;  %1415 = vmatpush.msra.mxu0 %v6376_v0  ;;  %1435 = vmatpush.msra.mxu1 %v6377_v48 }
 0x3d3   :  { %1604 = vmatpush.msra.mxu3 %v4700_v7  ;;  %v6399_v7 = vld [vmem:[#allocation58_spill] sm:$0xff] }
 0x3d4   :  { %1237 = vmatmul.f32.vlgmr.msrb.gmra.mxu0 %v1219_v55  ;;  %1257 = vmatmul.f32.vlgmr.msrb.gmra.mxu1 %v1219_v55 }
 0x3d5   :  { %1277 = vmatmul.f32.vlgmr.msrb.gmra.mxu2 %v1219_v55  ;;  %1297 = vmatmul.f32.vlgmr.msrb.gmra.mxu3 %v1219_v55 }
 0x3d6   :  { %1609 = vmatpush.msrb.mxu0 %v6379_v28  ;;  %1629 = vmatpush.msrb.mxu1 %v6380_v47 }
 0x3d7   :  { %1649 = vmatpush.msrb.mxu2 %v6381_v52 }
 0x3d8   :  { %1610 = vmatpush.msrb.mxu0 %v6382_v61  ;;  %1630 = vmatpush.msrb.mxu1 %v6383_v39 }
 0x3d9   :  { %1650 = vmatpush.msrb.mxu2 %v6384_v9 }
 0x3da   :  { %1611 = vmatpush.msrb.mxu0 %v6385_v49  ;;  %1631 = vmatpush.msrb.mxu1 %v6386_v46 }
 0x3db   :  { %1651 = vmatpush.msrb.mxu2 %v6387_v8 }
 0x3dc   :  { %1612 = vmatpush.msrb.mxu0 %v6388_v11  ;;  %1632 = vmatpush.msrb.mxu1 %v6389_v51  ;;  %v6427_v11 = vld [vmem:[#allocation24_spill] sm:$0xff] }
 0x3dd   :  { %1652 = vmatpush.msrb.mxu2 %v6390_v58 }
 0x3de   :  { %1613 = vmatpush.msrb.mxu0 %v6391_v26  ;;  %1633 = vmatpush.msrb.mxu1 %v6392_v44  ;;  %v6428_v44 = vld [vmem:[#allocation29_spill] sm:$0xff] }
 0x3df   :  { %1653 = vmatpush.msrb.mxu2 %v6393_v36 }
 0x3e0   :  { %1614 = vmatpush.msrb.mxu0 %v6394_v18  ;;  %1634 = vmatpush.msrb.mxu1 %v6395_v41 }
 0x3e1   :  { %1654 = vmatpush.msrb.mxu2 %v6396_v23 }
 0x3e2   :  { %1615 = vmatpush.msrb.mxu0 %v6397_v27  ;;  %1635 = vmatpush.msrb.mxu1 %v6398_v57 }
 0x3e3   :  { %1655 = vmatpush.msrb.mxu2 %v6399_v7 }
 0x3e4   :  { %1616 = vmatpush.msrb.mxu0 %v6400_v42  ;;  %1636 = vmatpush.msrb.mxu1 %v6401_v1 }
 0x3e5   :  { %1656 = vmatpush.msrb.mxu2 %v6402_v56 }
 0x3e6   :  { %1617 = vmatpush.msrb.mxu0 %v6403_v60  ;;  %1637 = vmatpush.msrb.mxu1 %v6404_v5 }
 0x3e7   :  { %1657 = vmatpush.msrb.mxu2 %v6405_v54 }
 0x3e8   :  { %1618 = vmatpush.msrb.mxu0 %v6406_v3  ;;  %1638 = vmatpush.msrb.mxu1 %v6407_v59 }
 0x3e9   :  { %1658 = vmatpush.msrb.mxu2 %v6408_v63 }
 0x3ea   :  { %1619 = vmatpush.msrb.mxu0 %v6409_v10  ;;  %1639 = vmatpush.msrb.mxu1 %v6410_v13 }
 0x3eb   :  { %1659 = vmatpush.msrb.mxu2 %v6411_v16 }
 0x3ec   :  { %1620 = vmatpush.msrb.mxu0 %v6412_v19  ;;  %1640 = vmatpush.msrb.mxu1 %v6413_v22 }
 0x3ed   :  { %1660 = vmatpush.msrb.mxu2 %v6414_v25  ;;  %v6429_v25 = vld [vmem:[#allocation39_spill] sm:$0xff] }
 0x3ee   :  { %1621 = vmatpush.msrb.mxu0 %v6415_v62  ;;  %1641 = vmatpush.msrb.mxu1 %v6416_v29  ;;  %v6430_v29 = vld [vmem:[#allocation82_spill] sm:$0xff] }
 0x3ef   :  { %1661 = vmatpush.msrb.mxu2 %v6417_v2 }
 0x3f0   :  { %1622 = vmatpush.msrb.mxu0 %v6418_v4  ;;  %1642 = vmatpush.msrb.mxu1 %v6419_v34 }
 0x3f1   :  { %1662 = vmatpush.msrb.mxu2 %v6420_v12 }
 0x3f2   :  { %1623 = vmatpush.msrb.mxu0 %v6421_v35  ;;  %1643 = vmatpush.msrb.mxu1 %v6422_v15 }
 0x3f3   :  { %1663 = vmatpush.msrb.mxu2 %v6423_v20 }
 0x3f4   :  { %1624 = vmatpush.msrb.mxu0 %v4702_v17  ;;  %1644 = vmatpush.msrb.mxu1 %v4707_v50 }
 0x3f5   :  { %1664 = vmatpush.msrb.mxu2 %v6424_v38 }
 0x451   :  { %v1238_v21 = vpop.f32.mrf.mxu0  ;;  %v1258_v30 = vpop.f32.mrf.mxu1 }
 0x452   :  { %v1239_v14 = vadd.f32 %v1238_v21, %v6425_v31  ;;  %v1259_v55 = vadd.f32 %v1258_v30, %v6426_v43 }
 0x454   :  { %v3300_v33 = vmul.f32 -1.442695, %v1239_v14  ;;  %v3301_v37 = vmul.f32 -1.442695, %v1259_v55 }
 0x456   :  { %3390 = vpow2.f32 %v3300_v33 }
 0x457   :  { %3392 = vpow2.f32 %v3301_v37 }
 0x458   :  { %v1298_v39 = vpop.f32.mrf.mxu3  ;;  %v1278_v46 = vpop.f32.mrf.mxu2 }
 0x459   :  { %v1299_v51 = vadd.f32 %v1298_v39, %v6427_v11  ;;  %v1279_v36 = vadd.f32 %v1278_v46, %v6428_v44 }
 0x45c   :  { %v3391_v40 = vpop.eup %3390 }
 0x45d   :  { %v3393_v45 = vpop.eup %3392  ;;  %v1304_v0 = vadd.f32 1.0, %v3391_v40 }
 0x45e   :  { %v1323_v48 = vadd.f32 1.0, %v3393_v45 }
 0x45f   :  { %3394 = vrcp.f32 %v1304_v0  ;;  %v1316_v28 = vand.u32 2147483648, %v1304_v0  ;;  %v1314_v61 = vand.u32 2147483647, %v1304_v0  ;;  %vm1310_vm9 = vweird.f32 %v1304_v0 }
 0x460   :  { %3396 = vrcp.f32 %v1323_v48  ;;  %v1335_v42 = vand.u32 2147483648, %v1323_v48  ;;  %vm1329_vm13 = vweird.f32 %v1323_v48  ;;  %v1333_v1 = vand.u32 2147483647, %v1323_v48 }
 0x461   :  { %v1317_v8 = vor.u32 1.1754944e-38, %v1316_v28  ;;  %vm1315_vm11 = vcmp.eq.f32.partialorder %v1314_v61, 8.507059e+37 }
 0x462   :  { %v1336_v54 = vor.u32 1.1754944e-38, %v1335_v42  ;;  %vm1334_vm15 = vcmp.eq.f32.partialorder %v1333_v1, 8.507059e+37  ;;  %v4876_v42 = vld [vmem:[#allocation11 + $0x150] sm:$0xff]  ;;  %v4878_v1 = vld [vmem:[#allocation11 + $0x158] sm:$0xff] }
 0x465   :  { %v3395_v17 = vpop.eup %3394 }
 0x466   :  { %v1306_v50 = vmul.f32 %v3395_v17, %v1304_v0  ;;  %v3397_v47 = vpop.eup %3396  ;;  %vm1311_vm8 = vweird.f32 %v3395_v17 }
 0x467   :  { %v1325_v49 = vmul.f32 %v3397_v47, %v1323_v48  ;;  %vm1312_vm10 = vmor %vm1310_vm9, %vm1311_vm8  ;;  %vm1330_vm12 = vweird.f32 %v3397_v47 }
 0x468   :  { %v1307_v53 = vsub.f32 1.0, %v1306_v50  ;;  %vm1331_vm14 = vmor %vm1329_vm13, %vm1330_vm12 }
 0x469   :  { %v1326_v41 = vsub.f32 1.0, %v1325_v49 }
 0x46a   :  { %v1308_v52 = vmul.f32 %v3395_v17, %v1307_v53 }
 0x46b   :  { %v1327_v27 = vmul.f32 %v3397_v47, %v1326_v41 }
 0x46c   :  { %v1309_v9 = vadd.f32 %v3395_v17, %v1308_v52 }
 0x46d   :  { %v1328_v57 = vadd.f32 %v3397_v47, %v1327_v27  ;;  %v4867_v27 = vld [vmem:[#allocation11 + $0x168] sm:$0xff] }
 0x46e   :  { %v1313_v58 = vsel %vm1312_vm10, %v3395_v17, %v1309_v9  ;;  %1768 = vmatpush.msrb.mxu3 %v4867_v27 }
 0x46f   :  { %v1318_v26 = vsel %vm1315_vm11, %v1317_v8, %v1313_v58  ;;  %v1332_v5 = vsel %vm1331_vm14, %v3397_v47, %v1328_v57  ;;  %v4869_v57 = vld [vmem:[#allocation11 + $0x170] sm:$0xff] }
 0x470   :  { %v1339_v18 = vmul.f32 %v1318_v26, %v1299_v51  ;;  %v1337_v59 = vsel %vm1334_vm15, %v1336_v54, %v1332_v5  ;;  %1769 = vmatpush.msrb.mxu3 %v4876_v42  ;;  %v4887_v5 = vld [vmem:[#allocation11 + $0x140] sm:$0xff]  ;;  %v4889_v54 = vld [vmem:[#allocation11 + $0x148] sm:$0xff] }
 0x472   :  { %v1340_v23 = vadd.f32 %v1339_v18, %v1279_v36 }
 0x474   :  { %3398 = vtanh.f32 %v1340_v23 }
 0x47a   :  { %v3399_v7 = vpop.eup %3398 }
 0x47b   :  { %v1343_v56 = vrot.slane %v3399_v7, 6 }
 0x47d   :  { %v1345_v60 = vsub.f32 %v4792_v24, %v1343_v56  ;;  %v4880_v56 = vld [vmem:[#allocation11 + $0x160] sm:$0xff] }
 0x47f   :  { %v1347_v3 = vrot.slane %v1345_v60, 2  ;;  %v4885_v60 = vld [vmem:[#allocation11 + $0x138] sm:$0xff] }
 0x480   :  { %1770 = vmatpush.msrb.mxu3 %v4885_v60 }
 0x481   :  { %v1349_v63 = vmul.f32 %v1347_v3, %v1337_v59  ;;  %v4894_v59 = vld [vmem:[#allocation11 + $0x120] sm:$0xff] }
 0x482   :  { %1771 = vmatpush.msrb.mxu3 %v4894_v59 }
 0x483   :  { %v1350_v10 = vadd.f32 %v3399_v7, %v1349_v63  ;;  %v4871_v7 = vld [vmem:[#allocation11 + $0x178] sm:$0xff]  ;;  %v4896_v63 = vld [vmem:[#allocation11 + $0x128] sm:$0xff] }
 0x485   :  { %1351 = vst [vmem:[#allocation2 + $0x2] sm:$0x1] %v1350_v10  ;;  %1416 = vmatmul.f32.vlgmr.msra.gmra.mxu0 %v1350_v10  ;;  %1436 = vmatmul.f32.vlgmr.msra.gmra.mxu1 %v1350_v10 }
 0x486   :  { %1456 = vmatmul.f32.vlgmr.msra.gmra.mxu2 %v1350_v10  ;;  %1788 = vmatpush.msra.mxu0 %v4869_v57 }
 0x487   :  { %1808 = vmatpush.msra.mxu1 %v4871_v7 }
 0x488   :  { %1789 = vmatpush.msra.mxu0 %v4878_v1 }
 0x489   :  { %1809 = vmatpush.msra.mxu1 %v4880_v56 }
 0x48a   :  { %1790 = vmatpush.msra.mxu0 %v4887_v5 }
 0x48b   :  { %1810 = vmatpush.msra.mxu1 %v4889_v54 }
 0x48c   :  { %1791 = vmatpush.msra.mxu0 %v4896_v63 }
 0x502   :  { %v1417_v13 = vpop.f32.mrf.mxu0  ;;  %v1437_v16 = vpop.f32.mrf.mxu1 }
 0x503   :  { %v1461_v19 = vrot.slane %v1417_v13, 5  ;;  %v1484_v22 = vrot.slane %v1437_v16, 5  ;;  %v4903_v13 = vld [vmem:[#allocation11 + $0x108] sm:$0xff]  ;;  %v4905_v16 = vld [vmem:[#allocation11 + $0x110] sm:$0xff] }
 0x504   :  { %1772 = vmatpush.msrb.mxu3 %v4903_v13  ;;  %1792 = vmatpush.msra.mxu0 %v4905_v16 }
 0x505   :  { %v1463_v62 = vadd.f32 %v1461_v19, %v6429_v25  ;;  %v1486_v2 = vadd.f32 %v1484_v22, %v6430_v29  ;;  %v4907_v19 = vld [vmem:[#allocation11 + $0x118] sm:$0xff] }
 0x507   :  { %v3302_v24 = vmul.f32 -1.442695, %v1463_v62  ;;  %v3303_v4 = vmul.f32 -1.442695, %v1486_v2  ;;  %v4913_v62 = vld [vmem:[#allocation11 + $0xf0] sm:$0xff]  ;;  %v4915_v2 = vld [vmem:[#allocation11 + $0xf8] sm:$0xff] }
 0x508   :  { %1773 = vmatpush.msrb.mxu3 %v4913_v62  ;;  %1793 = vmatpush.msra.mxu0 %v4915_v2 }
 0x509   :  { %3400 = vpow2.f32 %v3302_v24  ;;  %v1457_v21 = vpop.f32.mrf.mxu2  ;;  %v4917_v24 = vld [vmem:[#allocation11 + $0x100] sm:$0xff] }
 0x50a   :  { %3402 = vpow2.f32 %v3303_v4  ;;  %v1506_v40 = vadd.f32 %v4725_v32, %v1457_v21  ;;  %v4932_v21 = vld [vmem:[#allocation11 + $0xc0] sm:$0xff] }
 0x50c   :  { %v1508_v50 = vrot.slane %v1506_v40, 5  ;;  %v4950_v40 = vld [vmem:[#allocation11 + $0x90] sm:$0xff] }
 0x50f   :  { %v3401_v34 = vpop.eup %3400 }
 0x510   :  { %v3403_v12 = vpop.eup %3402  ;;  %v1467_v35 = vadd.f32 1.0, %v3401_v34 }
 0x511   :  { %v1490_v15 = vadd.f32 1.0, %v3403_v12  ;;  %v4923_v12 = vld [vmem:[#allocation11 + $0xd8] sm:$0xff] }
 0x512   :  { %3404 = vrcp.f32 %v1467_v35  ;;  %v1479_v14 = vand.u32 2147483648, %v1467_v35  ;;  %v1477_v37 = vand.u32 2147483647, %v1467_v35  ;;  %vm1473_vm1 = vweird.f32 %v1467_v35  ;;  %1774 = vmatpush.msrb.mxu3 %v4923_v12 }
 0x513   :  { %3406 = vrcp.f32 %v1490_v15  ;;  %v1502_v49 = vand.u32 2147483648, %v1490_v15  ;;  %vm1496_vm5 = vweird.f32 %v1490_v15  ;;  %v1500_v46 = vand.u32 2147483647, %v1490_v15 }
 0x514   :  { %v1480_v48 = vor.u32 1.1754944e-38, %v1479_v14  ;;  %vm1478_vm3 = vcmp.eq.f32.partialorder %v1477_v37, 8.507059e+37  ;;  %v4936_v14 = vld [vmem:[#allocation11 + $0xd0] sm:$0xff]  ;;  %1775 = vmatpush.msrb.mxu3 %v4932_v21  ;;  %v4945_v37 = vld [vmem:[#allocation11 + $0xb8] sm:$0xff] }
 0x515   :  { %v1503_v58 = vor.u32 1.1754944e-38, %v1502_v49  ;;  %vm1501_vm7 = vcmp.eq.f32.partialorder %v1500_v46, 8.507059e+37  ;;  %v4979_v49 = vld [vmem:[#allocation11 + $0x50] sm:$0xff] }
 0x516   :  { %6433 = vst [vmem:[#allocation76_spill] sm:$0xff] %v4979_v49  ;;  %v4985_v46 = vld [vmem:[#allocation11 + $0x30] sm:$0xff] }
 0x517   :  { %6435 = vst [vmem:[#allocation31_spill] sm:$0xff] %v4985_v46 }
 0x518   :  { %v3405_v20 = vpop.eup %3404 }
 0x519   :  { %v1469_v38 = vmul.f32 %v3405_v20, %v1467_v35  ;;  %v3407_v55 = vpop.eup %3406  ;;  %vm1474_vm0 = vweird.f32 %v3405_v20  ;;  %v4925_v35 = vld [vmem:[#allocation11 + $0xe0] sm:$0xff] }
 0x51a   :  { %v1492_v0 = vmul.f32 %v3407_v55, %v1490_v15  ;;  %vm1475_vm2 = vmor %vm1473_vm1, %vm1474_vm0  ;;  %vm1497_vm4 = vweird.f32 %v3407_v55  ;;  %v4927_v15 = vld [vmem:[#allocation11 + $0xe8] sm:$0xff]  ;;  %1794 = vmatpush.msra.mxu0 %v4925_v35 }
 0x51b   :  { %v1470_v30 = vsub.f32 1.0, %v1469_v38  ;;  %vm1498_vm6 = vmor %vm1496_vm5, %vm1497_vm4 }
 0x51c   :  { %v1493_v47 = vsub.f32 1.0, %v1492_v0  ;;  %v4954_v0 = vld [vmem:[#allocation11 + $0xa0] sm:$0xff] }
 0x51d   :  { %v1471_v33 = vmul.f32 %v3405_v20, %v1470_v30  ;;  %v4934_v30 = vld [vmem:[#allocation11 + $0xc8] sm:$0xff] }
 0x51e   :  { %v1494_v61 = vmul.f32 %v3407_v55, %v1493_v47  ;;  %1795 = vmatpush.msra.mxu0 %v4934_v30  ;;  %v4970_v47 = vld [vmem:[#allocation11 + $0x68] sm:$0xff] }
 0x51f   :  { %v1472_v45 = vadd.f32 %v3405_v20, %v1471_v33  ;;  %v4943_v33 = vld [vmem:[#allocation11 + $0xb0] sm:$0xff] }
 0x520   :  { %v1495_v39 = vadd.f32 %v3407_v55, %v1494_v61  ;;  %1796 = vmatpush.msra.mxu0 %v4943_v33 }
 0x521   :  { %v1476_v17 = vsel %vm1475_vm2, %v3405_v20, %v1472_v45  ;;  %v4952_v45 = vld [vmem:[#allocation11 + $0x98] sm:$0xff] }
 0x522   :  { %v1481_v53 = vsel %vm1478_vm3, %v1480_v48, %v1476_v17  ;;  %v1499_v8 = vsel %vm1498_vm6, %v3407_v55, %v1495_v39  ;;  %v4941_v55 = vld [vmem:[#allocation11 + $0xa8] sm:$0xff]  ;;  %1797 = vmatpush.msra.mxu0 %v4952_v45  ;;  %v4959_v48 = vld [vmem:[#allocation11 + $0x78] sm:$0xff]  ;;  %v4961_v17 = vld [vmem:[#allocation11 + $0x80] sm:$0xff] }
 0x523   :  { %v1510_v28 = vmul.f32 %v1508_v50, %v1481_v53  ;;  %v1504_v36 = vsel %vm1501_vm7, %v1503_v58, %v1499_v8  ;;  %1776 = vmatpush.msrb.mxu3 %v4941_v55  ;;  %v4963_v50 = vld [vmem:[#allocation11 + $0x88] sm:$0xff]  ;;  %v4987_v8 = vld [vmem:[#allocation11 + $0x38] sm:$0xff] }
 0x524   :  { %1798 = vmatpush.msra.mxu0 %v4961_v17  ;;  %6436 = vst [vmem:[#allocation34_spill] sm:$0xff] %v4987_v8 }
 0x525   :  { %v1511_v52 = vadd.f32 %v1510_v28, %v4233_v6  ;;  %1777 = vmatpush.msrb.mxu3 %v4950_v40  ;;  %v4968_v28 = vld [vmem:[#allocation11 + $0x60] sm:$0xff] }
 0x526   :  { %1799 = vmatpush.msra.mxu0 %v4970_v47 }
 0x527   :  { %3408 = vtanh.f32 %v1511_v52  ;;  %1778 = vmatpush.msrb.mxu3 %v4959_v48  ;;  %v4972_v52 = vld [vmem:[#allocation11 + $0x70] sm:$0xff] }
 0x528   :  { %6431 = vst [vmem:[#allocation28_spill] sm:$0xff] %v4972_v52  ;;  %1800 = vmatpush.msra.mxu0 %v4979_v49 }
 0x529   :  { %1779 = vmatpush.msrb.mxu3 %v4968_v28 }
 0x52a   :  { %1801 = vmatpush.msra.mxu0 %v4987_v8 }
 0x52d   :  { %v3409_v9 = vpop.eup %3408 }
 0x52e   :  { %v1514_v32 = vrot.slane %v3409_v9, 3 }
 0x530   :  { %v1516_v51 = vsub.f32 %v1350_v10, %v1514_v32  ;;  %v4898_v10 = vld [vmem:[#allocation11 + $0x130] sm:$0xff]  ;;  %v4981_v32 = vld [vmem:[#allocation11 + $0x58] sm:$0xff] }
 0x531   :  { %1811 = vmatpush.msra.mxu1 %v4898_v10  ;;  %6434 = vst [vmem:[#allocation25_spill] sm:$0xff] %v4981_v32 }
 0x532   :  { %v1518_v26 = vrot.slane %v1516_v51, 5  ;;  %v4989_v51 = vld [vmem:[#allocation11 + $0x40] sm:$0xff] }
 0x533   :  { %1812 = vmatpush.msra.mxu1 %v4907_v19  ;;  %6437 = vst [vmem:[#allocation80_spill] sm:$0xff] %v4989_v51 }
 0x534   :  { %v1520_v18 = vmul.f32 %v1518_v26, %v1504_v36  ;;  %v4992_v26 = vld [vmem:[#allocation11 + $0x18] sm:$0xff]  ;;  %v4994_v36 = vld [vmem:[#allocation11 + $0x20] sm:$0xff] }
 0x535   :  { %1813 = vmatpush.msra.mxu1 %v4917_v24  ;;  %6438 = vst [vmem:[#allocation79_spill] sm:$0xff] %v4992_v26  ;;  %1802 = vmatpush.msra.mxu0 %v4994_v36 }
 0x536   :  { %v4864_v41 = vadd.f32 %v3409_v9, %v1520_v18  ;;  %v4977_v9 = vld [vmem:[#allocation11 + $0x48] sm:$0xff]  ;;  %6439 = vst [vmem:[#allocation26_spill] sm:$0xff] %v4994_v36 }
 0x537   :  { %1814 = vmatpush.msra.mxu1 %v4927_v15  ;;  %6432 = vst [vmem:[#allocation32_spill] sm:$0xff] %v4977_v9  ;;  %1780 = vmatpush.msrb.mxu3 %v4977_v9  ;;  %v4998_v18 = vld [vmem:[#allocation11 + $0x28] sm:$0xff] }
 0x538   :  { %v1587_v23 = vrot.slane %v4864_v41, 3  ;;  %6440 = vst [vmem:[#allocation33_spill] sm:$0xff] %v4998_v18 }
 0x539   :  { %1815 = vmatpush.msra.mxu1 %v4936_v14  ;;  %1781 = vmatpush.msrb.mxu3 %v4985_v46 }
 0x53a   :  { %1605 = vmatmul.f32.vlgmr.msra.gmra.mxu3 %v1587_v23  ;;  %1625 = vmatmul.f32.vlgmr.msrb.gmra.mxu0 %v1587_v23 }
 0x53b   :  { %1645 = vmatmul.f32.vlgmr.msrb.gmra.mxu1 %v1587_v23  ;;  %1665 = vmatmul.f32.vlgmr.msrb.gmra.mxu2 %v1587_v23  ;;  %v5001_v23 = vld [vmem:[#allocation11] sm:$0xff] }
 0x53c   :  { %1816 = vmatpush.msra.mxu1 %v4945_v37  ;;  %6441 = vst [vmem:[#allocation36_spill] sm:$0xff] %v5001_v23  ;;  %1782 = vmatpush.msrb.mxu3 %v4992_v26 }
 0x53e   :  { %1817 = vmatpush.msra.mxu1 %v4954_v0  ;;  %1783 = vmatpush.msrb.mxu3 %v5001_v23 }
 0x540   :  { %1818 = vmatpush.msra.mxu1 %v4963_v50 }
 0x542   :  { %1819 = vmatpush.msra.mxu1 %v4972_v52 }
 0x544   :  { %1820 = vmatpush.msra.mxu1 %v4981_v32 }
 0x546   :  { %1821 = vmatpush.msra.mxu1 %v4989_v51 }
 0x548   :  { %1822 = vmatpush.msra.mxu1 %v4998_v18 }
 0x5b7   :  { %v1626_v3 = vpop.f32.mrf.mxu0 }
 0x5b8   :  { %v1627_v22 = vadd.f32 %v1626_v3, %v6426_v43  ;;  %v5003_v3 = vld [vmem:[#allocation11 + $0x8] sm:$0xff]  ;;  %v1646_v51 = vpop.f32.mrf.mxu1 }
 0x5b9   :  { %6442 = vst [vmem:[#allocation86_spill] sm:$0xff] %v5003_v3  ;;  %1803 = vmatpush.msra.mxu0 %v5003_v3 }
 0x5ba   :  { %v3305_v20 = vmul.f32 -1.442695, %v1627_v22  ;;  %v5007_v22 = vld [vmem:[#allocation11 + $0x10] sm:$0xff] }
 0x5bb   :  { %6443 = vst [vmem:[#allocation85_spill] sm:$0xff] %v5007_v22  ;;  %1823 = vmatpush.msra.mxu1 %v5007_v22  ;;  %v1647_v22 = vadd.f32 %v1646_v51, %v6428_v44  ;;  %v5077_v44 = vld [vmem:[#allocation12 + $0x178] sm:$0xff] }
 0x5bc   :  { %6458 = vst [vmem:[#allocation50_spill] sm:$0xff] %v5077_v44 }
 0x5bd   :  { %v1606_v4 = vpop.f32.mrf.mxu3 }
 0x5be   :  { %v1607_v34 = vadd.f32 %v1606_v4, %v6425_v31  ;;  %v1666_v31 = vpop.f32.mrf.mxu2 }
 0x5bf   :  { %v1667_v23 = vadd.f32 %v1666_v31, %v6427_v11  ;;  %v5085_v11 = vld [vmem:[#allocation12 + $0x150] sm:$0xff] }
 0x5c0   :  { %v3304_v38 = vmul.f32 -1.442695, %v1607_v34  ;;  %6460 = vst [vmem:[#allocation52_spill] sm:$0xff] %v5085_v11 }
 0x5c2   :  { %3410 = vpow2.f32 %v3304_v38 }
 0x5c3   :  { %3412 = vpow2.f32 %v3305_v20 }
 0x5c8   :  { %v3411_v53 = vpop.eup %3410 }
 0x5c9   :  { %v3413_v61 = vpop.eup %3412  ;;  %v1672_v39 = vadd.f32 1.0, %v3411_v53 }
 0x5ca   :  { %v1691_v58 = vadd.f32 1.0, %v3413_v61 }
 0x5cb   :  { %3414 = vrcp.f32 %v1672_v39  ;;  %v1684_v38 = vand.u32 2147483648, %v1672_v39  ;;  %v1682_v43 = vand.u32 2147483647, %v1672_v39  ;;  %vm1678_vm9 = vweird.f32 %v1672_v39 }
 0x5cc   :  { %3416 = vrcp.f32 %v1691_v58  ;;  %vm1697_vm13 = vweird.f32 %v1691_v58  ;;  %v1701_v9 = vand.u32 2147483647, %v1691_v58 }
 0x5cd   :  { %v1685_v18 = vor.u32 1.1754944e-38, %v1684_v38  ;;  %vm1683_vm11 = vcmp.eq.f32.partialorder %v1682_v43, 8.507059e+37  ;;  %v5048_v38 = vld [vmem:[#allocation12 + $0x1a8] sm:$0xff] }
 0x5ce   :  { %vm1702_vm15 = vcmp.eq.f32.partialorder %v1701_v9, 8.507059e+37  ;;  %v5030_v9 = vld [vmem:[#allocation12 + $0x1f8] sm:$0xff]  ;;  %6450 = vst [vmem:[#allocation42_spill] sm:$0xff] %v5048_v38 }
 0x5cf   :  { %6446 = vst [vmem:[#allocation37_spill] sm:$0xff] %v5030_v9  ;;  %2017 = vmatpush.msrb.mxu1 %v5030_v9  ;;  %v5187_v9 = vld [vmem:[#allocation12 + $0x50] sm:$0xff] }
 0x5d0   :  { %6485 = vst [vmem:[#allocation81_spill] sm:$0xff] %v5187_v9 }
 0x5d1   :  { %v3415_v4 = vpop.eup %3414 }
 0x5d2   :  { %v1674_v34 = vmul.f32 %v3415_v4, %v1672_v39  ;;  %v3417_v53 = vpop.eup %3416  ;;  %vm1679_vm8 = vweird.f32 %v3415_v4  ;;  %v1703_v39 = vand.u32 2147483648, %v1691_v58 }
 0x5d3   :  { %v1693_v26 = vmul.f32 %v3417_v53, %v1691_v58  ;;  %vm1680_vm10 = vmor %vm1678_vm9, %vm1679_vm8  ;;  %vm1698_vm12 = vweird.f32 %v3417_v53  ;;  %v5036_v58 = vld [vmem:[#allocation12 + $0x1c8] sm:$0xff] }
 0x5d4   :  { %v1675_v20 = vsub.f32 1.0, %v1674_v34  ;;  %vm1699_vm14 = vmor %vm1697_vm13, %vm1698_vm12  ;;  %v1704_v43 = vor.u32 1.1754944e-38, %v1703_v39  ;;  %6447 = vst [vmem:[#allocation38_spill] sm:$0xff] %v5036_v58  ;;  %v5062_v39 = vld [vmem:[#allocation12 + $0x190] sm:$0xff] }
 0x5d5   :  { %v1694_v46 = vsub.f32 1.0, %v1693_v26  ;;  %6454 = vst [vmem:[#allocation46_spill] sm:$0xff] %v5062_v39 }
 0x5d6   :  { %v1676_v61 = vmul.f32 %v3415_v4, %v1675_v20 }
 0x5d7   :  { %v1695_v20 = vmul.f32 %v3417_v53, %v1694_v46  ;;  %v5024_v46 = vld [vmem:[#allocation12 + $0x1e8] sm:$0xff] }
 0x5d8   :  { %v1677_v36 = vadd.f32 %v3415_v4, %v1676_v61  ;;  %6444 = vst [vmem:[#allocation27_spill] sm:$0xff] %v5024_v46  ;;  %1977 = vmatpush.msra.mxu3 %v5024_v46  ;;  %v5214_v46 = vld [vmem:[#allocation12 + $0x18] sm:$0xff] }
 0x5d9   :  { %v1696_v49 = vadd.f32 %v3417_v53, %v1695_v20  ;;  %v5058_v20 = vld [vmem:[#allocation12 + $0x180] sm:$0xff] }
 0x5da   :  { %v1681_v8 = vsel %vm1680_vm10, %v3415_v4, %v1677_v36  ;;  %1978 = vmatpush.msra.mxu3 %v5036_v58  ;;  %v5046_v4 = vld [vmem:[#allocation12 + $0x1a0] sm:$0xff] }
 0x5db   :  { %v1686_v3 = vsel %vm1683_vm11, %v1685_v18, %v1681_v8  ;;  %v1700_v36 = vsel %vm1699_vm14, %v3417_v53, %v1696_v49  ;;  %v5034_v49 = vld [vmem:[#allocation12 + $0x1c0] sm:$0xff]  ;;  %v5050_v53 = vld [vmem:[#allocation12 + $0x1b0] sm:$0xff] }
 0x5dc   :  { %v1707_v34 = vmul.f32 %v1686_v3, %v1667_v23  ;;  %v1705_v51 = vsel %vm1702_vm15, %v1704_v43, %v1700_v36  ;;  %v5038_v23 = vld [vmem:[#allocation12 + $0x1d0] sm:$0xff]  ;;  %6451 = vst [vmem:[#allocation43_spill] sm:$0xff] %v5050_v53  ;;  %1979 = vmatpush.msra.mxu3 %v5048_v38  ;;  %v5067_v43 = vld [vmem:[#allocation12 + $0x198] sm:$0xff] }
 0x5dd   :  { %6448 = vst [vmem:[#allocation40_spill] sm:$0xff] %v5038_v23 }
 0x5de   :  { %v1708_v32 = vadd.f32 %v1707_v34, %v1647_v22  ;;  %v5042_v22 = vld [vmem:[#allocation12 + $0x1d8] sm:$0xff]  ;;  %6455 = vst [vmem:[#allocation47_spill] sm:$0xff] %v5067_v43 }
 0x5df   :  { %6449 = vst [vmem:[#allocation41_spill] sm:$0xff] %v5042_v22  ;;  %2018 = vmatpush.msrb.mxu1 %v5042_v22  ;;  %v5054_v34 = vld [vmem:[#allocation12 + $0x1b8] sm:$0xff] }
 0x5e0   :  { %3418 = vtanh.f32 %v1708_v32  ;;  %v5022_v32 = vld [vmem:[#allocation12 + $0x1e0] sm:$0xff]  ;;  %6452 = vst [vmem:[#allocation44_spill] sm:$0xff] %v5054_v34 }
 0x5e1   :  { %1957 = vmatpush.msra.mxu2 %v5022_v32  ;;  %2019 = vmatpush.msrb.mxu1 %v5054_v34 }
 0x5e3   :  { %1958 = vmatpush.msra.mxu2 %v5034_v49  ;;  %2020 = vmatpush.msrb.mxu1 %v5067_v43  ;;  %v5092_v43 = vld [vmem:[#allocation12 + $0x120] sm:$0xff] }
 0x5e5   :  { %1959 = vmatpush.msra.mxu2 %v5046_v4  ;;  %2021 = vmatpush.msrb.mxu1 %v5077_v44  ;;  %v5148_v44 = vld [vmem:[#allocation12 + $0xb8] sm:$0xff] }
 0x5e6   :  { %v3419_v61 = vpop.eup %3418  ;;  %6476 = vst [vmem:[#allocation68_spill] sm:$0xff] %v5148_v44 }
 0x5e7   :  { %v1711_v52 = vrot.slane %v3419_v61, 5  ;;  %1960 = vmatpush.msra.mxu2 %v5058_v20 }
 0x5e9   :  { %v1713_v31 = vsub.f32 %v4864_v41, %v1711_v52  ;;  %v5026_v41 = vld [vmem:[#allocation12 + $0x1f0] sm:$0xff] }
 0x5ea   :  { %6445 = vst [vmem:[#allocation35_spill] sm:$0xff] %v5026_v41  ;;  %1997 = vmatpush.msrb.mxu0 %v5026_v41  ;;  %v5201_v41 = vld [vmem:[#allocation12 + $0x38] sm:$0xff] }
 0x5eb   :  { %v1715_v8 = vrot.slane %v1713_v31, 3  ;;  %6489 = vst [vmem:[#allocation88_spill] sm:$0xff] %v5201_v41 }
 0x5ec   :  { %1998 = vmatpush.msrb.mxu0 %v5038_v23  ;;  %v5162_v23 = vld [vmem:[#allocation12 + $0x98] sm:$0xff] }
 0x5ed   :  { %v1717_v18 = vmul.f32 %v1715_v8, %v1705_v51  ;;  %v5069_v8 = vld [vmem:[#allocation12 + $0x160] sm:$0xff]  ;;  %v5071_v51 = vld [vmem:[#allocation12 + $0x168] sm:$0xff]  ;;  %6479 = vst [vmem:[#allocation71_spill] sm:$0xff] %v5162_v23 }
 0x5ee   :  { %1999 = vmatpush.msrb.mxu0 %v5050_v53  ;;  %6456 = vst [vmem:[#allocation48_spill] sm:$0xff] %v5071_v51  ;;  %1961 = vmatpush.msra.mxu2 %v5069_v8  ;;  %v5100_v53 = vld [vmem:[#allocation12 + $0x138] sm:$0xff] }
 0x5ef   :  { %v5016_v26 = vadd.f32 %v3419_v61, %v1717_v18  ;;  %v5060_v61 = vld [vmem:[#allocation12 + $0x188] sm:$0xff]  ;;  %6464 = vst [vmem:[#allocation56_spill] sm:$0xff] %v5100_v53 }
 0x5f0   :  { %6453 = vst [vmem:[#allocation45_spill] sm:$0xff] %v5060_v61  ;;  %1980 = vmatpush.msra.mxu3 %v5060_v61  ;;  %2000 = vmatpush.msrb.mxu0 %v5062_v39  ;;  %v5087_v61 = vld [vmem:[#allocation12 + $0x158] sm:$0xff]  ;;  %v5094_v39 = vld [vmem:[#allocation12 + $0x128] sm:$0xff] }
 0x5f1   :  { %1719 = vst [vmem:[#allocation2 + $0x3] sm:$0x1] %v5016_v26  ;;  %1784 = vmatmul.f32.vlgmr.msrb.gmra.mxu3 %v5016_v26  ;;  %1804 = vmatmul.f32.vlgmr.msra.gmra.mxu0 %v5016_v26 }
 0x5f2   :  { %1824 = vmatmul.f32.vlgmr.msra.gmra.mxu1 %v5016_v26  ;;  %1981 = vmatpush.msra.mxu3 %v5071_v51  ;;  %6461 = vst [vmem:[#allocation53_spill] sm:$0xff] %v5087_v61  ;;  %v5098_v51 = vld [vmem:[#allocation12 + $0x130] sm:$0xff] }
 0x5f3   :  { %6462 = vst [vmem:[#allocation54_spill] sm:$0xff] %v5094_v39  ;;  %2022 = vmatpush.msrb.mxu1 %v5087_v61  ;;  %v5118_v61 = vld [vmem:[#allocation12 + $0xe8] sm:$0xff] }
 0x5f4   :  { %6463 = vst [vmem:[#allocation55_spill] sm:$0xff] %v5098_v51 }
 0x5f5   :  { %2023 = vmatpush.msrb.mxu1 %v5100_v53  ;;  %6468 = vst [vmem:[#allocation60_spill] sm:$0xff] %v5118_v61  ;;  %v5130_v53 = vld [vmem:[#allocation12 + $0xc8] sm:$0xff] }
 0x5f6   :  { %6471 = vst [vmem:[#allocation63_spill] sm:$0xff] %v5130_v53 }
 0x66e   :  { %v1805_v52 = vpop.f32.mrf.mxu0 }
 0x66f   :  { %v1852_v3 = vrot.slane %v1805_v52, 4  ;;  %v5075_v52 = vld [vmem:[#allocation12 + $0x170] sm:$0xff] }
 0x670   :  { %6457 = vst [vmem:[#allocation49_spill] sm:$0xff] %v5075_v52  ;;  %2001 = vmatpush.msrb.mxu0 %v5075_v52 }
 0x671   :  { %v1854_v31 = vadd.f32 %v1852_v3, %v6430_v29  ;;  %v5079_v3 = vld [vmem:[#allocation12 + $0x140] sm:$0xff]  ;;  %v5083_v29 = vld [vmem:[#allocation12 + $0x148] sm:$0xff] }
 0x672   :  { %6459 = vst [vmem:[#allocation51_spill] sm:$0xff] %v5083_v29  ;;  %1962 = vmatpush.msra.mxu2 %v5079_v3  ;;  %1982 = vmatpush.msra.mxu3 %v5083_v29  ;;  %v5112_v29 = vld [vmem:[#allocation12 + $0x118] sm:$0xff] }
 0x673   :  { %v3307_v34 = vmul.f32 -1.442695, %v1854_v31  ;;  %2002 = vmatpush.msrb.mxu0 %v5085_v11  ;;  %v5110_v31 = vld [vmem:[#allocation12 + $0x110] sm:$0xff]  ;;  %6467 = vst [vmem:[#allocation59_spill] sm:$0xff] %v5112_v29  ;;  %2024 = vmatpush.msrb.mxu1 %v5112_v29 }
 0x674   :  { %v1785_v36 = vpop.f32.mrf.mxu3  ;;  %1963 = vmatpush.msra.mxu2 %v5092_v43  ;;  %1983 = vmatpush.msra.mxu3 %v5094_v39  ;;  %6466 = vst [vmem:[#allocation58_spill] sm:$0xff] %v5110_v31  ;;  %v5122_v11 = vld [vmem:[#allocation12 + $0xf0] sm:$0xff]  ;;  %v5124_v39 = vld [vmem:[#allocation12 + $0xf8] sm:$0xff] }
 0x675   :  { %v1829_v18 = vrot.slane %v1785_v36, 4  ;;  %2003 = vmatpush.msrb.mxu0 %v5098_v51  ;;  %6469 = vst [vmem:[#allocation61_spill] sm:$0xff] %v5122_v11  ;;  %v5136_v51 = vld [vmem:[#allocation12 + $0xd8] sm:$0xff]  ;;  %2025 = vmatpush.msrb.mxu1 %v5124_v39  ;;  %v5146_v29 = vld [vmem:[#allocation12 + $0xb0] sm:$0xff] }
 0x676   :  { %6470 = vst [vmem:[#allocation62_spill] sm:$0xff] %v5124_v39  ;;  %v5154_v39 = vld [vmem:[#allocation12 + $0x88] sm:$0xff] }
 0x677   :  { %v1831_v36 = vadd.f32 %v1829_v18, %v6429_v25  ;;  %v5104_v18 = vld [vmem:[#allocation12 + $0x100] sm:$0xff]  ;;  %v5106_v25 = vld [vmem:[#allocation12 + $0x108] sm:$0xff]  ;;  %2004 = vmatpush.msrb.mxu0 %v5110_v31  ;;  %6473 = vst [vmem:[#allocation65_spill] sm:$0xff] %v5136_v51  ;;  %2026 = vmatpush.msrb.mxu1 %v5136_v51 }
 0x678   :  { %6465 = vst [vmem:[#allocation57_spill] sm:$0xff] %v5106_v25  ;;  %1964 = vmatpush.msra.mxu2 %v5104_v18  ;;  %1984 = vmatpush.msra.mxu3 %v5106_v25  ;;  %v5140_v25 = vld [vmem:[#allocation12 + $0xa0] sm:$0xff]  ;;  %v5142_v31 = vld [vmem:[#allocation12 + $0xa8] sm:$0xff] }
 0x679   :  { %v3306_v38 = vmul.f32 -1.442695, %v1831_v36  ;;  %v5116_v36 = vld [vmem:[#allocation12 + $0xe0] sm:$0xff]  ;;  %2005 = vmatpush.msrb.mxu0 %v5122_v11  ;;  %6474 = vst [vmem:[#allocation66_spill] sm:$0xff] %v5142_v31  ;;  %2027 = vmatpush.msrb.mxu1 %v5148_v44 }
 0x67a   :  { %1965 = vmatpush.msra.mxu2 %v5116_v36  ;;  %1985 = vmatpush.msra.mxu3 %v5118_v61  ;;  %6475 = vst [vmem:[#allocation67_spill] sm:$0xff] %v5146_v29  ;;  %v5152_v11 = vld [vmem:[#allocation12 + $0x80] sm:$0xff] }
 0x67b   :  { %3420 = vpow2.f32 %v3306_v38  ;;  %v5128_v38 = vld [vmem:[#allocation12 + $0xc0] sm:$0xff]  ;;  %6477 = vst [vmem:[#allocation69_spill] sm:$0xff] %v5154_v39  ;;  %2028 = vmatpush.msrb.mxu1 %v5162_v23  ;;  %v5199_v23 = vld [vmem:[#allocation12 + $0x30] sm:$0xff] }
 0x67c   :  { %3422 = vpow2.f32 %v3307_v34  ;;  %v5134_v34 = vld [vmem:[#allocation12 + $0xd0] sm:$0xff]  ;;  %1966 = vmatpush.msra.mxu2 %v5128_v38  ;;  %1986 = vmatpush.msra.mxu3 %v5130_v53  ;;  %v5166_v51 = vld [vmem:[#allocation12 + $0x60] sm:$0xff] }
 0x67d   :  { %6472 = vst [vmem:[#allocation64_spill] sm:$0xff] %v5134_v34  ;;  %2006 = vmatpush.msrb.mxu0 %v5134_v34  ;;  %v5160_v53 = vld [vmem:[#allocation12 + $0x90] sm:$0xff]  ;;  %v5168_v34 = vld [vmem:[#allocation12 + $0x68] sm:$0xff]  ;;  %v5181_v44 = vld [vmem:[#allocation12 + $0x40] sm:$0xff] }
 0x67e   :  { %1967 = vmatpush.msra.mxu2 %v5140_v25  ;;  %1987 = vmatpush.msra.mxu3 %v5142_v31  ;;  %6478 = vst [vmem:[#allocation70_spill] sm:$0xff] %v5160_v53  ;;  %v5175_v31 = vld [vmem:[#allocation12 + $0x78] sm:$0xff] }
 0x67f   :  { %2007 = vmatpush.msrb.mxu0 %v5146_v29  ;;  %6480 = vst [vmem:[#allocation73_spill] sm:$0xff] %v5168_v34  ;;  %v5183_v29 = vld [vmem:[#allocation12 + $0x48] sm:$0xff]  ;;  %2029 = vmatpush.msrb.mxu1 %v5175_v31 }
 0x680   :  { %1968 = vmatpush.msra.mxu2 %v5152_v11  ;;  %1988 = vmatpush.msra.mxu3 %v5154_v39  ;;  %6482 = vst [vmem:[#allocation75_spill] sm:$0xff] %v5175_v31  ;;  %v5189_v39 = vld [vmem:[#allocation12 + $0x58] sm:$0xff]  ;;  %v5208_v31 = vld [vmem:[#allocation12 + $0x8] sm:$0xff] }
 0x681   :  { %v3421_v61 = vpop.eup %3420  ;;  %2008 = vmatpush.msrb.mxu0 %v5160_v53  ;;  %6483 = vst [vmem:[#allocation77_spill] sm:$0xff] %v5181_v44  ;;  %v5195_v53 = vld [vmem:[#allocation12 + $0x28] sm:$0xff]  ;;  %2030 = vmatpush.msrb.mxu1 %v5189_v39 }
 0x682   :  { %v3423_v52 = vpop.eup %3422  ;;  %v5156_v22 = vadd.f32 1.0, %v3421_v61  ;;  %v5173_v61 = vld [vmem:[#allocation12 + $0x70] sm:$0xff]  ;;  %6484 = vst [vmem:[#allocation78_spill] sm:$0xff] %v5183_v29  ;;  %1969 = vmatpush.msra.mxu2 %v5166_v51  ;;  %1989 = vmatpush.msra.mxu3 %v5168_v34 }
 0x683   :  { %6481 = vst [vmem:[#allocation74_spill] sm:$0xff] %v5173_v61  ;;  %v5177_v58 = vadd.f32 1.0, %v3423_v52  ;;  %2009 = vmatpush.msrb.mxu0 %v5173_v61  ;;  %v5193_v52 = vld [vmem:[#allocation12 + $0x20] sm:$0xff]  ;;  %2031 = vmatpush.msrb.mxu1 %v5201_v41  ;;  %v5231_v41 = vld [vmem:[%s5896_s5] sm:$0x1] }
 0x684   :  { %3424 = vrcp.f32 %v5156_v22  ;;  %6486 = vst [vmem:[#allocation83_spill] sm:$0xff] %v5189_v39  ;;  %1970 = vmatpush.msra.mxu2 %v5181_v44  ;;  %1990 = vmatpush.msra.mxu3 %v5183_v29  ;;  %v5206_v61 = vld [vmem:[#allocation12] sm:$0xff]  ;;  %v5212_v29 = vld [vmem:[#allocation12 + $0x10] sm:$0xff]  ;;  %v1825_v39 = vpop.f32.mrf.mxu1  ;;  %vm1841_vm1 = vweird.f32 %v5156_v22 }
 0x685   :  { %6487 = vst [vmem:[#allocation84_spill] sm:$0xff] %v5193_v52  ;;  %3426 = vrcp.f32 %v5177_v58  ;;  %2010 = vmatpush.msrb.mxu0 %v5187_v9  ;;  %2032 = vmatpush.msrb.mxu1 %v5214_v46  ;;  %vm1864_vm5 = vweird.f32 %v5177_v58 }
 0x686   :  { %6488 = vst [vmem:[#allocation87_spill] sm:$0xff] %v5195_v53  ;;  %1971 = vmatpush.msra.mxu2 %v5193_v52  ;;  %1991 = vmatpush.msra.mxu3 %v5195_v53  ;;  %v1847_v53 = vand.u32 2147483648, %v5156_v22 }
 0x687   :  { %6490 = vst [vmem:[#allocation89_spill] sm:$0xff] %v5208_v31  ;;  %2011 = vmatpush.msrb.mxu0 %v5199_v23  ;;  %2325 = vmatpush.msra.mxu1 %v5022_v32  ;;  %v6509_v32 = vld [vmem:[#allocation37_spill] sm:$0xff] }
 0x688   :  { %6491 = vst [vmem:[#allocation90_spill] sm:$0xff] %v5212_v29  ;;  %1972 = vmatpush.msra.mxu2 %v5206_v61  ;;  %1992 = vmatpush.msra.mxu3 %v5208_v31  ;;  %v1874_v31 = vadd.f32 %v5231_v41, %v1825_v39  ;;  %v6516_v39 = vld [vmem:[#allocation45_spill] sm:$0xff] }
 0x689   :  { %2012 = vmatpush.msrb.mxu0 %v5212_v29  ;;  %v1845_v29 = vand.u32 2147483647, %v5156_v22  ;;  %2326 = vmatpush.msra.mxu1 %v5034_v49  ;;  %v6510_v49 = vld [vmem:[#allocation38_spill] sm:$0xff] }
 0x68a   :  { %v3425_v34 = vpop.eup %3424  ;;  %2136 = vmatpush.msrb.mxu2 %v4867_v27  ;;  %2156 = vmatpush.msrb.mxu3 %v4869_v57 }
 0x68b   :  { %v1837_v44 = vmul.f32 %v3425_v34, %v5156_v22  ;;  %v5226_v52 = vpop.eup %3426  ;;  %vm1842_vm0 = vweird.f32 %v3425_v34  ;;  %2176 = vmatpush.msra.mxu0 %v4871_v7  ;;  %v1876_v7 = vrot.slane %v1874_v31, 4  ;;  %vm1846_vm3 = vcmp.eq.f32.partialorder %v1845_v29, 8.507059e+37  ;;  %2327 = vmatpush.msra.mxu1 %v5046_v4  ;;  %v6512_v22 = vld [vmem:[#allocation41_spill] sm:$0xff]  ;;  %v6513_v4 = vld [vmem:[#allocation42_spill] sm:$0xff]  ;;  %v6522_v31 = vld [vmem:[#allocation51_spill] sm:$0xff] }
 0x68c   :  { %2137 = vmatpush.msrb.mxu2 %v4876_v42  ;;  %2157 = vmatpush.msrb.mxu3 %v4878_v1  ;;  %v1860_v57 = vmul.f32 %v5226_v52, %v5177_v58  ;;  %vm1843_vm2 = vmor %vm1841_vm1, %vm1842_vm0  ;;  %vm1865_vm4 = vweird.f32 %v5226_v52 }
 0x68d   :  { %v1838_v9 = vsub.f32 1.0, %v1837_v44  ;;  %2177 = vmatpush.msra.mxu0 %v4880_v56  ;;  %2328 = vmatpush.msra.mxu1 %v5058_v20  ;;  %vm1866_vm6 = vmor %vm1864_vm5, %vm1865_vm4  ;;  %v6515_v20 = vld [vmem:[#allocation44_spill] sm:$0xff] }
 0x68e   :  { %2138 = vmatpush.msrb.mxu2 %v4885_v60  ;;  %2158 = vmatpush.msrb.mxu3 %v4887_v5  ;;  %v1861_v60 = vsub.f32 1.0, %v1860_v57  ;;  %v6530_v57 = vld [vmem:[#allocation59_spill] sm:$0xff] }
 0x68f   :  { %v1839_v44 = vmul.f32 %v3425_v34, %v1838_v9  ;;  %v1848_v9 = vor.u32 1.1754944e-38, %v1847_v53  ;;  %2178 = vmatpush.msra.mxu0 %v4889_v54  ;;  %2329 = vmatpush.msra.mxu1 %v5069_v8  ;;  %v6514_v53 = vld [vmem:[#allocation43_spill] sm:$0xff] }
 0x690   :  { %2139 = vmatpush.msrb.mxu2 %v4894_v59  ;;  %2159 = vmatpush.msrb.mxu3 %v4896_v63  ;;  %v1862_v5 = vmul.f32 %v5226_v52, %v1861_v60  ;;  %v1870_v63 = vand.u32 2147483648, %v5177_v58  ;;  %v6518_v8 = vld [vmem:[#allocation47_spill] sm:$0xff]  ;;  %v6536_v60 = vld [vmem:[#allocation65_spill] sm:$0xff] }
 0x691   :  { %v1840_v27 = vadd.f32 %v3425_v34, %v1839_v44  ;;  %2179 = vmatpush.msra.mxu0 %v4898_v10  ;;  %2330 = vmatpush.msra.mxu1 %v5079_v3  ;;  %v1868_v10 = vand.u32 2147483647, %v5177_v58  ;;  %v6511_v58 = vld [vmem:[#allocation40_spill] sm:$0xff]  ;;  %v6520_v3 = vld [vmem:[#allocation49_spill] sm:$0xff] }
 0x692   :  { %2140 = vmatpush.msrb.mxu2 %v4903_v13  ;;  %2160 = vmatpush.msrb.mxu3 %v4905_v16  ;;  %v1863_v54 = vadd.f32 %v5226_v52, %v1862_v5  ;;  %v6528_v44 = vld [vmem:[#allocation57_spill] sm:$0xff]  ;;  %v6538_v5 = vld [vmem:[#allocation67_spill] sm:$0xff] }
 0x693   :  { %v1844_v42 = vsel %vm1843_vm2, %v3425_v34, %v1840_v27  ;;  %2180 = vmatpush.msra.mxu0 %v4907_v19  ;;  %2331 = vmatpush.msra.mxu1 %v5092_v43  ;;  %vm1869_vm7 = vcmp.eq.f32.partialorder %v1868_v10, 8.507059e+37  ;;  %v6517_v43 = vld [vmem:[#allocation46_spill] sm:$0xff]  ;;  %v6542_v10 = vld [vmem:[#allocation71_spill] sm:$0xff] }
 0x694   :  { %v1849_v1 = vsel %vm1846_vm3, %v1848_v9, %v1844_v42  ;;  %2141 = vmatpush.msrb.mxu2 %v4913_v62  ;;  %2161 = vmatpush.msrb.mxu3 %v4915_v2  ;;  %v1867_v16 = vsel %vm1866_vm6, %v5226_v52, %v1863_v54  ;;  %v1871_v62 = vor.u32 1.1754944e-38, %v1870_v63  ;;  %v6525_v34 = vld [vmem:[#allocation54_spill] sm:$0xff]  ;;  %v6527_v52 = vld [vmem:[#allocation56_spill] sm:$0xff] }
 0x695   :  { %v1878_v56 = vmul.f32 %v1876_v7, %v1849_v1  ;;  %2181 = vmatpush.msra.mxu0 %v4917_v24  ;;  %2332 = vmatpush.msra.mxu1 %v5104_v18  ;;  %v6521_v18 = vld [vmem:[#allocation50_spill] sm:$0xff]  ;;  %v6531_v9 = vld [vmem:[#allocation60_spill] sm:$0xff]  ;;  %v6532_v7 = vld [vmem:[#allocation61_spill] sm:$0xff] }
 0x696   :  { %2142 = vmatpush.msrb.mxu2 %v4923_v12  ;;  %2162 = vmatpush.msrb.mxu3 %v4925_v35  ;;  %v1872_v24 = vsel %vm1869_vm7, %v1871_v62, %v1867_v16  ;;  %v6492_v12 = vld [vmem:[#allocation28_spill] sm:$0xff]  ;;  %v6529_v27 = vld [vmem:[#allocation58_spill] sm:$0xff]  ;;  %v6534_v1 = vld [vmem:[#allocation63_spill] sm:$0xff] }
 0x697   :  { %v1879_v29 = vadd.f32 %v1878_v56, %v4233_v6  ;;  %2182 = vmatpush.msra.mxu0 %v4927_v15  ;;  %2333 = vmatpush.msra.mxu1 %v5116_v36  ;;  %v6493_v15 = vld [vmem:[#allocation32_spill] sm:$0xff]  ;;  %v6533_v42 = vld [vmem:[#allocation62_spill] sm:$0xff] }
 0x698   :  { %2143 = vmatpush.msrb.mxu2 %v4932_v21  ;;  %2163 = vmatpush.msrb.mxu3 %v4934_v30  ;;  %v6494_v21 = vld [vmem:[#allocation76_spill] sm:$0xff]  ;;  %v6495_v30 = vld [vmem:[#allocation25_spill] sm:$0xff]  ;;  %v6541_v63 = vld [vmem:[#allocation70_spill] sm:$0xff] }
 0x699   :  { %3428 = vtanh.f32 %v1879_v29  ;;  %2183 = vmatpush.msra.mxu0 %v4936_v14  ;;  %2334 = vmatpush.msra.mxu1 %v5128_v38  ;;  %v6496_v14 = vld [vmem:[#allocation31_spill] sm:$0xff]  ;;  %v6523_v36 = vld [vmem:[#allocation52_spill] sm:$0xff]  ;;  %v6524_v38 = vld [vmem:[#allocation53_spill] sm:$0xff] }
 0x69a   :  { %2144 = vmatpush.msrb.mxu2 %v4941_v55  ;;  %2164 = vmatpush.msrb.mxu3 %v4943_v33  ;;  %v6497_v55 = vld [vmem:[#allocation34_spill] sm:$0xff]  ;;  %v6498_v33 = vld [vmem:[#allocation80_spill] sm:$0xff] }
 0x69b   :  { %2184 = vmatpush.msra.mxu0 %v4945_v37  ;;  %2335 = vmatpush.msra.mxu1 %v5140_v25  ;;  %v6499_v37 = vld [vmem:[#allocation77_spill] sm:$0xff]  ;;  %v6535_v56 = vld [vmem:[#allocation64_spill] sm:$0xff]  ;;  %v6537_v29 = vld [vmem:[#allocation66_spill] sm:$0xff] }
 0x69c   :  { %2145 = vmatpush.msrb.mxu2 %v4950_v40  ;;  %2165 = vmatpush.msrb.mxu3 %v4952_v45  ;;  %v6500_v40 = vld [vmem:[#allocation79_spill] sm:$0xff]  ;;  %v6501_v45 = vld [vmem:[#allocation26_spill] sm:$0xff]  ;;  %v6539_v54 = vld [vmem:[#allocation68_spill] sm:$0xff] }
 0x69d   :  { %2185 = vmatpush.msra.mxu0 %v4954_v0  ;;  %2336 = vmatpush.msra.mxu1 %v5152_v11  ;;  %v6502_v0 = vld [vmem:[#allocation33_spill] sm:$0xff]  ;;  %v6544_v16 = vld [vmem:[#allocation74_spill] sm:$0xff] }
 0x69e   :  { %2146 = vmatpush.msrb.mxu2 %v4959_v48  ;;  %2166 = vmatpush.msrb.mxu3 %v4961_v17  ;;  %v6503_v48 = vld [vmem:[#allocation84_spill] sm:$0xff]  ;;  %v6546_v62 = vld [vmem:[#allocation78_spill] sm:$0xff] }
 0x69f   :  { %v3429_v59 = vpop.eup %3428  ;;  %2186 = vmatpush.msra.mxu0 %v4963_v50  ;;  %2337 = vmatpush.msra.mxu1 %v5166_v51  ;;  %v6504_v17 = vld [vmem:[#allocation36_spill] sm:$0xff]  ;;  %v6505_v50 = vld [vmem:[#allocation86_spill] sm:$0xff] }
 0x6a0   :  { %v1882_v13 = vrot.slane %v3429_v59, 4  ;;  %2147 = vmatpush.msrb.mxu2 %v4968_v28  ;;  %2167 = vmatpush.msrb.mxu3 %v4970_v47  ;;  %v6506_v28 = vld [vmem:[#allocation85_spill] sm:$0xff]  ;;  %v6507_v47 = vld [vmem:[#allocation27_spill] sm:$0xff]  ;;  %v6519_v51 = vld [vmem:[#allocation48_spill] sm:$0xff] }
 0x6a1   :  { %2187 = vmatpush.msra.mxu0 %v6492_v12  ;;  %2338 = vmatpush.msra.mxu1 %v6499_v37  ;;  %v6549_v12 = vld [vmem:[#allocation87_spill] sm:$0xff]  ;;  %v6554_v37 = vld [vmem:[#allocation72_spill] sm:$0xff] }
 0x6a2   :  { %v1884_v19 = vsub.f32 %v5016_v26, %v1882_v13  ;;  %2148 = vmatpush.msrb.mxu2 %v6493_v15  ;;  %2168 = vmatpush.msrb.mxu3 %v6494_v21  ;;  %v6508_v26 = vld [vmem:[#allocation35_spill] sm:$0xff]  ;;  %v6543_v13 = vld [vmem:[#allocation73_spill] sm:$0xff]  ;;  %v6552_v21 = vld [vmem:[#allocation90_spill] sm:$0xff] }
 0x6a3   :  { %2188 = vmatpush.msra.mxu0 %v6495_v30  ;;  %2339 = vmatpush.msra.mxu1 %v6503_v48  ;;  %v6551_v15 = vld [vmem:[#allocation89_spill] sm:$0xff] }
 0x6a4   :  { %v1886_v2 = vrot.slane %v1884_v19, 4  ;;  %2149 = vmatpush.msrb.mxu2 %v6496_v14  ;;  %2169 = vmatpush.msrb.mxu3 %v6497_v55  ;;  %v6545_v19 = vld [vmem:[#allocation75_spill] sm:$0xff]  ;;  %v6553_v55 = vld [vmem:[#allocation30_spill] sm:$0xff] }
 0x6a5   :  { %2189 = vmatpush.msra.mxu0 %v6498_v33  ;;  %2340 = vmatpush.msra.mxu1 %v5206_v61  ;;  %v6526_v61 = vld [vmem:[#allocation55_spill] sm:$0xff] }
 0x6a6   :  { %v1888_v35 = vmul.f32 %v1886_v2, %v1872_v24  ;;  %2150 = vmatpush.msrb.mxu2 %v6500_v40  ;;  %2170 = vmatpush.msrb.mxu3 %v6501_v45  ;;  %v6547_v2 = vld [vmem:[#allocation81_spill] sm:$0xff]  ;;  %v6548_v24 = vld [vmem:[#allocation83_spill] sm:$0xff] }
 0x6a7   :  { %2190 = vmatpush.msra.mxu0 %v6502_v0 }
 0x6a8   :  { %v5297_v25 = vadd.f32 %v3429_v59, %v1888_v35  ;;  %2151 = vmatpush.msrb.mxu2 %v6504_v17  ;;  %2171 = vmatpush.msrb.mxu3 %v6505_v50  ;;  %v6540_v59 = vld [vmem:[#allocation69_spill] sm:$0xff]  ;;  %v6550_v35 = vld [vmem:[#allocation88_spill] sm:$0xff] }
 0x6a9   :  { %2191 = vmatpush.msra.mxu0 %v6506_v28 }
 0x6aa   :  { %v1955_v11 = vrot.slane %v5297_v25, 4 }
 0x6ac   :  { %1973 = vmatmul.f32.vlgmr.msra.gmra.mxu2 %v1955_v11  ;;  %1993 = vmatmul.f32.vlgmr.msra.gmra.mxu3 %v1955_v11 }
 0x6ad   :  { %2013 = vmatmul.f32.vlgmr.msrb.gmra.mxu0 %v1955_v11  ;;  %2033 = vmatmul.f32.vlgmr.msrb.gmra.mxu1 %v1955_v11 }
 0x6ae   :  { %2345 = vmatpush.msra.mxu2 %v6507_v47  ;;  %2365 = vmatpush.msra.mxu3 %v6508_v26 }
 0x6af   :  { %2385 = vmatpush.msrb.mxu0 %v6509_v32 }
 0x6b0   :  { %2346 = vmatpush.msra.mxu2 %v6510_v49  ;;  %2366 = vmatpush.msra.mxu3 %v6511_v58 }
 0x6b1   :  { %2386 = vmatpush.msrb.mxu0 %v6512_v22 }
 0x6b2   :  { %2347 = vmatpush.msra.mxu2 %v6513_v4  ;;  %2367 = vmatpush.msra.mxu3 %v6514_v53 }
 0x6b3   :  { %2387 = vmatpush.msrb.mxu0 %v6515_v20 }
 0x6b4   :  { %2348 = vmatpush.msra.mxu2 %v6516_v39  ;;  %2368 = vmatpush.msra.mxu3 %v6517_v43  ;;  %v6555_v39 = vld [vmem:[#allocation24_spill] sm:$0xff] }
 0x6b5   :  { %2388 = vmatpush.msrb.mxu0 %v6518_v8 }
 0x6b6   :  { %2349 = vmatpush.msra.mxu2 %v6519_v51  ;;  %2369 = vmatpush.msra.mxu3 %v6520_v3  ;;  %v6556_v3 = vld [vmem:[#allocation29_spill] sm:$0xff] }
 0x6b7   :  { %2389 = vmatpush.msrb.mxu0 %v6521_v18 }
 0x6b8   :  { %2350 = vmatpush.msra.mxu2 %v6522_v31  ;;  %2370 = vmatpush.msra.mxu3 %v6523_v36 }
 0x6b9   :  { %2390 = vmatpush.msrb.mxu0 %v6524_v38 }
 0x6ba   :  { %2351 = vmatpush.msra.mxu2 %v6525_v34  ;;  %2371 = vmatpush.msra.mxu3 %v6526_v61 }
 0x6bb   :  { %2391 = vmatpush.msrb.mxu0 %v6527_v52 }
 0x6bc   :  { %2352 = vmatpush.msra.mxu2 %v6528_v44  ;;  %2372 = vmatpush.msra.mxu3 %v6529_v27 }
 0x6bd   :  { %2392 = vmatpush.msrb.mxu0 %v6530_v57 }
 0x6be   :  { %2353 = vmatpush.msra.mxu2 %v6531_v9  ;;  %2373 = vmatpush.msra.mxu3 %v6532_v7 }
 0x6bf   :  { %2393 = vmatpush.msrb.mxu0 %v6533_v42 }
 0x6c0   :  { %2354 = vmatpush.msra.mxu2 %v6534_v1  ;;  %2374 = vmatpush.msra.mxu3 %v6535_v56 }
 0x6c1   :  { %2394 = vmatpush.msrb.mxu0 %v6536_v60 }
 0x6c2   :  { %2355 = vmatpush.msra.mxu2 %v6537_v29  ;;  %2375 = vmatpush.msra.mxu3 %v6538_v5 }
 0x6c3   :  { %2395 = vmatpush.msrb.mxu0 %v6539_v54 }
 0x6c4   :  { %2356 = vmatpush.msra.mxu2 %v6540_v59  ;;  %2376 = vmatpush.msra.mxu3 %v6541_v63 }
 0x6c5   :  { %2396 = vmatpush.msrb.mxu0 %v6542_v10  ;;  %v6557_v10 = vld [vmem:[#allocation39_spill] sm:$0xff] }
 0x6c6   :  { %2357 = vmatpush.msra.mxu2 %v6543_v13  ;;  %2377 = vmatpush.msra.mxu3 %v6544_v16  ;;  %v6558_v16 = vld [vmem:[#allocation82_spill] sm:$0xff] }
 0x6c7   :  { %2397 = vmatpush.msrb.mxu0 %v6545_v19 }
 0x6c8   :  { %2358 = vmatpush.msra.mxu2 %v6546_v62  ;;  %2378 = vmatpush.msra.mxu3 %v6547_v2 }
 0x6c9   :  { %2398 = vmatpush.msrb.mxu0 %v6548_v24 }
 0x6ca   :  { %2359 = vmatpush.msra.mxu2 %v6549_v12  ;;  %2379 = vmatpush.msra.mxu3 %v5199_v23 }
 0x6cb   :  { %2399 = vmatpush.msrb.mxu0 %v6550_v35 }
 0x6cc   :  { %2360 = vmatpush.msra.mxu2 %v6551_v15  ;;  %2380 = vmatpush.msra.mxu3 %v6552_v21 }
 0x6cd   :  { %2400 = vmatpush.msrb.mxu0 %v5214_v46 }
 0x72a   :  { %v2034_v58 = vpop.f32.mrf.mxu1  ;;  %v2014_v4 = vpop.f32.mrf.mxu0 }
 0x72b   :  { %v2035_v43 = vadd.f32 %v2034_v58, %v6555_v39  ;;  %v2015_v18 = vadd.f32 %v2014_v4, %v6556_v3 }
 0x72f   :  { %v1974_v30 = vpop.f32.mrf.mxu2  ;;  %v1994_v14 = vpop.f32.mrf.mxu3 }
 0x730   :  { %v1975_v33 = vadd.f32 %v1974_v30, %v6553_v55  ;;  %v1995_v11 = vadd.f32 %v1994_v14, %v6554_v37 }
 0x732   :  { %v3308_v40 = vmul.f32 -1.442695, %v1975_v33  ;;  %v3309_v45 = vmul.f32 -1.442695, %v1995_v11 }
 0x734   :  { %3430 = vpow2.f32 %v3308_v40 }
 0x735   :  { %3432 = vpow2.f32 %v3309_v45 }
 0x73a   :  { %v3431_v0 = vpop.eup %3430 }
 0x73b   :  { %v3433_v23 = vpop.eup %3432  ;;  %v2040_v48 = vadd.f32 1.0, %v3431_v0 }
 0x73c   :  { %v2059_v17 = vadd.f32 1.0, %v3433_v23 }
 0x73d   :  { %3434 = vrcp.f32 %v2040_v48  ;;  %v2052_v46 = vand.u32 2147483648, %v2040_v48  ;;  %v2050_v49 = vand.u32 2147483647, %v2040_v48  ;;  %vm2046_vm9 = vweird.f32 %v2040_v48 }
 0x73e   :  { %3436 = vrcp.f32 %v2059_v17  ;;  %v2071_v44 = vand.u32 2147483648, %v2059_v17  ;;  %vm2065_vm13 = vweird.f32 %v2059_v17  ;;  %v2069_v27 = vand.u32 2147483647, %v2059_v17 }
 0x73f   :  { %v2053_v53 = vor.u32 1.1754944e-38, %v2052_v46  ;;  %vm2051_vm11 = vcmp.eq.f32.partialorder %v2050_v49, 8.507059e+37 }
 0x740   :  { %v2072_v42 = vor.u32 1.1754944e-38, %v2071_v44  ;;  %vm2070_vm15 = vcmp.eq.f32.partialorder %v2069_v27, 8.507059e+37  ;;  %v5381_v44 = vld [vmem:[#allocation11 + $0x150] sm:$0xff]  ;;  %v5383_v27 = vld [vmem:[#allocation11 + $0x158] sm:$0xff] }
 0x743   :  { %v3435_v50 = vpop.eup %3434 }
 0x744   :  { %v2042_v28 = vmul.f32 %v3435_v50, %v2040_v48  ;;  %v3437_v26 = vpop.eup %3436  ;;  %vm2047_vm8 = vweird.f32 %v3435_v50 }
 0x745   :  { %vm2048_vm10 = vmor %vm2046_vm9, %vm2047_vm8  ;;  %v2061_v20 = vmul.f32 %v3437_v26, %v2059_v17  ;;  %vm2066_vm12 = vweird.f32 %v3437_v26 }
 0x746   :  { %v2043_v47 = vsub.f32 1.0, %v2042_v28  ;;  %vm2067_vm14 = vmor %vm2065_vm13, %vm2066_vm12 }
 0x747   :  { %v2062_v36 = vsub.f32 1.0, %v2061_v20 }
 0x748   :  { %v2044_v32 = vmul.f32 %v3435_v50, %v2043_v47 }
 0x749   :  { %v2063_v34 = vmul.f32 %v3437_v26, %v2062_v36 }
 0x74a   :  { %v2045_v22 = vadd.f32 %v3435_v50, %v2044_v32 }
 0x74b   :  { %v2064_v61 = vadd.f32 %v3437_v26, %v2063_v34  ;;  %v5372_v34 = vld [vmem:[#allocation11 + $0x168] sm:$0xff] }
 0x74c   :  { %v2049_v8 = vsel %vm2048_vm10, %v3435_v50, %v2045_v22  ;;  %2504 = vmatpush.msrb.mxu1 %v5372_v34 }
 0x74d   :  { %v2054_v51 = vsel %vm2051_vm11, %v2053_v53, %v2049_v8  ;;  %v2068_v9 = vsel %vm2067_vm14, %v3437_v26, %v2064_v61  ;;  %v5374_v61 = vld [vmem:[#allocation11 + $0x170] sm:$0xff] }
 0x74e   :  { %v2075_v31 = vmul.f32 %v2054_v51, %v2035_v43  ;;  %v2073_v56 = vsel %vm2070_vm15, %v2072_v42, %v2068_v9  ;;  %2505 = vmatpush.msrb.mxu1 %v5381_v44  ;;  %v5390_v9 = vld [vmem:[#allocation11 + $0x138] sm:$0xff]  ;;  %v5394_v42 = vld [vmem:[#allocation11 + $0x148] sm:$0xff] }
 0x750   :  { %v2076_v38 = vadd.f32 %v2075_v31, %v2015_v18  ;;  %2506 = vmatpush.msrb.mxu1 %v5390_v9 }
 0x752   :  { %3438 = vtanh.f32 %v2076_v38 }
 0x758   :  { %v3439_v52 = vpop.eup %3438 }
 0x759   :  { %v2079_v57 = vrot.slane %v3439_v52, 4 }
 0x75b   :  { %v2081_v7 = vsub.f32 %v5297_v25, %v2079_v57  ;;  %v5385_v57 = vld [vmem:[#allocation11 + $0x160] sm:$0xff] }
 0x75d   :  { %v2083_v1 = vrot.slane %v2081_v7, 4  ;;  %v5392_v7 = vld [vmem:[#allocation11 + $0x140] sm:$0xff] }
 0x75f   :  { %v2085_v60 = vmul.f32 %v2083_v1, %v2073_v56  ;;  %v5399_v1 = vld [vmem:[#allocation11 + $0x120] sm:$0xff]  ;;  %v5401_v56 = vld [vmem:[#allocation11 + $0x128] sm:$0xff] }
 0x760   :  { %2507 = vmatpush.msrb.mxu1 %v5399_v1 }
 0x761   :  { %v2086_v29 = vadd.f32 %v3439_v52, %v2085_v60  ;;  %v5376_v52 = vld [vmem:[#allocation11 + $0x178] sm:$0xff]  ;;  %v5403_v60 = vld [vmem:[#allocation11 + $0x130] sm:$0xff] }
 0x763   :  { %2087 = vst [vmem:[#allocation2 + $0x4] sm:$0x1] %v2086_v29  ;;  %2152 = vmatmul.f32.vlgmr.msrb.gmra.mxu2 %v2086_v29  ;;  %2172 = vmatmul.f32.vlgmr.msrb.gmra.mxu3 %v2086_v29 }
 0x764   :  { %2192 = vmatmul.f32.vlgmr.msra.gmra.mxu0 %v2086_v29  ;;  %2524 = vmatpush.msrb.mxu2 %v5374_v61 }
 0x765   :  { %2544 = vmatpush.msrb.mxu3 %v5376_v52 }
 0x766   :  { %2525 = vmatpush.msrb.mxu2 %v5383_v27 }
 0x767   :  { %2545 = vmatpush.msrb.mxu3 %v5385_v57 }
 0x768   :  { %2526 = vmatpush.msrb.mxu2 %v5392_v7 }
 0x769   :  { %2546 = vmatpush.msrb.mxu3 %v5394_v42 }
 0x76a   :  { %2527 = vmatpush.msrb.mxu2 %v5401_v56 }
 0x76b   :  { %2547 = vmatpush.msrb.mxu3 %v5403_v60 }
 0x7e1   :  { %v2193_v30 = vpop.f32.mrf.mxu0 }
 0x7e2   :  { %v2242_v40 = vadd.f32 %v5231_v41, %v2193_v30  ;;  %v5445_v30 = vld [vmem:[#allocation11 + $0xa8] sm:$0xff] }
 0x7e4   :  { %v2244_v50 = vrot.slane %v2242_v40, 3 }
 0x7e6   :  { %v2153_v5 = vpop.f32.mrf.mxu2  ;;  %v2173_v54 = vpop.f32.mrf.mxu3 }
 0x7e7   :  { %v2197_v59 = vrot.slane %v2153_v5, 3  ;;  %v2220_v63 = vrot.slane %v2173_v54, 3  ;;  %v5410_v5 = vld [vmem:[#allocation11 + $0x110] sm:$0xff]  ;;  %v5412_v54 = vld [vmem:[#allocation11 + $0x118] sm:$0xff] }
 0x7e8   :  { %2528 = vmatpush.msrb.mxu2 %v5410_v5  ;;  %2548 = vmatpush.msrb.mxu3 %v5412_v54 }
 0x7e9   :  { %v2199_v13 = vadd.f32 %v2197_v59, %v6557_v10  ;;  %v2222_v19 = vadd.f32 %v2220_v63, %v6558_v16  ;;  %v5417_v59 = vld [vmem:[#allocation11 + $0xf0] sm:$0xff]  ;;  %v5419_v63 = vld [vmem:[#allocation11 + $0xf8] sm:$0xff] }
 0x7ea   :  { %2529 = vmatpush.msrb.mxu2 %v5419_v63 }
 0x7eb   :  { %v3310_v62 = vmul.f32 -1.442695, %v2199_v13  ;;  %v3311_v25 = vmul.f32 -1.442695, %v2222_v19  ;;  %v5421_v13 = vld [vmem:[#allocation11 + $0x100] sm:$0xff] }
 0x7ec   :  { %2549 = vmatpush.msrb.mxu3 %v5421_v13 }
 0x7ed   :  { %3440 = vpow2.f32 %v3310_v62 }
 0x7ee   :  { %3442 = vpow2.f32 %v3311_v25  ;;  %v5427_v25 = vld [vmem:[#allocation11 + $0xd8] sm:$0xff] }
 0x7f3   :  { %v3441_v2 = vpop.eup %3440 }
 0x7f4   :  { %v3443_v24 = vpop.eup %3442  ;;  %v2203_v12 = vadd.f32 1.0, %v3441_v2  ;;  %v5429_v2 = vld [vmem:[#allocation11 + $0xe0] sm:$0xff] }
 0x7f5   :  { %v2226_v35 = vadd.f32 1.0, %v3443_v24  ;;  %v5431_v24 = vld [vmem:[#allocation11 + $0xe8] sm:$0xff]  ;;  %2530 = vmatpush.msrb.mxu2 %v5429_v2 }
 0x7f6   :  { %3444 = vrcp.f32 %v2203_v12  ;;  %v2215_v33 = vand.u32 2147483648, %v2203_v12  ;;  %v2213_v0 = vand.u32 2147483647, %v2203_v12  ;;  %vm2209_vm1 = vweird.f32 %v2203_v12  ;;  %2550 = vmatpush.msrb.mxu3 %v5431_v24 }
 0x7f7   :  { %3446 = vrcp.f32 %v2226_v35  ;;  %v2238_v22 = vand.u32 2147483648, %v2226_v35  ;;  %vm2232_vm5 = vweird.f32 %v2226_v35  ;;  %v2236_v4 = vand.u32 2147483647, %v2226_v35 }
 0x7f8   :  { %v2216_v48 = vor.u32 1.1754944e-38, %v2215_v33  ;;  %vm2214_vm3 = vcmp.eq.f32.partialorder %v2213_v0, 8.507059e+37  ;;  %v5449_v33 = vld [vmem:[#allocation11 + $0xb8] sm:$0xff] }
 0x7f9   :  { %v2239_v8 = vor.u32 1.1754944e-38, %v2238_v22  ;;  %vm2237_vm7 = vcmp.eq.f32.partialorder %v2236_v4, 8.507059e+37  ;;  %v5457_v0 = vld [vmem:[#allocation11 + $0x98] sm:$0xff]  ;;  %v5491_v4 = vld [vmem:[#allocation11 + $0x30] sm:$0xff] }
 0x7fa   :  { %v5486_v22 = vld [vmem:[#allocation11 + $0x58] sm:$0xff]  ;;  %6563 = vst [vmem:[#allocation31_spill] sm:$0xff] %v5491_v4 }
 0x7fb   :  { %6562 = vst [vmem:[#allocation25_spill] sm:$0xff] %v5486_v22 }
 0x7fc   :  { %v3445_v15 = vpop.eup %3444 }
 0x7fd   :  { %v2205_v21 = vmul.f32 %v3445_v15, %v2203_v12  ;;  %v3447_v11 = vpop.eup %3446  ;;  %vm2210_vm0 = vweird.f32 %v3445_v15 }
 0x7fe   :  { %vm2211_vm2 = vmor %vm2209_vm1, %vm2210_vm0  ;;  %v2228_v17 = vmul.f32 %v3447_v11, %v2226_v35  ;;  %vm2233_vm4 = vweird.f32 %v3447_v11  ;;  %v5436_v35 = vld [vmem:[#allocation11 + $0xc0] sm:$0xff] }
 0x7ff   :  { %v2206_v14 = vsub.f32 1.0, %v2205_v21  ;;  %vm2234_vm6 = vmor %vm2232_vm5, %vm2233_vm4  ;;  %v5440_v21 = vld [vmem:[#allocation11 + $0xd0] sm:$0xff] }
 0x800   :  { %v2229_v26 = vsub.f32 1.0, %v2228_v17  ;;  %2551 = vmatpush.msrb.mxu3 %v5440_v21  ;;  %v5464_v17 = vld [vmem:[#allocation11 + $0x78] sm:$0xff] }
 0x801   :  { %v2207_v45 = vmul.f32 %v3445_v15, %v2206_v14  ;;  %v5447_v14 = vld [vmem:[#allocation11 + $0xb0] sm:$0xff] }
 0x802   :  { %v2230_v49 = vmul.f32 %v3447_v11, %v2229_v26  ;;  %2552 = vmatpush.msrb.mxu3 %v5449_v33  ;;  %v5475_v26 = vld [vmem:[#allocation11 + $0x68] sm:$0xff] }
 0x803   :  { %v2208_v23 = vadd.f32 %v3445_v15, %v2207_v45  ;;  %v5455_v45 = vld [vmem:[#allocation11 + $0x90] sm:$0xff] }
 0x804   :  { %v2231_v58 = vadd.f32 %v3447_v11, %v2230_v49 }
 0x805   :  { %v2212_v28 = vsel %vm2211_vm2, %v3445_v15, %v2208_v23  ;;  %v5438_v15 = vld [vmem:[#allocation11 + $0xc8] sm:$0xff]  ;;  %v5459_v23 = vld [vmem:[#allocation11 + $0xa0] sm:$0xff] }
 0x806   :  { %v2217_v47 = vsel %vm2214_vm3, %v2216_v48, %v2212_v28  ;;  %v2235_v20 = vsel %vm2234_vm6, %v3447_v11, %v2231_v58  ;;  %2531 = vmatpush.msrb.mxu2 %v5438_v15  ;;  %2553 = vmatpush.msrb.mxu3 %v5459_v23  ;;  %v5468_v28 = vld [vmem:[#allocation11 + $0x88] sm:$0xff] }
 0x807   :  { %v2246_v46 = vmul.f32 %v2244_v50, %v2217_v47  ;;  %v2240_v18 = vsel %vm2237_vm7, %v2239_v8, %v2235_v20  ;;  %v5466_v50 = vld [vmem:[#allocation11 + $0x80] sm:$0xff]  ;;  %v5482_v58 = vld [vmem:[#allocation11 + $0x48] sm:$0xff]  ;;  %v5500_v8 = vld [vmem:[#allocation11 + $0x18] sm:$0xff] }
 0x808   :  { %2532 = vmatpush.msrb.mxu2 %v5447_v14  ;;  %2554 = vmatpush.msrb.mxu3 %v5468_v28  ;;  %6560 = vst [vmem:[#allocation32_spill] sm:$0xff] %v5482_v58  ;;  %v5495_v20 = vld [vmem:[#allocation11 + $0x40] sm:$0xff] }
 0x809   :  { %v2247_v32 = vadd.f32 %v2246_v46, %v4233_v6  ;;  %v5473_v46 = vld [vmem:[#allocation11 + $0x60] sm:$0xff]  ;;  %6565 = vst [vmem:[#allocation80_spill] sm:$0xff] %v5495_v20 }
 0x80a   :  { %2533 = vmatpush.msrb.mxu2 %v5457_v0  ;;  %6566 = vst [vmem:[#allocation77_spill] sm:$0xff] %v5500_v8 }
 0x80b   :  { %3448 = vtanh.f32 %v2247_v32  ;;  %v5477_v32 = vld [vmem:[#allocation11 + $0x70] sm:$0xff] }
 0x80c   :  { %2534 = vmatpush.msrb.mxu2 %v5466_v50  ;;  %6559 = vst [vmem:[#allocation28_spill] sm:$0xff] %v5477_v32  ;;  %2555 = vmatpush.msrb.mxu3 %v5477_v32 }
 0x80e   :  { %2535 = vmatpush.msrb.mxu2 %v5475_v26  ;;  %2556 = vmatpush.msrb.mxu3 %v5486_v22 }
 0x810   :  { %2557 = vmatpush.msrb.mxu3 %v5495_v20 }
 0x811   :  { %v3449_v41 = vpop.eup %3448 }
 0x812   :  { %v2250_v53 = vrot.slane %v3449_v41, 5 }
 0x814   :  { %v2252_v43 = vsub.f32 %v2086_v29, %v2250_v53  ;;  %v5408_v29 = vld [vmem:[#allocation11 + $0x108] sm:$0xff]  ;;  %v5493_v53 = vld [vmem:[#allocation11 + $0x38] sm:$0xff] }
 0x815   :  { %2508 = vmatpush.msrb.mxu1 %v5408_v29  ;;  %6564 = vst [vmem:[#allocation34_spill] sm:$0xff] %v5493_v53 }
 0x816   :  { %v2254_v51 = vrot.slane %v2252_v43, 3 }
 0x817   :  { %2509 = vmatpush.msrb.mxu1 %v5417_v59 }
 0x818   :  { %v2256_v31 = vmul.f32 %v2254_v51, %v2240_v18  ;;  %v5502_v51 = vld [vmem:[#allocation11 + $0x20] sm:$0xff]  ;;  %v5504_v18 = vld [vmem:[#allocation11 + $0x28] sm:$0xff] }
 0x819   :  { %2510 = vmatpush.msrb.mxu1 %v5427_v25  ;;  %6567 = vst [vmem:[#allocation79_spill] sm:$0xff] %v5502_v51  ;;  %2558 = vmatpush.msrb.mxu3 %v5504_v18 }
 0x81a   :  { %v5369_v36 = vadd.f32 %v3449_v41, %v2256_v31  ;;  %v5484_v41 = vld [vmem:[#allocation11 + $0x50] sm:$0xff]  ;;  %6568 = vst [vmem:[#allocation26_spill] sm:$0xff] %v5504_v18 }
 0x81b   :  { %2511 = vmatpush.msrb.mxu1 %v5436_v35  ;;  %6561 = vst [vmem:[#allocation76_spill] sm:$0xff] %v5484_v41  ;;  %2536 = vmatpush.msrb.mxu2 %v5484_v41 }
 0x81c   :  { %v2323_v38 = vrot.slane %v5369_v36, 5 }
 0x81d   :  { %2512 = vmatpush.msrb.mxu1 %v5445_v30  ;;  %2537 = vmatpush.msrb.mxu2 %v5493_v53 }
 0x81e   :  { %2341 = vmatmul.f32.vlgmr.msra.gmra.mxu1 %v2323_v38  ;;  %2361 = vmatmul.f32.vlgmr.msra.gmra.mxu2 %v2323_v38 }
 0x81f   :  { %2381 = vmatmul.f32.vlgmr.msra.gmra.mxu3 %v2323_v38  ;;  %2401 = vmatmul.f32.vlgmr.msrb.gmra.mxu0 %v2323_v38  ;;  %v5509_v38 = vld [vmem:[#allocation11] sm:$0xff] }
 0x820   :  { %2513 = vmatpush.msrb.mxu1 %v5455_v45  ;;  %2538 = vmatpush.msrb.mxu2 %v5502_v51  ;;  %6569 = vst [vmem:[#allocation33_spill] sm:$0xff] %v5509_v38 }
 0x822   :  { %2514 = vmatpush.msrb.mxu1 %v5464_v17 }
 0x824   :  { %2515 = vmatpush.msrb.mxu1 %v5473_v46 }
 0x826   :  { %2516 = vmatpush.msrb.mxu1 %v5482_v58 }
 0x828   :  { %2517 = vmatpush.msrb.mxu1 %v5491_v4 }
 0x82a   :  { %2518 = vmatpush.msrb.mxu1 %v5500_v8 }
 0x82c   :  { %2519 = vmatpush.msrb.mxu1 %v5509_v38 }
 0x89b   :  { %v2342_v19 = vpop.f32.mrf.mxu1 }
 0x89c   :  { %v2343_v62 = vadd.f32 %v2342_v19, %v6553_v55  ;;  %v5511_v19 = vld [vmem:[#allocation11 + $0x8] sm:$0xff]  ;;  %v2402_v55 = vpop.f32.mrf.mxu0 }
 0x89d   :  { %6570 = vst [vmem:[#allocation84_spill] sm:$0xff] %v5511_v19  ;;  %2539 = vmatpush.msrb.mxu2 %v5511_v19  ;;  %v2403_v38 = vadd.f32 %v2402_v55, %v6555_v39  ;;  %v5592_v39 = vld [vmem:[#allocation12 + $0x150] sm:$0xff] }
 0x89e   :  { %v3312_v12 = vmul.f32 -1.442695, %v2343_v62  ;;  %v5513_v62 = vld [vmem:[#allocation11 + $0x10] sm:$0xff]  ;;  %6588 = vst [vmem:[#allocation50_spill] sm:$0xff] %v5592_v39 }
 0x89f   :  { %6571 = vst [vmem:[#allocation36_spill] sm:$0xff] %v5513_v62  ;;  %2559 = vmatpush.msrb.mxu3 %v5513_v62 }
 0x8a0   :  { %3450 = vpow2.f32 %v3312_v12 }
 0x8a1   :  { %v2362_v11 = vpop.f32.mrf.mxu2 }
 0x8a2   :  { %v2363_v40 = vadd.f32 %v2362_v11, %v6554_v37  ;;  %v2382_v20 = vpop.f32.mrf.mxu3 }
 0x8a4   :  { %v3313_v48 = vmul.f32 -1.442695, %v2363_v40 }
 0x8a6   :  { %v3451_v47 = vpop.eup %3450  ;;  %3452 = vpow2.f32 %v3313_v48 }
 0x8a7   :  { %v2408_v49 = vadd.f32 1.0, %v3451_v47 }
 0x8a9   :  { %3454 = vrcp.f32 %v2408_v49  ;;  %v2420_v48 = vand.u32 2147483648, %v2408_v49  ;;  %vm2414_vm9 = vweird.f32 %v2408_v49 }
 0x8ab   :  { %v2421_v51 = vor.u32 1.1754944e-38, %v2420_v48 }
 0x8ac   :  { %v3453_v43 = vpop.eup %3452 }
 0x8ad   :  { %v2427_v31 = vadd.f32 1.0, %v3453_v43  ;;  %v2418_v43 = vand.u32 2147483647, %v2408_v49 }
 0x8af   :  { %v3455_v12 = vpop.eup %3454  ;;  %3456 = vrcp.f32 %v2427_v31  ;;  %vm2419_vm11 = vcmp.eq.f32.partialorder %v2418_v43, 8.507059e+37  ;;  %vm2433_vm13 = vweird.f32 %v2427_v31  ;;  %v2437_v48 = vand.u32 2147483647, %v2427_v31  ;;  %v5563_v43 = vld [vmem:[#allocation12 + $0x180] sm:$0xff] }
 0x8b0   :  { %v2410_v11 = vmul.f32 %v3455_v12, %v2408_v49  ;;  %vm2415_vm8 = vweird.f32 %v3455_v12  ;;  %v2439_v49 = vand.u32 2147483648, %v2427_v31 }
 0x8b1   :  { %vm2416_vm10 = vmor %vm2414_vm9, %vm2415_vm8  ;;  %vm2438_vm15 = vcmp.eq.f32.partialorder %v2437_v48, 8.507059e+37 }
 0x8b2   :  { %v2411_v40 = vsub.f32 1.0, %v2410_v11  ;;  %v2383_v11 = vadd.f32 %v2382_v20, %v6556_v3  ;;  %v5590_v3 = vld [vmem:[#allocation12 + $0x148] sm:$0xff] }
 0x8b3   :  { %6587 = vst [vmem:[#allocation49_spill] sm:$0xff] %v5590_v3 }
 0x8b4   :  { %v2412_v47 = vmul.f32 %v3455_v12, %v2411_v40 }
 0x8b5   :  { %v3457_v37 = vpop.eup %3456 }
 0x8b6   :  { %v2413_v18 = vadd.f32 %v3455_v12, %v2412_v47  ;;  %v2429_v8 = vmul.f32 %v3457_v37, %v2427_v31  ;;  %vm2434_vm12 = vweird.f32 %v3457_v37  ;;  %v5547_v31 = vld [vmem:[#allocation12 + $0x1d8] sm:$0xff] }
 0x8b7   :  { %vm2435_vm14 = vmor %vm2433_vm13, %vm2434_vm12  ;;  %6577 = vst [vmem:[#allocation38_spill] sm:$0xff] %v5547_v31 }
 0x8b8   :  { %v2417_v53 = vsel %vm2416_vm10, %v3455_v12, %v2413_v18  ;;  %v2430_v62 = vsub.f32 1.0, %v2429_v8  ;;  %v2440_v18 = vor.u32 1.1754944e-38, %v2439_v49  ;;  %v5559_v12 = vld [vmem:[#allocation12 + $0x1b8] sm:$0xff] }
 0x8b9   :  { %v2422_v19 = vsel %vm2419_vm11, %v2421_v51, %v2417_v53  ;;  %6580 = vst [vmem:[#allocation42_spill] sm:$0xff] %v5559_v12  ;;  %v5571_v49 = vld [vmem:[#allocation12 + $0x198] sm:$0xff] }
 0x8ba   :  { %v2443_v4 = vmul.f32 %v2422_v19, %v2403_v38  ;;  %v2431_v22 = vmul.f32 %v3457_v37, %v2430_v62  ;;  %v5551_v38 = vld [vmem:[#allocation12 + $0x1a0] sm:$0xff]  ;;  %v5553_v19 = vld [vmem:[#allocation12 + $0x1a8] sm:$0xff]  ;;  %v5555_v62 = vld [vmem:[#allocation12 + $0x1b0] sm:$0xff]  ;;  %6583 = vst [vmem:[#allocation45_spill] sm:$0xff] %v5571_v49 }
 0x8bb   :  { %6578 = vst [vmem:[#allocation40_spill] sm:$0xff] %v5553_v19 }
 0x8bc   :  { %v2444_v40 = vadd.f32 %v2443_v4, %v2383_v11  ;;  %v2432_v41 = vadd.f32 %v3457_v37, %v2431_v22  ;;  %v5527_v22 = vld [vmem:[#allocation12 + $0x1e0] sm:$0xff]  ;;  %v5543_v4 = vld [vmem:[#allocation12 + $0x1d0] sm:$0xff]  ;;  %6579 = vst [vmem:[#allocation41_spill] sm:$0xff] %v5555_v62  ;;  %v5565_v11 = vld [vmem:[#allocation12 + $0x188] sm:$0xff] }
 0x8bd   :  { %2693 = vmatpush.msra.mxu0 %v5527_v22  ;;  %6576 = vst [vmem:[#allocation37_spill] sm:$0xff] %v5543_v4 }
 0x8be   :  { %3458 = vtanh.f32 %v2444_v40  ;;  %v2436_v32 = vsel %vm2435_vm14, %v3457_v37, %v2432_v41  ;;  %v5529_v37 = vld [vmem:[#allocation12 + $0x1e8] sm:$0xff]  ;;  %6581 = vst [vmem:[#allocation43_spill] sm:$0xff] %v5565_v11  ;;  %v5567_v40 = vld [vmem:[#allocation12 + $0x190] sm:$0xff] }
 0x8bf   :  { %v2441_v51 = vsel %vm2438_vm15, %v2440_v18, %v2436_v32  ;;  %6572 = vst [vmem:[#allocation86_spill] sm:$0xff] %v5529_v37  ;;  %2713 = vmatpush.msra.mxu1 %v5529_v37  ;;  %v5535_v32 = vld [vmem:[#allocation12 + $0x1f8] sm:$0xff]  ;;  %v5541_v41 = vld [vmem:[#allocation12 + $0x1c8] sm:$0xff] }
 0x8c0   :  { %6574 = vst [vmem:[#allocation27_spill] sm:$0xff] %v5535_v32  ;;  %2753 = vmatpush.msra.mxu3 %v5535_v32  ;;  %v5577_v18 = vld [vmem:[#allocation12 + $0x168] sm:$0xff] }
 0x8c1   :  { %6575 = vst [vmem:[#allocation35_spill] sm:$0xff] %v5541_v41  ;;  %2714 = vmatpush.msra.mxu1 %v5541_v41  ;;  %v5692_v41 = vld [vmem:[#allocation12 + $0x58] sm:$0xff] }
 0x8c2   :  { %2754 = vmatpush.msra.mxu3 %v5547_v31  ;;  %6582 = vst [vmem:[#allocation44_spill] sm:$0xff] %v5567_v40  ;;  %v5665_v31 = vld [vmem:[#allocation12 + $0x90] sm:$0xff] }
 0x8c3   :  { %2715 = vmatpush.msra.mxu1 %v5553_v19  ;;  %6584 = vst [vmem:[#allocation46_spill] sm:$0xff] %v5577_v18 }
 0x8c4   :  { %v3459_v47 = vpop.eup %3458  ;;  %2755 = vmatpush.msra.mxu3 %v5559_v12  ;;  %v5649_v12 = vld [vmem:[#allocation12 + $0xa8] sm:$0xff]  ;;  %6606 = vst [vmem:[#allocation68_spill] sm:$0xff] %v5665_v31 }
 0x8c5   :  { %v2447_v58 = vrot.slane %v3459_v47, 3  ;;  %2716 = vmatpush.msra.mxu1 %v5565_v11  ;;  %v5620_v11 = vld [vmem:[#allocation12 + $0x118] sm:$0xff]  ;;  %6602 = vst [vmem:[#allocation64_spill] sm:$0xff] %v5649_v12 }
 0x8c6   :  { %2756 = vmatpush.msra.mxu3 %v5571_v49  ;;  %v5596_v49 = vld [vmem:[#allocation12 + $0x158] sm:$0xff]  ;;  %6595 = vst [vmem:[#allocation57_spill] sm:$0xff] %v5620_v11 }
 0x8c7   :  { %v2449_v55 = vsub.f32 %v5369_v36, %v2447_v58  ;;  %v5531_v36 = vld [vmem:[#allocation12 + $0x1f0] sm:$0xff]  ;;  %v5539_v58 = vld [vmem:[#allocation12 + $0x1c0] sm:$0xff]  ;;  %2717 = vmatpush.msra.mxu1 %v5577_v18  ;;  %6589 = vst [vmem:[#allocation51_spill] sm:$0xff] %v5596_v49 }
 0x8c8   :  { %6573 = vst [vmem:[#allocation85_spill] sm:$0xff] %v5531_v36  ;;  %2733 = vmatpush.msra.mxu2 %v5531_v36  ;;  %2694 = vmatpush.msra.mxu0 %v5539_v58  ;;  %v5706_v36 = vld [vmem:[#allocation12 + $0x38] sm:$0xff] }
 0x8c9   :  { %v2451_v53 = vrot.slane %v2449_v55, 5  ;;  %v5575_v55 = vld [vmem:[#allocation12 + $0x160] sm:$0xff]  ;;  %2718 = vmatpush.msra.mxu1 %v5590_v3  ;;  %6614 = vst [vmem:[#allocation81_spill] sm:$0xff] %v5692_v41 }
 0x8ca   :  { %2734 = vmatpush.msra.mxu2 %v5543_v4  ;;  %2695 = vmatpush.msra.mxu0 %v5551_v38  ;;  %v5690_v4 = vld [vmem:[#allocation12 + $0x50] sm:$0xff]  ;;  %6618 = vst [vmem:[#allocation89_spill] sm:$0xff] %v5706_v36 }
 0x8cb   :  { %v2453_v20 = vmul.f32 %v2451_v53, %v2441_v51  ;;  %v5579_v53 = vld [vmem:[#allocation12 + $0x170] sm:$0xff]  ;;  %v5583_v51 = vld [vmem:[#allocation12 + $0x178] sm:$0xff]  ;;  %6613 = vst [vmem:[#allocation78_spill] sm:$0xff] %v5690_v4 }
 0x8cc   :  { %2735 = vmatpush.msra.mxu2 %v5555_v62  ;;  %2696 = vmatpush.msra.mxu0 %v5563_v43  ;;  %6585 = vst [vmem:[#allocation47_spill] sm:$0xff] %v5579_v53  ;;  %v5657_v62 = vld [vmem:[#allocation12 + $0x80] sm:$0xff] }
 0x8cd   :  { %v5521_v8 = vadd.f32 %v3459_v47, %v2453_v20  ;;  %6586 = vst [vmem:[#allocation48_spill] sm:$0xff] %v5583_v51  ;;  %2757 = vmatpush.msra.mxu3 %v5583_v51  ;;  %v5604_v51 = vld [vmem:[#allocation12 + $0x130] sm:$0xff] }
 0x8ce   :  { %2736 = vmatpush.msra.mxu2 %v5567_v40  ;;  %2697 = vmatpush.msra.mxu0 %v5575_v55  ;;  %6591 = vst [vmem:[#allocation53_spill] sm:$0xff] %v5604_v51  ;;  %v5608_v40 = vld [vmem:[#allocation12 + $0x138] sm:$0xff] }
 0x8cf   :  { %2455 = vst [vmem:[#allocation2 + $0x5] sm:$0x1] %v5521_v8  ;;  %2520 = vmatmul.f32.vlgmr.msrb.gmra.mxu1 %v5521_v8  ;;  %2540 = vmatmul.f32.vlgmr.msrb.gmra.mxu2 %v5521_v8 }
 0x8d0   :  { %2560 = vmatmul.f32.vlgmr.msrb.gmra.mxu3 %v5521_v8  ;;  %2737 = vmatpush.msra.mxu2 %v5579_v53  ;;  %6592 = vst [vmem:[#allocation54_spill] sm:$0xff] %v5608_v40 }
 0x8d1   :  { %2758 = vmatpush.msra.mxu3 %v5596_v49  ;;  %v5614_v49 = vld [vmem:[#allocation12 + $0x108] sm:$0xff] }
 0x8d2   :  { %2738 = vmatpush.msra.mxu2 %v5592_v39  ;;  %6593 = vst [vmem:[#allocation55_spill] sm:$0xff] %v5614_v49  ;;  %v5616_v39 = vld [vmem:[#allocation12 + $0x110] sm:$0xff] }
 0x8d3   :  { %2759 = vmatpush.msra.mxu3 %v5608_v40  ;;  %6594 = vst [vmem:[#allocation56_spill] sm:$0xff] %v5616_v39  ;;  %v5629_v40 = vld [vmem:[#allocation12 + $0xf0] sm:$0xff] }
 0x8d4   :  { %2739 = vmatpush.msra.mxu2 %v5604_v51  ;;  %6597 = vst [vmem:[#allocation59_spill] sm:$0xff] %v5629_v40  ;;  %v5633_v51 = vld [vmem:[#allocation12 + $0xf8] sm:$0xff] }
 0x8d5   :  { %2760 = vmatpush.msra.mxu3 %v5620_v11  ;;  %6598 = vst [vmem:[#allocation60_spill] sm:$0xff] %v5633_v51  ;;  %v5641_v11 = vld [vmem:[#allocation12 + $0xd0] sm:$0xff] }
 0x8d6   :  { %2740 = vmatpush.msra.mxu2 %v5616_v39  ;;  %6600 = vst [vmem:[#allocation62_spill] sm:$0xff] %v5641_v11  ;;  %v5645_v39 = vld [vmem:[#allocation12 + $0xd8] sm:$0xff] }
 0x8d7   :  { %2761 = vmatpush.msra.mxu3 %v5633_v51  ;;  %6601 = vst [vmem:[#allocation63_spill] sm:$0xff] %v5645_v39  ;;  %v5653_v51 = vld [vmem:[#allocation12 + $0xb0] sm:$0xff] }
 0x8d8   :  { %2741 = vmatpush.msra.mxu2 %v5629_v40  ;;  %6603 = vst [vmem:[#allocation65_spill] sm:$0xff] %v5653_v51  ;;  %v5655_v40 = vld [vmem:[#allocation12 + $0xb8] sm:$0xff] }
 0x8d9   :  { %2762 = vmatpush.msra.mxu3 %v5645_v39  ;;  %6604 = vst [vmem:[#allocation66_spill] sm:$0xff] %v5655_v40  ;;  %v5671_v39 = vld [vmem:[#allocation12 + $0x60] sm:$0xff] }
 0x8da   :  { %2742 = vmatpush.msra.mxu2 %v5641_v11  ;;  %v5673_v11 = vld [vmem:[#allocation12 + $0x68] sm:$0xff] }
 0x8db   :  { %2763 = vmatpush.msra.mxu3 %v5655_v40  ;;  %6608 = vst [vmem:[#allocation70_spill] sm:$0xff] %v5673_v11  ;;  %v5686_v40 = vld [vmem:[#allocation12 + $0x48] sm:$0xff] }
 0x8dc   :  { %2743 = vmatpush.msra.mxu2 %v5653_v51  ;;  %v5684_v51 = vld [vmem:[#allocation12 + $0x40] sm:$0xff]  ;;  %6612 = vst [vmem:[#allocation75_spill] sm:$0xff] %v5686_v40 }
 0x8dd   :  { %6611 = vst [vmem:[#allocation74_spill] sm:$0xff] %v5684_v51 }
 0x8de   :  { %2744 = vmatpush.msra.mxu2 %v5665_v31  ;;  %v5696_v31 = vld [vmem:[#allocation12 + $0x20] sm:$0xff] }
 0x8df   :  { %6615 = vst [vmem:[#allocation83_spill] sm:$0xff] %v5696_v31 }
 0x94c   :  { %v2521_v47 = vpop.f32.mrf.mxu1 }
 0x94d   :  { %v2565_v48 = vrot.slane %v2521_v47, 2  ;;  %v5588_v47 = vld [vmem:[#allocation12 + $0x140] sm:$0xff] }
 0x94e   :  { %2698 = vmatpush.msra.mxu0 %v5588_v47 }
 0x94f   :  { %v2567_v20 = vadd.f32 %v2565_v48, %v6557_v10  ;;  %v5600_v48 = vld [vmem:[#allocation12 + $0x120] sm:$0xff]  ;;  %v5602_v10 = vld [vmem:[#allocation12 + $0x128] sm:$0xff] }
 0x950   :  { %6590 = vst [vmem:[#allocation52_spill] sm:$0xff] %v5602_v10  ;;  %2699 = vmatpush.msra.mxu0 %v5600_v48  ;;  %2719 = vmatpush.msra.mxu1 %v5602_v10 }
 0x951   :  { %v3314_v18 = vmul.f32 -1.442695, %v2567_v20  ;;  %v5612_v20 = vld [vmem:[#allocation12 + $0x100] sm:$0xff] }
 0x952   :  { %v2541_v53 = vpop.f32.mrf.mxu2  ;;  %2700 = vmatpush.msra.mxu0 %v5612_v20  ;;  %2720 = vmatpush.msra.mxu1 %v5614_v49 }
 0x953   :  { %3460 = vpow2.f32 %v3314_v18  ;;  %v2588_v3 = vrot.slane %v2541_v53, 2  ;;  %v5625_v18 = vld [vmem:[#allocation12 + $0xe0] sm:$0xff]  ;;  %v5627_v53 = vld [vmem:[#allocation12 + $0xe8] sm:$0xff] }
 0x954   :  { %6596 = vst [vmem:[#allocation58_spill] sm:$0xff] %v5627_v53  ;;  %2701 = vmatpush.msra.mxu0 %v5625_v18  ;;  %2721 = vmatpush.msra.mxu1 %v5627_v53  ;;  %v5647_v53 = vld [vmem:[#allocation12 + $0xa0] sm:$0xff] }
 0x955   :  { %v2590_v10 = vadd.f32 %v2588_v3, %v6558_v16  ;;  %v5637_v3 = vld [vmem:[#allocation12 + $0xc0] sm:$0xff]  ;;  %v5639_v16 = vld [vmem:[#allocation12 + $0xc8] sm:$0xff] }
 0x956   :  { %6599 = vst [vmem:[#allocation61_spill] sm:$0xff] %v5639_v16  ;;  %2702 = vmatpush.msra.mxu0 %v5637_v3  ;;  %2722 = vmatpush.msra.mxu1 %v5639_v16  ;;  %v5663_v16 = vld [vmem:[#allocation12 + $0x88] sm:$0xff] }
 0x957   :  { %v3315_v49 = vmul.f32 -1.442695, %v2590_v10  ;;  %6605 = vst [vmem:[#allocation67_spill] sm:$0xff] %v5663_v16 }
 0x958   :  { %2703 = vmatpush.msra.mxu0 %v5647_v53  ;;  %2723 = vmatpush.msra.mxu1 %v5649_v12  ;;  %v5680_v12 = vld [vmem:[#allocation12 + $0x78] sm:$0xff] }
 0x959   :  { %v3461_v10 = vpop.eup %3460  ;;  %3462 = vpow2.f32 %v3315_v49  ;;  %v5667_v49 = vld [vmem:[#allocation12 + $0x98] sm:$0xff]  ;;  %6610 = vst [vmem:[#allocation73_spill] sm:$0xff] %v5680_v12 }
 0x95a   :  { %v5659_v19 = vadd.f32 1.0, %v3461_v10  ;;  %6607 = vst [vmem:[#allocation69_spill] sm:$0xff] %v5667_v49  ;;  %2704 = vmatpush.msra.mxu0 %v5657_v62  ;;  %2724 = vmatpush.msra.mxu1 %v5663_v16  ;;  %v5678_v10 = vld [vmem:[#allocation12 + $0x70] sm:$0xff] }
 0x95b   :  { %6609 = vst [vmem:[#allocation71_spill] sm:$0xff] %v5678_v10  ;;  %2764 = vmatpush.msra.mxu3 %v5667_v49  ;;  %2745 = vmatpush.msra.mxu2 %v5678_v10  ;;  %v5698_v49 = vld [vmem:[#allocation12 + $0x28] sm:$0xff]  ;;  %v5710_v10 = vld [vmem:[#allocation12] sm:$0xff] }
 0x95c   :  { %3464 = vrcp.f32 %v5659_v19  ;;  %2705 = vmatpush.msra.mxu0 %v5671_v39  ;;  %2725 = vmatpush.msra.mxu1 %v5673_v11  ;;  %6616 = vst [vmem:[#allocation87_spill] sm:$0xff] %v5698_v49  ;;  %v5704_v11 = vld [vmem:[#allocation12 + $0x30] sm:$0xff]  ;;  %vm2577_vm1 = vweird.f32 %v5659_v19 }
 0x95d   :  { %2765 = vmatpush.msra.mxu3 %v5680_v12  ;;  %6617 = vst [vmem:[#allocation88_spill] sm:$0xff] %v5704_v11  ;;  %2746 = vmatpush.msra.mxu2 %v5690_v4  ;;  %v5712_v12 = vld [vmem:[#allocation12 + $0x8] sm:$0xff] }
 0x95e   :  { %2706 = vmatpush.msra.mxu0 %v5684_v51  ;;  %2726 = vmatpush.msra.mxu1 %v5686_v40  ;;  %v5719_v40 = vld [vmem:[#allocation12 + $0x18] sm:$0xff] }
 0x95f   :  { %v3463_v16 = vpop.eup %3462  ;;  %2766 = vmatpush.msra.mxu3 %v5692_v41  ;;  %6619 = vst [vmem:[#allocation90_spill] sm:$0xff] %v5719_v40  ;;  %2747 = vmatpush.msra.mxu2 %v5704_v11  ;;  %v2561_v41 = vpop.f32.mrf.mxu3  ;;  %v5735_v11 = vld [vmem:[%s5896_s5] sm:$0x1]  ;;  %s3749_s5 = smov [#allocation16]  }
 0x960   :  { %v5700_v32 = vadd.f32 1.0, %v3463_v16  ;;  %2707 = vmatpush.msra.mxu0 %v5696_v31  ;;  %2727 = vmatpush.msra.mxu1 %v5698_v49  ;;  %v5717_v16 = vld [vmem:[#allocation12 + $0x10] sm:$0xff]  ;;  %v2583_v49 = vand.u32 2147483648, %v5659_v19  ;;  %s3270_s6 = sshll.u32 %s3749_s5, 4  ;;  %s3271_s6 = int_to_ptr.vmem [resolvable:$true] %s3270_s6 }
 0x961   :  { %2767 = vmatpush.msra.mxu3 %v5706_v36  ;;  %2748 = vmatpush.msra.mxu2 %v5717_v16  ;;  %v2581_v36 = vand.u32 2147483647, %v5659_v19 }
 0x962   :  { %v3465_v37 = vpop.eup %3464  ;;  %3466 = vrcp.f32 %v5700_v32  ;;  %2708 = vmatpush.msra.mxu0 %v5710_v10  ;;  %2728 = vmatpush.msra.mxu1 %v5712_v12  ;;  %vm2600_vm5 = vweird.f32 %v5700_v32 }
 0x963   :  { %v2573_v51 = vmul.f32 %v3465_v37, %v5659_v19  ;;  %2768 = vmatpush.msra.mxu3 %v5719_v40  ;;  %vm2578_vm0 = vweird.f32 %v3465_v37  ;;  %2912 = vmatpush.msrb.mxu2 %v5376_v52  ;;  %v2584_v52 = vor.u32 1.1754944e-38, %v2583_v49  ;;  %vm2582_vm3 = vcmp.eq.f32.partialorder %v2581_v36, 8.507059e+37  ;;  %v6636_v36 = vld [vmem:[#allocation85_spill] sm:$0xff]  ;;  %v6643_v19 = vld [vmem:[#allocation42_spill] sm:$0xff] }
 0x964   :  { %2872 = vmatpush.msrb.mxu0 %v5372_v34  ;;  %2892 = vmatpush.msrb.mxu1 %v5374_v61  ;;  %vm2579_vm2 = vmor %vm2577_vm1, %vm2578_vm0  ;;  %v6654_v49 = vld [vmem:[#allocation53_spill] sm:$0xff] }
 0x965   :  { %v2574_v4 = vsub.f32 1.0, %v2573_v51  ;;  %v2610_v51 = vadd.f32 %v5735_v11, %v2561_v41  ;;  %3061 = vmatpush.msrb.mxu3 %v5527_v22  ;;  %2913 = vmatpush.msrb.mxu2 %v5385_v57  ;;  %v6639_v41 = vld [vmem:[#allocation37_spill] sm:$0xff] }
 0x966   :  { %2873 = vmatpush.msrb.mxu0 %v5381_v44  ;;  %2893 = vmatpush.msrb.mxu1 %v5383_v27 }
 0x967   :  { %v2575_v31 = vmul.f32 %v3465_v37, %v2574_v4  ;;  %3062 = vmatpush.msrb.mxu3 %v5539_v58  ;;  %v2612_v44 = vrot.slane %v2610_v51, 2  ;;  %2914 = vmatpush.msrb.mxu2 %v5394_v42  ;;  %v6638_v58 = vld [vmem:[#allocation35_spill] sm:$0xff]  ;;  %v6640_v4 = vld [vmem:[#allocation38_spill] sm:$0xff] }
 0x968   :  { %v5740_v40 = vpop.eup %3466  ;;  %2874 = vmatpush.msrb.mxu0 %v5390_v9  ;;  %2894 = vmatpush.msrb.mxu1 %v5392_v7  ;;  %v6656_v51 = vld [vmem:[#allocation55_spill] sm:$0xff] }
 0x969   :  { %v2576_v34 = vadd.f32 %v3465_v37, %v2575_v31  ;;  %v2596_v61 = vmul.f32 %v5740_v40, %v5700_v32  ;;  %3063 = vmatpush.msrb.mxu3 %v5551_v38  ;;  %2915 = vmatpush.msrb.mxu2 %v5403_v60  ;;  %vm2601_vm4 = vweird.f32 %v5740_v40  ;;  %v2606_v60 = vand.u32 2147483648, %v5700_v32  ;;  %v6641_v31 = vld [vmem:[#allocation40_spill] sm:$0xff]  ;;  %v6642_v38 = vld [vmem:[#allocation41_spill] sm:$0xff] }
 0x96a   :  { %2875 = vmatpush.msrb.mxu0 %v5399_v1  ;;  %2895 = vmatpush.msrb.mxu1 %v5401_v56  ;;  %vm2602_vm6 = vmor %vm2600_vm5, %vm2601_vm4 }
 0x96b   :  { %v2580_v22 = vsel %vm2579_vm2, %v3465_v37, %v2576_v34  ;;  %3064 = vmatpush.msrb.mxu3 %v5563_v43  ;;  %v2597_v9 = vsub.f32 1.0, %v2596_v61  ;;  %2916 = vmatpush.msrb.mxu2 %v5412_v54  ;;  %v6635_v37 = vld [vmem:[#allocation86_spill] sm:$0xff]  ;;  %v6645_v43 = vld [vmem:[#allocation44_spill] sm:$0xff]  ;;  %v6658_v61 = vld [vmem:[#allocation57_spill] sm:$0xff] }
 0x96c   :  { %v2585_v27 = vsel %vm2582_vm3, %v2584_v52, %v2580_v22  ;;  %2876 = vmatpush.msrb.mxu0 %v5408_v29  ;;  %2896 = vmatpush.msrb.mxu1 %v5410_v5  ;;  %v2604_v5 = vand.u32 2147483647, %v5700_v32  ;;  %v6637_v32 = vld [vmem:[#allocation27_spill] sm:$0xff]  ;;  %v6657_v34 = vld [vmem:[#allocation56_spill] sm:$0xff]  ;;  %v6659_v52 = vld [vmem:[#allocation58_spill] sm:$0xff] }
 0x96d   :  { %v2614_v57 = vmul.f32 %v2612_v44, %v2585_v27  ;;  %3065 = vmatpush.msrb.mxu3 %v5575_v55  ;;  %2917 = vmatpush.msrb.mxu2 %v5421_v13  ;;  %v2598_v42 = vmul.f32 %v5740_v40, %v2597_v9  ;;  %v6647_v55 = vld [vmem:[#allocation46_spill] sm:$0xff]  ;;  %v6660_v22 = vld [vmem:[#allocation59_spill] sm:$0xff]  ;;  %v6661_v44 = vld [vmem:[#allocation60_spill] sm:$0xff] }
 0x96e   :  { %2877 = vmatpush.msrb.mxu0 %v5417_v59  ;;  %2897 = vmatpush.msrb.mxu1 %v5419_v63  ;;  %v2607_v63 = vor.u32 1.1754944e-38, %v2606_v60  ;;  %vm2605_vm7 = vcmp.eq.f32.partialorder %v2604_v5, 8.507059e+37  ;;  %v6662_v27 = vld [vmem:[#allocation61_spill] sm:$0xff]  ;;  %v6664_v9 = vld [vmem:[#allocation63_spill] sm:$0xff]  ;;  %v6669_v60 = vld [vmem:[#allocation68_spill] sm:$0xff] }
 0x96f   :  { %v2615_v7 = vadd.f32 %v2614_v57, %v4233_v6  ;;  %3066 = vmatpush.msrb.mxu3 %v5588_v47  ;;  %2918 = vmatpush.msrb.mxu2 %v5431_v24  ;;  %v2599_v1 = vadd.f32 %v5740_v40, %v2598_v42  ;;  %v6648_v47 = vld [vmem:[#allocation47_spill] sm:$0xff]  ;;  %v6663_v57 = vld [vmem:[#allocation62_spill] sm:$0xff]  ;;  %v6666_v42 = vld [vmem:[#allocation65_spill] sm:$0xff] }
 0x970   :  { %2878 = vmatpush.msrb.mxu0 %v5427_v25  ;;  %2898 = vmatpush.msrb.mxu1 %v5429_v2  ;;  %v6620_v2 = vld [vmem:[#allocation28_spill] sm:$0xff]  ;;  %v6671_v5 = vld [vmem:[#allocation70_spill] sm:$0xff] }
 0x971   :  { %3468 = vtanh.f32 %v2615_v7  ;;  %3067 = vmatpush.msrb.mxu3 %v5600_v48  ;;  %2919 = vmatpush.msrb.mxu2 %v5440_v21  ;;  %v2603_v54 = vsel %vm2602_vm6, %v5740_v40, %v2599_v1  ;;  %v6623_v21 = vld [vmem:[#allocation25_spill] sm:$0xff]  ;;  %v6649_v48 = vld [vmem:[#allocation48_spill] sm:$0xff]  ;;  %v6667_v1 = vld [vmem:[#allocation66_spill] sm:$0xff] }
 0x972   :  { %2879 = vmatpush.msrb.mxu0 %v5436_v35  ;;  %2899 = vmatpush.msrb.mxu1 %v5438_v15  ;;  %v2608_v25 = vsel %vm2605_vm7, %v2607_v63, %v2603_v54  ;;  %v6621_v35 = vld [vmem:[#allocation32_spill] sm:$0xff]  ;;  %v6646_v40 = vld [vmem:[#allocation45_spill] sm:$0xff]  ;;  %v6672_v54 = vld [vmem:[#allocation71_spill] sm:$0xff] }
 0x973   :  { %3068 = vmatpush.msrb.mxu3 %v5612_v20  ;;  %2920 = vmatpush.msrb.mxu2 %v5449_v33  ;;  %v6622_v15 = vld [vmem:[#allocation76_spill] sm:$0xff]  ;;  %v6625_v33 = vld [vmem:[#allocation34_spill] sm:$0xff]  ;;  %v6650_v20 = vld [vmem:[#allocation49_spill] sm:$0xff] }
 0x974   :  { %2880 = vmatpush.msrb.mxu0 %v5445_v30  ;;  %2900 = vmatpush.msrb.mxu1 %v5447_v14  ;;  %v6624_v14 = vld [vmem:[#allocation31_spill] sm:$0xff]  ;;  %v6665_v7 = vld [vmem:[#allocation64_spill] sm:$0xff] }
 0x975   :  { %3069 = vmatpush.msrb.mxu3 %v5625_v18  ;;  %2921 = vmatpush.msrb.mxu2 %v5459_v23  ;;  %v6651_v18 = vld [vmem:[#allocation50_spill] sm:$0xff]  ;;  %v6674_v63 = vld [vmem:[#allocation75_spill] sm:$0xff] }
 0x976   :  { %2881 = vmatpush.msrb.mxu0 %v5455_v45  ;;  %2901 = vmatpush.msrb.mxu1 %v5457_v0  ;;  %v6626_v45 = vld [vmem:[#allocation80_spill] sm:$0xff]  ;;  %v6627_v0 = vld [vmem:[#allocation74_spill] sm:$0xff] }
 0x977   :  { %v3469_v56 = vpop.eup %3468  ;;  %3070 = vmatpush.msrb.mxu3 %v5637_v3  ;;  %2922 = vmatpush.msrb.mxu2 %v5468_v28  ;;  %v6630_v28 = vld [vmem:[#allocation26_spill] sm:$0xff]  ;;  %v6653_v3 = vld [vmem:[#allocation52_spill] sm:$0xff] }
 0x978   :  { %v2618_v29 = vrot.slane %v3469_v56, 6  ;;  %2882 = vmatpush.msrb.mxu0 %v5464_v17  ;;  %2902 = vmatpush.msrb.mxu1 %v5466_v50  ;;  %v6628_v17 = vld [vmem:[#allocation77_spill] sm:$0xff]  ;;  %v6629_v50 = vld [vmem:[#allocation79_spill] sm:$0xff] }
 0x979   :  { %3071 = vmatpush.msrb.mxu3 %v5647_v53  ;;  %2923 = vmatpush.msrb.mxu2 %v6620_v2  ;;  %v6652_v53 = vld [vmem:[#allocation51_spill] sm:$0xff] }
 0x97a   :  { %v2620_v59 = vsub.f32 %v5521_v8, %v2618_v29  ;;  %2883 = vmatpush.msrb.mxu0 %v5473_v46  ;;  %2903 = vmatpush.msrb.mxu1 %v5475_v26  ;;  %v6631_v46 = vld [vmem:[#allocation83_spill] sm:$0xff]  ;;  %v6633_v26 = vld [vmem:[#allocation84_spill] sm:$0xff]  ;;  %v6670_v29 = vld [vmem:[#allocation69_spill] sm:$0xff] }
 0x97b   :  { %3072 = vmatpush.msrb.mxu3 %v5657_v62  ;;  %2924 = vmatpush.msrb.mxu2 %v6623_v21  ;;  %v6634_v8 = vld [vmem:[#allocation36_spill] sm:$0xff]  ;;  %v6644_v62 = vld [vmem:[#allocation43_spill] sm:$0xff] }
 0x97c   :  { %v2622_v13 = vrot.slane %v2620_v59, 2  ;;  %2884 = vmatpush.msrb.mxu0 %v6621_v35  ;;  %2904 = vmatpush.msrb.mxu1 %v6622_v15  ;;  %v6673_v59 = vld [vmem:[#allocation73_spill] sm:$0xff]  ;;  %v6677_v2 = vld [vmem:[#allocation87_spill] sm:$0xff]  ;;  %v6680_v15 = vld [vmem:[#allocation90_spill] sm:$0xff] }
 0x97d   :  { %3073 = vmatpush.msrb.mxu3 %v5671_v39  ;;  %2925 = vmatpush.msrb.mxu2 %v6626_v45  ;;  %v6632_v39 = vld [vmem:[#allocation33_spill] sm:$0xff] }
 0x97e   :  { %v2624_v24 = vmul.f32 %v2622_v13, %v2608_v25  ;;  %2885 = vmatpush.msrb.mxu0 %v6624_v14  ;;  %2905 = vmatpush.msrb.mxu1 %v6625_v33  ;;  %v6675_v13 = vld [vmem:[#allocation78_spill] sm:$0xff]  ;;  %v6676_v25 = vld [vmem:[#allocation81_spill] sm:$0xff] }
 0x97f   :  { %3074 = vmatpush.msrb.mxu3 %v6627_v0  ;;  %2926 = vmatpush.msrb.mxu2 %v6630_v28  ;;  %v6679_v35 = vld [vmem:[#allocation89_spill] sm:$0xff]  ;;  %v6681_v33 = vld [vmem:[#allocation30_spill] sm:$0xff]  ;;  %v6682_v0 = vld [vmem:[#allocation72_spill] sm:$0xff] }
 0x980   :  { %v5802_v30 = vadd.f32 %v3469_v56, %v2624_v24  ;;  %2886 = vmatpush.msrb.mxu0 %v6628_v17  ;;  %2906 = vmatpush.msrb.mxu1 %v6629_v50  ;;  %v6668_v56 = vld [vmem:[#allocation67_spill] sm:$0xff]  ;;  %v6678_v24 = vld [vmem:[#allocation88_spill] sm:$0xff] }
 0x981   :  { %3075 = vmatpush.msrb.mxu3 %v6631_v46  ;;  %2927 = vmatpush.msrb.mxu2 %v6634_v8 }
 0x982   :  { %v2691_v23 = vrot.slane %v5802_v30, 6  ;;  %2887 = vmatpush.msrb.mxu0 %v6632_v39  ;;  %2907 = vmatpush.msrb.mxu1 %v6633_v26 }
 0x983   :  { %3076 = vmatpush.msrb.mxu3 %v5710_v10  ;;  %v6655_v10 = vld [vmem:[#allocation54_spill] sm:$0xff] }
 0x984   :  { %2709 = vmatmul.f32.vlgmr.msra.gmra.mxu0 %v2691_v23  ;;  %2729 = vmatmul.f32.vlgmr.msra.gmra.mxu1 %v2691_v23 }
 0x985   :  { %2749 = vmatmul.f32.vlgmr.msra.gmra.mxu2 %v2691_v23  ;;  %2769 = vmatmul.f32.vlgmr.msra.gmra.mxu3 %v2691_v23 }
 0x986   :  { %3081 = vmatpush.msra.mxu0 %v6635_v37  ;;  %3101 = vmatpush.msra.mxu1 %v6636_v36 }
 0x987   :  { %3121 = vmatpush.msra.mxu2 %v6637_v32 }
 0x988   :  { %3082 = vmatpush.msra.mxu0 %v6638_v58  ;;  %3102 = vmatpush.msra.mxu1 %v6639_v41 }
 0x989   :  { %3122 = vmatpush.msra.mxu2 %v6640_v4 }
 0x98a   :  { %3083 = vmatpush.msra.mxu0 %v6641_v31  ;;  %3103 = vmatpush.msra.mxu1 %v6642_v38 }
 0x98b   :  { %3123 = vmatpush.msra.mxu2 %v6643_v19 }
 0x98c   :  { %3084 = vmatpush.msra.mxu0 %v6644_v62  ;;  %3104 = vmatpush.msra.mxu1 %v6645_v43  ;;  %v6683_v62 = vld [vmem:[#allocation24_spill] sm:$0xff] }
 0x98d   :  { %3124 = vmatpush.msra.mxu2 %v6646_v40 }
 0x98e   :  { %3085 = vmatpush.msra.mxu0 %v6647_v55  ;;  %3105 = vmatpush.msra.mxu1 %v6648_v47  ;;  %v6684_v47 = vld [vmem:[#allocation29_spill] sm:$0xff] }
 0x98f   :  { %3125 = vmatpush.msra.mxu2 %v6649_v48 }
 0x990   :  { %3086 = vmatpush.msra.mxu0 %v6650_v20  ;;  %3106 = vmatpush.msra.mxu1 %v6651_v18 }
 0x991   :  { %3126 = vmatpush.msra.mxu2 %v6652_v53 }
 0x992   :  { %3087 = vmatpush.msra.mxu0 %v6653_v3  ;;  %3107 = vmatpush.msra.mxu1 %v6654_v49 }
 0x993   :  { %3127 = vmatpush.msra.mxu2 %v6655_v10 }
 0x994   :  { %3088 = vmatpush.msra.mxu0 %v6656_v51  ;;  %3108 = vmatpush.msra.mxu1 %v6657_v34 }
 0x995   :  { %3128 = vmatpush.msra.mxu2 %v6658_v61 }
 0x996   :  { %3089 = vmatpush.msra.mxu0 %v6659_v52  ;;  %3109 = vmatpush.msra.mxu1 %v6660_v22 }
 0x997   :  { %3129 = vmatpush.msra.mxu2 %v6661_v44 }
 0x998   :  { %3090 = vmatpush.msra.mxu0 %v6662_v27  ;;  %3110 = vmatpush.msra.mxu1 %v6663_v57 }
 0x999   :  { %3130 = vmatpush.msra.mxu2 %v6664_v9 }
 0x99a   :  { %3091 = vmatpush.msra.mxu0 %v6665_v7  ;;  %3111 = vmatpush.msra.mxu1 %v6666_v42 }
 0x99b   :  { %3131 = vmatpush.msra.mxu2 %v6667_v1 }
 0x99c   :  { %3092 = vmatpush.msra.mxu0 %v6668_v56  ;;  %3112 = vmatpush.msra.mxu1 %v6669_v60 }
 0x99d   :  { %3132 = vmatpush.msra.mxu2 %v6670_v29  ;;  %v6685_v29 = vld [vmem:[#allocation39_spill] sm:$0xff] }
 0x99e   :  { %3093 = vmatpush.msra.mxu0 %v6671_v5  ;;  %3113 = vmatpush.msra.mxu1 %v6672_v54  ;;  %v6686_v54 = vld [vmem:[#allocation82_spill] sm:$0xff] }
 0x99f   :  { %3133 = vmatpush.msra.mxu2 %v6673_v59 }
 0x9a0   :  { %3094 = vmatpush.msra.mxu0 %v6674_v63  ;;  %3114 = vmatpush.msra.mxu1 %v6675_v13 }
 0x9a1   :  { %3134 = vmatpush.msra.mxu2 %v6676_v25 }
 0x9a2   :  { %3095 = vmatpush.msra.mxu0 %v6677_v2  ;;  %3115 = vmatpush.msra.mxu1 %v6678_v24 }
 0x9a3   :  { %3135 = vmatpush.msra.mxu2 %v6679_v35 }
 0x9a4   :  { %3096 = vmatpush.msra.mxu0 %v5712_v12  ;;  %3116 = vmatpush.msra.mxu1 %v5717_v16 }
 0x9a5   :  { %3136 = vmatpush.msra.mxu2 %v6680_v15 }
 0xa01   :  { %v2710_v21 = vpop.f32.mrf.mxu0  ;;  %v2730_v14 = vpop.f32.mrf.mxu1 }
 0xa02   :  { %v2711_v45 = vadd.f32 %v2710_v21, %v6681_v33  ;;  %v2731_v23 = vadd.f32 %v2730_v14, %v6682_v0 }
 0xa04   :  { %v3316_v17 = vmul.f32 -1.442695, %v2711_v45  ;;  %v3317_v50 = vmul.f32 -1.442695, %v2731_v23 }
 0xa06   :  { %3470 = vpow2.f32 %v3316_v17 }
 0xa07   :  { %3472 = vpow2.f32 %v3317_v50 }
 0xa08   :  { %v2770_v41 = vpop.f32.mrf.mxu3  ;;  %v2750_v38 = vpop.f32.mrf.mxu2 }
 0xa09   :  { %v2771_v43 = vadd.f32 %v2770_v41, %v6683_v62  ;;  %v2751_v48 = vadd.f32 %v2750_v38, %v6684_v47 }
 0xa0c   :  { %v3471_v28 = vpop.eup %3470 }
 0xa0d   :  { %v3473_v46 = vpop.eup %3472  ;;  %v2776_v39 = vadd.f32 1.0, %v3471_v28 }
 0xa0e   :  { %v2795_v26 = vadd.f32 1.0, %v3473_v46 }
 0xa0f   :  { %3474 = vrcp.f32 %v2776_v39  ;;  %v2788_v37 = vand.u32 2147483648, %v2776_v39  ;;  %v2786_v58 = vand.u32 2147483647, %v2776_v39  ;;  %vm2782_vm9 = vweird.f32 %v2776_v39 }
 0xa10   :  { %3476 = vrcp.f32 %v2795_v26  ;;  %v2807_v51 = vand.u32 2147483648, %v2795_v26  ;;  %vm2801_vm13 = vweird.f32 %v2795_v26  ;;  %v2805_v34 = vand.u32 2147483647, %v2795_v26 }
 0xa11   :  { %v2789_v19 = vor.u32 1.1754944e-38, %v2788_v37  ;;  %vm2787_vm11 = vcmp.eq.f32.partialorder %v2786_v58, 8.507059e+37 }
 0xa12   :  { %v2808_v44 = vor.u32 1.1754944e-38, %v2807_v51  ;;  %vm2806_vm15 = vcmp.eq.f32.partialorder %v2805_v34, 8.507059e+37 }
 0xa15   :  { %v3475_v12 = vpop.eup %3474 }
 0xa16   :  { %v2778_v16 = vmul.f32 %v3475_v12, %v2776_v39  ;;  %v3477_v36 = vpop.eup %3476  ;;  %vm2783_vm8 = vweird.f32 %v3475_v12 }
 0xa17   :  { %v2797_v31 = vmul.f32 %v3477_v36, %v2795_v26  ;;  %vm2784_vm10 = vmor %vm2782_vm9, %vm2783_vm8  ;;  %vm2802_vm12 = vweird.f32 %v3477_v36 }
 0xa18   :  { %v2779_v8 = vsub.f32 1.0, %v2778_v16  ;;  %vm2803_vm14 = vmor %vm2801_vm13, %vm2802_vm12 }
 0xa19   :  { %v2798_v18 = vsub.f32 1.0, %v2797_v31 }
 0xa1a   :  { %v2780_v32 = vmul.f32 %v3475_v12, %v2779_v8 }
 0xa1b   :  { %v2799_v3 = vmul.f32 %v3477_v36, %v2798_v18 }
 0xa1c   :  { %v2781_v4 = vadd.f32 %v3475_v12, %v2780_v32 }
 0xa1d   :  { %v2800_v49 = vadd.f32 %v3477_v36, %v2799_v3  ;;  %v3208_v3 = vld [vmem:[#allocation14 + $0x78] sm:$0xff] }
 0xa1e   :  { %v2785_v40 = vsel %vm2784_vm10, %v3475_v12, %v2781_v4  ;;  %3213 = vmatpush.msra.mxu3 %v3208_v3 }
 0xa1f   :  { %v2790_v55 = vsel %vm2787_vm11, %v2789_v19, %v2785_v40  ;;  %v2804_v22 = vsel %vm2803_vm14, %v3477_v36, %v2800_v49 }
 0xa20   :  { %v2811_v20 = vmul.f32 %v2790_v55, %v2771_v43  ;;  %v2809_v57 = vsel %vm2806_vm15, %v2808_v44, %v2804_v22  ;;  %v3205_v44 = vld [vmem:[#allocation14 + $0x60] sm:$0xff] }
 0xa22   :  { %v2812_v53 = vadd.f32 %v2811_v20, %v2751_v48 }
 0xa24   :  { %3478 = vtanh.f32 %v2812_v53 }
 0xa2a   :  { %v3479_v10 = vpop.eup %3478 }
 0xa2b   :  { %v2815_v61 = vrot.slane %v3479_v10, 2 }
 0xa2d   :  { %v2817_v52 = vsub.f32 %v5802_v30, %v2815_v61  ;;  %v3206_v61 = vld [vmem:[#allocation14 + $0x68] sm:$0xff] }
 0xa2f   :  { %v2819_v27 = vrot.slane %v2817_v52, 6 }
 0xa31   :  { %v2821_v9 = vmul.f32 %v2819_v27, %v2809_v57  ;;  %v3204_v27 = vld [vmem:[#allocation14 + $0x58] sm:$0xff]  ;;  %v3203_v57 = vld [vmem:[#allocation14 + $0x50] sm:$0xff] }
 0xa33   :  { %v2822_v7 = vadd.f32 %v3479_v10, %v2821_v9  ;;  %v3207_v10 = vld [vmem:[#allocation14 + $0x70] sm:$0xff]  ;;  %v3202_v9 = vld [vmem:[#allocation14 + $0x48] sm:$0xff] }
 0xa34   :  { %3214 = vmatpush.msra.mxu3 %v3207_v10 }
 0xa35   :  { %2823 = vst [vmem:[#allocation2 + $0x6] sm:$0x1] %v2822_v7  ;;  %2888 = vmatmul.f32.vlgmr.msrb.gmra.mxu0 %v2822_v7  ;;  %2908 = vmatmul.f32.vlgmr.msrb.gmra.mxu1 %v2822_v7 }
 0xa36   :  { %2928 = vmatmul.f32.vlgmr.msrb.gmra.mxu2 %v2822_v7  ;;  %3215 = vmatpush.msra.mxu3 %v3206_v61 }
 0xa38   :  { %3216 = vmatpush.msra.mxu3 %v3205_v44 }
 0xa3a   :  { %3217 = vmatpush.msra.mxu3 %v3204_v27 }
 0xa3c   :  { %3218 = vmatpush.msra.mxu3 %v3203_v57 }
 0xa3e   :  { %3219 = vmatpush.msra.mxu3 %v3202_v9 }
 0xab2   :  { %v2889_v42 = vpop.f32.mrf.mxu0  ;;  %v2909_v1 = vpop.f32.mrf.mxu1 }
 0xab3   :  { %v2933_v56 = vrot.slane %v2889_v42, 1  ;;  %v2956_v60 = vrot.slane %v2909_v1, 1 }
 0xab5   :  { %v2935_v5 = vadd.f32 %v2933_v56, %v6685_v29  ;;  %v2958_v59 = vadd.f32 %v2956_v60, %v6686_v54  ;;  %v3199_v60 = vld [vmem:[#allocation14 + $0x30] sm:$0xff]  ;;  %v3198_v29 = vld [vmem:[#allocation14 + $0x28] sm:$0xff] }
 0xab7   :  { %v3318_v30 = vmul.f32 -1.442695, %v2935_v5  ;;  %v3319_v63 = vmul.f32 -1.442695, %v2958_v59  ;;  %v3197_v5 = vld [vmem:[#allocation14 + $0x20] sm:$0xff] }
 0xab9   :  { %3480 = vpow2.f32 %v3318_v30  ;;  %v2929_v21 = vpop.f32.mrf.mxu2  ;;  %v3196_v30 = vld [vmem:[#allocation14 + $0x18] sm:$0xff] }
 0xaba   :  { %3482 = vpow2.f32 %v3319_v63  ;;  %v2978_v28 = vadd.f32 %v5735_v11, %v2929_v21  ;;  %v3195_v63 = vld [vmem:[#allocation14 + $0x10] sm:$0xff]  ;;  %v3193_v21 = vld [vmem:[#allocation14] sm:$0xff] }
 0xabc   :  { %v2980_v16 = vrot.slane %v2978_v28, 1 }
 0xabf   :  { %v3481_v13 = vpop.eup %3480 }
 0xac0   :  { %v3483_v25 = vpop.eup %3482  ;;  %v2939_v2 = vadd.f32 1.0, %v3481_v13 }
 0xac1   :  { %v2962_v24 = vadd.f32 1.0, %v3483_v25  ;;  %v3194_v25 = vld [vmem:[#allocation14 + $0x8] sm:$0xff] }
 0xac2   :  { %3484 = vrcp.f32 %v2939_v2  ;;  %v2951_v45 = vand.u32 2147483648, %v2939_v2  ;;  %v2949_v50 = vand.u32 2147483647, %v2939_v2  ;;  %vm2945_vm1 = vweird.f32 %v2939_v2 }
 0xac3   :  { %3486 = vrcp.f32 %v2962_v24  ;;  %v2974_v31 = vand.u32 2147483648, %v2962_v24  ;;  %vm2968_vm5 = vweird.f32 %v2962_v24  ;;  %v2972_v38 = vand.u32 2147483647, %v2962_v24 }
 0xac4   :  { %v2952_v26 = vor.u32 1.1754944e-38, %v2951_v45  ;;  %vm2950_vm3 = vcmp.eq.f32.partialorder %v2949_v50, 8.507059e+37 }
 0xac5   :  { %v2975_v40 = vor.u32 1.1754944e-38, %v2974_v31  ;;  %vm2973_vm7 = vcmp.eq.f32.partialorder %v2972_v38, 8.507059e+37 }
 0xac8   :  { %v3485_v35 = vpop.eup %3484 }
 0xac9   :  { %v2941_v15 = vmul.f32 %v3485_v35, %v2939_v2  ;;  %v3487_v23 = vpop.eup %3486  ;;  %vm2946_vm0 = vweird.f32 %v3485_v35 }
 0xaca   :  { %v2964_v39 = vmul.f32 %v3487_v23, %v2962_v24  ;;  %vm2947_vm2 = vmor %vm2945_vm1, %vm2946_vm0  ;;  %vm2969_vm4 = vweird.f32 %v3487_v23 }
 0xacb   :  { %v2942_v14 = vsub.f32 1.0, %v2941_v15  ;;  %vm2970_vm6 = vmor %vm2968_vm5, %vm2969_vm4 }
 0xacc   :  { %v2965_v36 = vsub.f32 1.0, %v2964_v39 }
 0xacd   :  { %v2943_v17 = vmul.f32 %v3485_v35, %v2942_v14 }
 0xace   :  { %v2966_v58 = vmul.f32 %v3487_v23, %v2965_v36 }
 0xacf   :  { %v2944_v46 = vadd.f32 %v3485_v35, %v2943_v17 }
 0xad0   :  { %v2967_v41 = vadd.f32 %v3487_v23, %v2966_v58 }
 0xad1   :  { %v2948_v12 = vsel %vm2947_vm2, %v3485_v35, %v2944_v46 }
 0xad2   :  { %v2953_v8 = vsel %vm2950_vm3, %v2952_v26, %v2948_v12  ;;  %v2971_v19 = vsel %vm2970_vm6, %v3487_v23, %v2967_v41 }
 0xad3   :  { %v2982_v37 = vmul.f32 %v2980_v16, %v2953_v8  ;;  %v2976_v48 = vsel %vm2973_vm7, %v2975_v40, %v2971_v19 }
 0xad5   :  { %v2983_v32 = vadd.f32 %v2982_v37, %v4233_v6 }
 0xad7   :  { %3488 = vtanh.f32 %v2983_v32 }
 0xadd   :  { %v3489_v4 = vpop.eup %3488 }
 0xade   :  { %v2986_v11 = vrot.slane %v3489_v4, 7 }
 0xae0   :  { %v2988_v43 = vsub.f32 %v2822_v7, %v2986_v11  ;;  %v3201_v7 = vld [vmem:[#allocation14 + $0x40] sm:$0xff] }
 0xae1   :  { %3220 = vmatpush.msra.mxu3 %v3201_v7 }
 0xae2   :  { %v2990_v55 = vrot.slane %v2988_v43, 1 }
 0xae4   :  { %v2992_v20 = vmul.f32 %v2990_v55, %v2976_v48  ;;  %v3339_v55 = vld [vmem:[%s5900_s9] ss:$0 sm:$0xff]  ;;  %s3261_s9 = sshll.u32 %s5901_s10, 4  ;;  %s3262_s9 = int_to_ptr.hbm [resolvable:$true] %s3261_s9 }
 0xae6   :  { %v5874_v18 = vadd.f32 %v3489_v4, %v2992_v20 }
 0xae8   :  { %v3059_v6 = vrot.slane %v5874_v18, 7 }
 0xaea   :  { %3077 = vmatmul.f32.vlgmr.msrb.gmra.mxu3 %v3059_v6  ;;  %3097 = vmatmul.f32.vlgmr.msra.gmra.mxu0 %v3059_v6 }
 0xaeb   :  { %3117 = vmatmul.f32.vlgmr.msra.gmra.mxu1 %v3059_v6  ;;  %3137 = vmatmul.f32.vlgmr.msra.gmra.mxu2 %v3059_v6 }
 0xb67   :  { %v3098_v53 = vpop.f32.mrf.mxu0 }
 0xb68   :  { %v3099_v49 = vadd.f32 %v3098_v53, %v6682_v0  ;;  %v3118_v17 = vpop.f32.mrf.mxu1 }
 0xb69   :  { %v3119_v26 = vadd.f32 %v3118_v17, %v6684_v47 }
 0xb6a   :  { %v3321_v52 = vmul.f32 -1.442695, %v3099_v49 }
 0xb6d   :  { %v3078_v51 = vpop.f32.mrf.mxu3 }
 0xb6e   :  { %v3079_v34 = vadd.f32 %v3078_v51, %v6681_v33  ;;  %v3200_v33 = vld [vmem:[#allocation14 + $0x38] sm:$0xff]  ;;  %v3138_v14 = vpop.f32.mrf.mxu2 }
 0xb6f   :  { %3221 = vmatpush.msra.mxu3 %v3200_v33  ;;  %v3139_v28 = vadd.f32 %v3138_v14, %v6683_v62 }
 0xb70   :  { %v3320_v22 = vmul.f32 -1.442695, %v3079_v34 }
 0xb71   :  { %3222 = vmatpush.msra.mxu3 %v3199_v60 }
 0xb72   :  { %3490 = vpow2.f32 %v3320_v22 }
 0xb73   :  { %3492 = vpow2.f32 %v3321_v52  ;;  %3223 = vmatpush.msra.mxu3 %v3198_v29 }
 0xb75   :  { %3224 = vmatpush.msra.mxu3 %v3197_v5 }
 0xb77   :  { %3225 = vmatpush.msra.mxu3 %v3196_v30 }
 0xb78   :  { %v3491_v0 = vpop.eup %3490 }
 0xb79   :  { %v3493_v42 = vpop.eup %3492  ;;  %v3144_v1 = vadd.f32 1.0, %v3491_v0  ;;  %3226 = vmatpush.msra.mxu3 %v3195_v63 }
 0xb7a   :  { %v3163_v56 = vadd.f32 1.0, %v3493_v42 }
 0xb7b   :  { %3494 = vrcp.f32 %v3144_v1  ;;  %v3156_v2 = vand.u32 2147483648, %v3144_v1  ;;  %v3154_v15 = vand.u32 2147483647, %v3144_v1  ;;  %3227 = vmatpush.msra.mxu3 %v3194_v25  ;;  %vm3150_vm9 = vweird.f32 %v3144_v1 }
 0xb7c   :  { %3496 = vrcp.f32 %v3163_v56  ;;  %v3175_v58 = vand.u32 2147483648, %v3163_v56  ;;  %vm3169_vm13 = vweird.f32 %v3163_v56  ;;  %v3173_v41 = vand.u32 2147483647, %v3163_v56 }
 0xb7d   :  { %v3157_v50 = vor.u32 1.1754944e-38, %v3156_v2  ;;  %3228 = vmatpush.msra.mxu3 %v3193_v21  ;;  %vm3155_vm11 = vcmp.eq.f32.partialorder %v3154_v15, 8.507059e+37 }
 0xb7e   :  { %v3176_v11 = vor.u32 1.1754944e-38, %v3175_v58  ;;  %vm3174_vm15 = vcmp.eq.f32.partialorder %v3173_v41, 8.507059e+37 }
 0xb81   :  { %v3495_v54 = vpop.eup %3494 }
 0xb82   :  { %v3146_v59 = vmul.f32 %v3495_v54, %v3144_v1  ;;  %v3497_v24 = vpop.eup %3496  ;;  %vm3151_vm8 = vweird.f32 %v3495_v54 }
 0xb83   :  { %v3165_v23 = vmul.f32 %v3497_v24, %v3163_v56  ;;  %vm3152_vm10 = vmor %vm3150_vm9, %vm3151_vm8  ;;  %vm3170_vm12 = vweird.f32 %v3497_v24 }
 0xb84   :  { %v3147_v13 = vsub.f32 1.0, %v3146_v59  ;;  %vm3171_vm14 = vmor %vm3169_vm13, %vm3170_vm12 }
 0xb85   :  { %v3166_v16 = vsub.f32 1.0, %v3165_v23 }
 0xb86   :  { %v3148_v35 = vmul.f32 %v3495_v54, %v3147_v13 }
 0xb87   :  { %v3167_v37 = vmul.f32 %v3497_v24, %v3166_v16 }
 0xb88   :  { %v3149_v45 = vadd.f32 %v3495_v54, %v3148_v35 }
 0xb89   :  { %v3168_v36 = vadd.f32 %v3497_v24, %v3167_v37 }
 0xb8a   :  { %v3153_v46 = vsel %vm3152_vm10, %v3495_v54, %v3149_v45 }
 0xb8b   :  { %v3158_v39 = vsel %vm3155_vm11, %v3157_v50, %v3153_v46  ;;  %v3172_v31 = vsel %vm3171_vm14, %v3497_v24, %v3168_v36 }
 0xb8c   :  { %v3179_v12 = vmul.f32 %v3158_v39, %v3139_v28  ;;  %v3177_v47 = vsel %vm3174_vm15, %v3176_v11, %v3172_v31 }
 0xb8e   :  { %v3180_v8 = vadd.f32 %v3179_v12, %v3119_v26 }
 0xb90   :  { %3498 = vtanh.f32 %v3180_v8 }
 0xb96   :  { %v3499_v32 = vpop.eup %3498 }
 0xb97   :  { %v3183_v4 = vrot.slane %v3499_v32, 1 }
 0xb99   :  { %v3185_v62 = vsub.f32 %v5874_v18, %v3183_v4 }
 0xb9b   :  { %v3187_v38 = vrot.slane %v3185_v62, 7 }
 0xb9d   :  { %v3189_v19 = vmul.f32 %v3187_v38, %v3177_v47 }
 0xb9f   :  { %v3190_v43 = vadd.f32 %v3499_v32, %v3189_v19 }
 0xba1   :  { %3191 = vst [vmem:[#allocation2 + $0x7] sm:$0x1] %v3190_v43 }
 0xba2   :  { %3253 = vst [vmem:[#allocation16] sm:$0x1] %v3190_v43 }
 0xba3   :  { %3275 = dma.vmem_to_hbm [thread:$0]  %s3271_s6, 16, %s3273_s22, [#allocation17]  }
 0xba8   :  { %v3192_v40 = vld [vmem:[#allocation2] sm:$0xff] }
 0xba9   :  { %3229 = vmatmul.f32.vlgmr.msra.gmra.mxu3 %v3192_v40 }
 0xc2c   :  { %v3230_v48 = vpop.f32.mrf.mxu3 }
 0xc2d   :  { %v3231_v20 = vadd.f32 %v3339_v55, %v3230_v48 }
 0xc2f   :  { %v3322_v18 = vmul.f32 -1.442695, %v3231_v20 }
 0xc31   :  { %3500 = vpow2.f32 %v3322_v18 }
 0xc37   :  { %v3501_v6 = vpop.eup %3500 }
 0xc38   :  { %v3236_v53 = vadd.f32 1.0, %v3501_v6 }
 0xc3a   :  { %3502 = vrcp.f32 %v3236_v53  ;;  %v3248_v51 = vand.u32 2147483648, %v3236_v53  ;;  %v3246_v61 = vand.u32 2147483647, %v3236_v53  ;;  %vm3242_vm1 = vweird.f32 %v3236_v53 }
 0xc3c   :  { %v3249_v22 = vor.u32 1.1754944e-38, %v3248_v51  ;;  %vm3247_vm3 = vcmp.eq.f32.partialorder %v3246_v61, 8.507059e+37 }
 0xc40   :  { %v3503_v3 = vpop.eup %3502 }
 0xc41   :  { %v3238_v49 = vmul.f32 %v3503_v3, %v3236_v53  ;;  %vm3243_vm0 = vweird.f32 %v3503_v3 }
 0xc42   :  { %vm3244_vm2 = vmor %vm3242_vm1, %vm3243_vm0 }
 0xc43   :  { %v3239_v10 = vsub.f32 1.0, %v3238_v49 }
 0xc45   :  { %v3240_v34 = vmul.f32 %v3503_v3, %v3239_v10 }
 0xc47   :  { %v3241_v52 = vadd.f32 %v3503_v3, %v3240_v34 }
 0xc49   :  { %v3245_v44 = vsel %vm3244_vm2, %v3503_v3, %v3241_v52 }
 0xc4a   :  { %v3250_v27 = vsel %vm3247_vm3, %v3249_v22, %v3245_v44 }
 0xc4b   :  { %3252 = vst [vmem:[#allocation15] sm:$0xff] %v3250_v27 }
 0xc4c   :  { %3264 = dma.vmem_to_hbm [thread:$0]  %s3260_s24, 128, %s3262_s9, [#allocation5]  }
 0xc4d   :  { %3731 = dma.done.wait [#allocation5], 128  }
 0xc4e   :  { %3732 = vsyncadd [#allocation5], 4294967168 }
 0xc4f   :  { %3733 = dma.done.wait [#allocation17], 16  }
 0xc50   :  { %3734 = vsyncadd [#allocation17], 4294967280 }
 0xc51   :  { %3284 = vsyncpa [#allocation4], 1 }
 0xc52   :  { %3285 = vsyncpa [#allocation7], 1 }
 0xc53   :  { %3286 = vsyncpa [#allocation10], 1 }
 0xc54   :  { %3287 = vsyncpa [#allocation13], 1 }
 0xc55   :  { %3288 = vsyncpa [#allocation5], 1 }
 0xc56   :  { %3289 = vsyncpa [#allocation17], 1 }

</bundles_post_ra>
